<compile_context>
chip_gen: v5e
topology: v5e:2x2
jax: 0.10.0
libtpu: 0.0.40
codegen_flags: <defaults>
</compile_context>

<pallas_src>
import jax
import jax.numpy as jnp
import numpy as np
from jax.experimental import pallas as pl
from jax.experimental.pallas import tpu as pltpu


def _sigmoid(x):
    # single-EUP-pass sigmoid: 0.5*(tanh(x/2)+1) == sigmoid(x)
    return 0.5 * jnp.tanh(0.5 * x) + 0.5


# -----------------------------------------------------------------------------
# Pallas kernel: T_BLK ELMKT timesteps per grid point.
#   grid = (B_pad // bt, T_pad // T_BLK), semantics ("parallel", "arbitrary")
# Streamed blocks (time-major):
#   qn : (T_BLK, bt, C)   q_matrix rows for question at t+1
#   g  : (T_BLK, bt, 2D)  precomputed gate contribution (le_pre, it, le_cur)+bias
#   f  : (T_BLK, bt, D)   precomputed forgetting-gate contribution (it)+bias
#   p  : (T_BLK, bt, D)   precomputed predictor contribution (q_emb[t+1])+bias
# Per-batch-chunk / resident: qsel0 (bt,C), h0 (C,D), fused/in-loop weights.
# Carried state (VMEM scratch): h (bt,C,D), gate pre-act (bt,2D), q_cur (bt,C).
# Output: resident (T_pad, bt) score block, index depends only on batch chunk.
# -----------------------------------------------------------------------------
def elmkt_block_kernel(q0_ref, qn_ref, g_ref, f_ref, p_ref, h0_ref,
                       wgap_ref, woh_ref, wola_ref,
                       out_ref, h_state, gpre_state, qcur_state):
    tb = pl.program_id(1)
    t_blk = qn_ref.shape[0]
    bt, C, D = h_state.shape
    cdt = wgap_ref.dtype                     # MXU operand dtype (bf16 or f32)

    wgap = wgap_ref[...]                     # (D, 3D)  [Wg_h | Wa_h | Wp_h]
    woh = woh_ref[...]                       # (D, D)   forgetting gate, h block
    wola = wola_ref[...]                     # (D, D)   forgetting gate, la block

    @pl.when(tb == 0)
    def _init():
        h_init = jnp.broadcast_to(h0_ref[...][None, :, :],
                                  (bt, C, D)).astype(jnp.float32)
        h_state[...] = h_init
        q0 = q0_ref[...].astype(jnp.float32)                         # (bt, C)
        qcur_state[...] = q0
        h_tilde0 = jnp.sum(q0[:, :, None] * h_init, axis=1)          # (bt, D)
        z0 = jnp.dot(h_tilde0.astype(cdt), wgap,
                     preferred_element_type=jnp.float32)             # (bt, 3D)
        gpre_state[...] = z0[:, :2 * D]

    h = h_state[...]                         # (bt, C, D) f32 carried state
    gpre = gpre_state[...]                   # (bt, 2D)   h_tilde gate pre-act
    q_cur = qcur_state[...]                  # (bt, C)

    scores = []
    for i in range(t_blk):                   # unrolled timestep loop
        gate = gpre + g_ref[i].astype(jnp.float32)                   # (bt, 2D)
        lg = jnp.tanh(gate[:, :D])
        la = _sigmoid(gate[:, D:]) * (lg + 1.0) * 0.5                # (bt, D)

        # actual learning gain: q_cur outer la  (dropout == identity, eval)
        alg = q_cur[:, :, None] * la[:, None, :]                     # (bt, C, D)

        # forgetting gate; interval-time part precomputed in f_ref
        f_vec = (jnp.dot(la.astype(cdt), wola,
                         preferred_element_type=jnp.float32)
                 + f_ref[i].astype(jnp.float32))                     # (bt, D)
        gamma = jnp.dot(h.reshape(bt * C, D).astype(cdt), woh,
                        preferred_element_type=jnp.float32).reshape(bt, C, D)
        h = alg + _sigmoid(gamma + f_vec[:, None, :]) * h            # (bt, C, D)

        q_next = qn_ref[i].astype(jnp.float32)                       # (bt, C)
        h_tilde = jnp.sum(q_next[:, :, None] * h, axis=1)            # (bt, D)

        # fused next-step-gate / predictor matmul: [Wg_h | Wa_h | Wp_h]
        z = jnp.dot(h_tilde.astype(cdt), wgap,
                    preferred_element_type=jnp.float32)              # (bt, 3D)
        gpre = z[:, :2 * D]
        pred = _sigmoid(z[:, 2 * D:] + p_ref[i].astype(jnp.float32)) # (bt, D)
        scores.append(jnp.sum(pred, axis=-1, keepdims=True) * (1.0 / D))
        q_cur = q_next

    # carry state to the next timestep block
    h_state[...] = h
    gpre_state[...] = gpre
    qcur_state[...] = q_cur

    # lane-dense resident output: t_blk rows written at an aligned offset;
    # single HBM writeback per batch chunk (out index_map depends only on b).
    score_blk = jnp.transpose(jnp.concatenate(scores, axis=1))       # (t_blk, bt)
    row0 = pl.multiple_of(tb * t_blk, t_blk)
    out_ref[pl.ds(row0, t_blk), :] = score_blk


def elmkt_pallas(q0, q_next, g_steps, f_steps, p_next, h0,
                 wgap, woh, wola, *, bt, t_blk, vmem_margin_bytes=16 << 20):
    Tp, B_pad, C = q_next.shape
    D = h0.shape[1]
    assert Tp % t_blk == 0 and t_blk % 8 == 0, "t_blk must be a multiple of 8"
    assert B_pad % bt == 0 and bt % 8 == 0, "bt must divide B_pad, multiple of 8"
    assert bt == B_pad or bt % 128 == 0, (
        "bt must equal the padded batch or be a multiple of 128 so every block "
        "keeps (8,128)-friendly minor dims and the output stays lane-dense")
    n_b, n_t = B_pad // bt, Tp // t_blk

    stream = lambda b, t: (t, b, 0)
    perb = lambda b, t: (b, 0)
    const = lambda b, t: (0, 0)

    # explicit VMEM budget (double-buffered streams + weights + state + output)
    sbytes = q_next.dtype.itemsize
    wbytes = wgap.dtype.itemsize
    est = (2 * t_blk * bt * (C + 4 * D) * sbytes        # streamed input blocks
           + bt * C * sbytes                            # qsel0 block
           + 5 * D * D * wbytes + C * D * 4             # weights + h0
           + Tp * bt * 4                                # resident score block
           + bt * (C * D + 2 * D + C) * 4)              # carried-state scratch
    # keep <= ~48 MiB on v7x (64 MiB physical) by choosing a smaller bt there.
    vmem_limit = int(min(max(2 * est + vmem_margin_bytes, 32 << 20), 100 << 20))

    out = pl.pallas_call(
        elmkt_block_kernel,
        out_shape=jax.ShapeDtypeStruct((Tp, B_pad), jnp.float32),
        grid_spec=pltpu.PrefetchScalarGridSpec(
            num_scalar_prefetch=0,
            grid=(n_b, n_t),
            in_specs=[
                pl.BlockSpec((bt, C), perb),               # q rows at t = 0
                pl.BlockSpec((t_blk, bt, C), stream),      # q rows at t + 1
                pl.BlockSpec((t_blk, bt, 2 * D), stream),  # gate static part
                pl.BlockSpec((t_blk, bt, D), stream),      # forget static part
                pl.BlockSpec((t_blk, bt, D), stream),      # predictor static part
                pl.BlockSpec((C, D), const),               # h0
                pl.BlockSpec((D, 3 * D), const),           # [Wg_h|Wa_h|Wp_h]
                pl.BlockSpec((D, D), const),               # Wo_h
                pl.BlockSpec((D, D), const),               # Wo_la
            ],
            out_specs=pl.BlockSpec((Tp, bt), lambda b, t: (0, b)),
            scratch_shapes=[
                pltpu.VMEM((bt, C, D), jnp.float32),       # hidden state carry
                pltpu.VMEM((bt, 2 * D), jnp.float32),      # gate pre-act carry
                pltpu.VMEM((bt, C), jnp.float32),          # q_cur carry
            ]),
        compiler_params=pltpu.CompilerParams(
            dimension_semantics=("parallel", "arbitrary"),
            vmem_limit_bytes=vmem_limit),
    )(q0, q_next, g_steps, f_steps, p_next, h0, wgap, woh, wola)
    return out                                            # (Tp, B_pad)


# -----------------------------------------------------------------------------
# Pure-JAX reference (mirrors the PyTorch forward loop) for validation.
# -----------------------------------------------------------------------------
def elmkt_reference(q_matrix, question_seq, cat5, it_emb, q_emb, h0, w):
    B, S, D = q_emb.shape
    C = q_matrix.shape[1]
    hidden_pre = jnp.broadcast_to(h0[None], (B, C, D))
    le_pre = jnp.zeros((B, D), jnp.float32)
    scores = jnp.zeros((B, S), jnp.float32)
    h_tilde = None
    for t in range(S - 1):
        q_cur = q_matrix[question_seq[:, t]]
        lt = it_emb[:, t]
        if h_tilde is None:
            h_tilde = jnp.einsum('bc,bcd->bd', q_cur, hidden_pre)
        le_cur = cat5[:, t] @ w['Wf'] + w['bf'][0]
        gate_in = jnp.concatenate([le_pre, lt, le_cur, h_tilde], -1)
        lg = jnp.tanh(gate_in @ w['Wg'] + w['bg'][0])
        la = jax.nn.sigmoid(gate_in @ w['Wa'] + w['ba'][0]) * ((lg + 1.0) / 2.0)
        alg = q_cur[:, :, None] * la[:, None, :]
        forget_in = jnp.concatenate(
            [hidden_pre,
             jnp.broadcast_to(la[:, None, :], (B, C, D)),
             jnp.broadcast_to(lt[:, None, :], (B, C, D))], -1)
        gamma_f = jax.nn.sigmoid(jnp.einsum('bcf,fd->bcd', forget_in, w['Wo'])
                                 + w['bo'][0])
        hidden_cur = alg + gamma_f * hidden_pre
        q_next = q_matrix[question_seq[:, t + 1]]
        h_tilde_next = jnp.einsum('bc,bcd->bd', q_next, hidden_cur)
        pred_in = jnp.concatenate([q_emb[:, t + 1], h_tilde_next], -1)
        score = jnp.sum(jax.nn.sigmoid(pred_in @ w['Wp'] + w['bp'][0]), -1) / D
        scores = scores.at[:, t + 1].set(score)
        le_pre, hidden_pre, h_tilde = le_cur, hidden_cur, h_tilde_next
    return scores


# -----------------------------------------------------------------------------
# Parameter init + glue (embedding gathers, q-matrix, hoisted GEMMs) in XLA.
# -----------------------------------------------------------------------------
def init_params(key, num_question, num_concept, dim_emb):
    D = dim_emb
    ks = jax.random.split(key, 16)

    def linear(kw, kb, din, dout):
        bound = 1.0 / np.sqrt(din)
        W = jax.random.uniform(kw, (din, dout), jnp.float32, -bound, bound)
        b = jax.random.uniform(kb, (1, dout), jnp.float32, -bound, bound)
        return W, b

    params = {}
    params['embed_question'] = jax.random.normal(ks[0], (num_question, D), jnp.float32)
    params['embed_use_time'] = jax.random.normal(ks[1], (100, D), jnp.float32)
    params['Wf'], params['bf'] = linear(ks[2], ks[3], 5 * D, D)
    params['Wg'], params['bg'] = linear(ks[4], ks[5], 4 * D, D)
    params['Wa'], params['ba'] = linear(ks[6], ks[7], 4 * D, D)
    params['Wo'], params['bo'] = linear(ks[8], ks[9], 3 * D, D)
    params['Wp'], params['bp'] = linear(ks[10], ks[11], 2 * D, D)
    Q_table = (jax.random.uniform(ks[12], (num_question, num_concept)) > 0.5
               ).astype(jnp.float32)
    params['Q_table'] = Q_table
    params['learnable_Q_table'] = Q_table * 10.0
    bound = np.sqrt(6.0 / (num_concept + D))          # xavier_uniform
    params['hidden0'] = jax.random.uniform(ks[13], (num_concept, D), jnp.float32,
                                           -bound, bound)
    return params


def build_q_matrix(params, max_q_value, min_q_value):
    # use_learnable_q = True branch of the PyTorch forward
    Q = params['Q_table']
    Q1 = jnp.minimum(Q + max_q_value / (1.0 - min_q_value), 1.0)
    Q2 = (1.0 - Q) * min_q_value
    Q3 = Q * min_q_value
    return (jax.nn.sigmoid(params['learnable_Q_table']) * (1.0 - min_q_value)
            + Q3 - Q2) * Q1


def _round_up(x, m):
    return ((x + m - 1) // m) * m


def elmkt_forward(params, batch, num_concept, dim_emb,
                  max_q_value=0.05, min_q_value=0.8,
                  use_pallas=True, use_bf16=True, bt=None, t_blk=8):
    D = dim_emb
    question_seq = batch['question_seq']
    correct_seq = batch['correct_seq']
    B, S = question_seq.shape

    q_matrix = build_q_matrix(params, max_q_value, min_q_value)

    if not use_pallas:
        # batch-major pure-JAX reference mirroring the PyTorch loop
        q_emb = params['embed_question'][question_seq]
        correct_emb = jnp.broadcast_to(correct_seq[..., None].astype(jnp.float32),
                                       (B, S, D))
        use_time_emb = params['embed_use_time'][batch['use_time_seq']]
        it_emb = params['embed_use_time'][batch['interval_time_seq']]
        num_hint_emb = params['embed_use_time'][batch['num_hint_seq']]
        num_attempt_emb = params['embed_use_time'][batch['num_attempt_seq']]
        cat5 = jnp.concatenate([q_emb, correct_emb, num_attempt_emb,
                                num_hint_emb, use_time_emb], axis=-1)
        return elmkt_reference(q_matrix, question_seq, cat5, it_emb,
                               q_emb, params['hidden0'], params)

    # --- time-major gathers (only tiny int index arrays are transposed) -------
    qseq_t = question_seq.T                                          # (S, B)
    q_emb_t = params['embed_question'][qseq_t]                       # (S, B, D)
    correct_t = jnp.broadcast_to(correct_seq.T[..., None].astype(jnp.float32),
                                 (S, B, D))
    # NOTE: the reference PyTorch code uses embed_use_time for all four lookups.
    use_time_t = params['embed_use_time'][batch['use_time_seq'].T]
    it_t = params['embed_use_time'][batch['interval_time_seq'].T]
    hint_t = params['embed_use_time'][batch['num_hint_seq'].T]
    attempt_t = params['embed_use_time'][batch['num_attempt_seq'].T]

    cat5_t = jnp.concatenate([q_emb_t, correct_t, attempt_t, hint_t, use_time_t],
                             axis=-1)                                # (S, B, 5D)

    # --- hoisted GEMMs: one big matmul each instead of S tiny ones in-loop ----
    le_t = jnp.dot(cat5_t, params['Wf']) + params['bf'][0]           # (S, B, D)
    le_prev_t = jnp.concatenate(
        [jnp.zeros((1, B, D), jnp.float32), le_t[:-1]], axis=0)      # (S, B, D)

    Wga = jnp.concatenate([params['Wg'], params['Wa']], axis=1)      # (4D, 2D)
    bga = jnp.concatenate([params['bg'], params['ba']], axis=1)[0]   # (2D,)
    g_static = (jnp.dot(le_prev_t, Wga[0:D])
                + jnp.dot(it_t, Wga[D:2 * D])
                + jnp.dot(le_t, Wga[2 * D:3 * D])
                + bga)                                               # (S, B, 2D)
    f_static = jnp.dot(it_t, params['Wo'][2 * D:3 * D]) + params['bo'][0]
    p_all = jnp.dot(q_emb_t, params['Wp'][0:D]) + params['bp'][0]    # (S, B, D)
    qsel_t = q_matrix[qseq_t]                                        # (S, B, C)
    C = qsel_t.shape[-1]

    # per-recurrence-step slices (steps t = 0 .. S-2)
    g_steps = g_static[:S - 1]
    f_steps = f_static[:S - 1]
    p_next = p_all[1:]                                               # q_emb[t+1]
    q_next = qsel_t[1:]                                              # q rows t+1
    q0 = qsel_t[0]                                                   # q rows t=0

    # in-loop weights: fused gate(+predictor) RHS and forgetting-gate blocks
    wgap = jnp.concatenate([Wga[3 * D:4 * D], params['Wp'][D:2 * D]], axis=1)
    woh = params['Wo'][0:D]
    wola = params['Wo'][D:2 * D]

    # --- padding + tile selection (generation-aware) --------------------------
    T = S - 1
    Tp = _round_up(T, t_blk)
    B_pad = max(8, _round_up(B, 8))
    if B_pad >= 256:
        B_pad = _round_up(B, 128)
    if bt is None:
        # >=2 batch chunks of 128 for large batches (megacore / v7x 2-TC sharding);
        # small batches run as a single chunk.  On v7x keep bt*C*D*4 well under
        # the 64 MiB per-core VMEM (see vmem estimate in elmkt_pallas).
        bt = 128 if (B_pad % 128 == 0 and B_pad // 128 >= 2) else B_pad

    def pad_tb(x):
        pads = [(0, Tp - x.shape[0]), (0, B_pad - x.shape[1])] + \
               [(0, 0)] * (x.ndim - 2)
        return jnp.pad(x, pads)

    sdt = jnp.bfloat16 if use_bf16 else jnp.float32   # streamed / MXU dtype
    q_next_p = pad_tb(q_next).astype(sdt)
    g_p = pad_tb(g_steps).astype(sdt)
    f_p = pad_tb(f_steps).astype(sdt)
    p_p = pad_tb(p_next).astype(sdt)
    q0_p = jnp.pad(q0, ((0, B_pad - B), (0, 0))).astype(sdt)

    out = elmkt_pallas(q0_p, q_next_p, g_p, f_p, p_p, params['hidden0'],
                       wgap.astype(sdt), woh.astype(sdt), wola.astype(sdt),
                       bt=bt, t_blk=t_blk)                           # (Tp, B_pad)

    # timestep 0 of predict_score_all_time stays zero (as in the reference)
    scores_t = jnp.concatenate(
        [jnp.zeros((1, B), jnp.float32), out[:T, :B]], axis=0)       # (S, B)
    return scores_t.T                                                # (B, S)


if __name__ == "__main__":
    # small shapes: batch=2, seq=17 (-> two timestep blocks of 8), num_concept=8,
    # dim_emb=32, num_question=16
    B, S = 2, 17
    num_question, num_concept, dim_emb = 16, 8, 32

    key = jax.random.PRNGKey(0)
    kp, kq, kc, k1, k2, k3, k4 = jax.random.split(key, 7)
    params = init_params(kp, num_question, num_concept, dim_emb)

    batch = {
        'question_seq': jax.random.randint(kq, (B, S), 0, num_question),
        'correct_seq': jax.random.randint(kc, (B, S), 0, 2),
        'use_time_seq': jax.random.randint(k1, (B, S), 0, 100),
        'interval_time_seq': jax.random.randint(k2, (B, S), 0, 100),
        'num_hint_seq': jax.random.randint(k3, (B, S), 0, 100),
        'num_attempt_seq': jax.random.randint(k4, (B, S), 0, 100),
    }

    # bf16 MXU operands (default, fast path)
    out_bf16 = elmkt_forward(params, batch, num_concept, dim_emb,
                             use_pallas=True, use_bf16=True)
    out_bf16 = jax.block_until_ready(out_bf16)

    # f32 path (tight numerical check of the restructured recurrence)
    out_f32 = elmkt_forward(params, batch, num_concept, dim_emb,
                            use_pallas=True, use_bf16=False)
    out_f32 = jax.block_until_ready(out_f32)

    ref = elmkt_forward(params, batch, num_concept, dim_emb, use_pallas=False)
    ref = jax.block_until_ready(ref)

    assert out_bf16.shape == (B, S) and out_f32.shape == (B, S)
    np.testing.assert_allclose(np.asarray(out_f32), np.asarray(ref),
                               rtol=2e-3, atol=3e-3)
    np.testing.assert_allclose(np.asarray(out_bf16), np.asarray(ref),
                               rtol=3e-2, atol=3e-2)
    print("KERNEL_OK")
</pallas_src>

<mosaic_0001>
module attributes {stable_mosaic.version = 11 : i64} {
  func.func @elmkt_block_kernel(%arg0: i32, %arg1: i32, %arg2: memref<8x8xbf16, #tpu.memory_space<vmem>>, %arg3: memref<8x8x8xbf16, #tpu.memory_space<vmem>>, %arg4: memref<8x8x64xbf16, #tpu.memory_space<vmem>>, %arg5: memref<8x8x32xbf16, #tpu.memory_space<vmem>>, %arg6: memref<8x8x32xbf16, #tpu.memory_space<vmem>>, %arg7: memref<8x32xf32, #tpu.memory_space<vmem>>, %arg8: memref<32x96xbf16, #tpu.memory_space<vmem>>, %arg9: memref<32x32xbf16, #tpu.memory_space<vmem>>, %arg10: memref<32x32xbf16, #tpu.memory_space<vmem>>, %arg11: memref<16x8xf32, #tpu.memory_space<vmem>>, %arg12: memref<8x8x32xf32, #tpu.memory_space<vmem>>, %arg13: memref<8x64xf32, #tpu.memory_space<vmem>>, %arg14: memref<8x8xf32, #tpu.memory_space<vmem>>) attributes {dimension_semantics = [#tpu.dimension_semantics<parallel>, #tpu.dimension_semantics<arbitrary>], iteration_bounds = array<i64: 1, 2>, scalar_prefetch = 0 : i64, scratch_operands = 3 : i64, tpu.core_type = #tpu.core_type<tc>, window_params = [{transform_indices = @transform_0, window_bounds = array<i64: 8, 8>}, {transform_indices = @transform_1, window_bounds = array<i64: 8, 8, 8>}, {transform_indices = @transform_2, window_bounds = array<i64: 8, 8, 64>}, {transform_indices = @transform_3, window_bounds = array<i64: 8, 8, 32>}, {transform_indices = @transform_4, window_bounds = array<i64: 8, 8, 32>}, {pipeline_mode = #tpu.pipeline_mode<synchronous>, transform_indices = @transform_5, window_bounds = array<i64: 8, 32>}, {pipeline_mode = #tpu.pipeline_mode<synchronous>, transform_indices = @transform_6, window_bounds = array<i64: 32, 96>}, {pipeline_mode = #tpu.pipeline_mode<synchronous>, transform_indices = @transform_7, window_bounds = array<i64: 32, 32>}, {pipeline_mode = #tpu.pipeline_mode<synchronous>, transform_indices = @transform_8, window_bounds = array<i64: 32, 32>}, {transform_indices = @transform_9, window_bounds = array<i64: 16, 8>}]} {
    %c0 = arith.constant 0 : index
    %c0_0 = arith.constant 0 : index
    %0 = vector.load %arg8[%c0, %c0_0] : memref<32x96xbf16, #tpu.memory_space<vmem>>, vector<32x96xbf16>
    %c0_1 = arith.constant 0 : index
    %c0_2 = arith.constant 0 : index
    %1 = vector.load %arg9[%c0_1, %c0_2] : memref<32x32xbf16, #tpu.memory_space<vmem>>, vector<32x32xbf16>
    %c0_3 = arith.constant 0 : index
    %c0_4 = arith.constant 0 : index
    %2 = vector.load %arg10[%c0_3, %c0_4] : memref<32x32xbf16, #tpu.memory_space<vmem>>, vector<32x32xbf16>
    %c0_i32 = arith.constant 0 : i32
    %3 = arith.cmpi eq, %arg1, %c0_i32 : i32
    %4 = arith.extui %3 : i1 to i32
    %c0_i32_5 = arith.constant 0 : i32
    %5 = arith.cmpi ne, %4, %c0_i32_5 : i32
    scf.if %5 {
      %c0_245 = arith.constant 0 : index
      %c0_246 = arith.constant 0 : index
      %594 = vector.load %arg7[%c0_245, %c0_246] : memref<8x32xf32, #tpu.memory_space<vmem>>, vector<8x32xf32>
      %595 = vector.shape_cast %594 : vector<8x32xf32> to vector<1x8x32xf32>
      %596 = vector.shape_cast %595 : vector<1x8x32xf32> to vector<1x8x32xf32>
      %597 = vector.broadcast %596 : vector<1x8x32xf32> to vector<8x8x32xf32>
      %c0_247 = arith.constant 0 : index
      %c0_248 = arith.constant 0 : index
      %c0_249 = arith.constant 0 : index
      %598 = vector.load %arg12[%c0_247, %c0_248, %c0_249] : memref<8x8x32xf32, #tpu.memory_space<vmem>>, vector<8x8x32xf32>
      tpu.vector_store %arg12[%c0_247, %c0_248, %c0_249], %597 {strides = array<i32>} : memref<8x8x32xf32, #tpu.memory_space<vmem>>, vector<8x8x32xf32>,
      %c0_250 = arith.constant 0 : index
      %c0_251 = arith.constant 0 : index
      %599 = vector.load %arg2[%c0_250, %c0_251] : memref<8x8xbf16, #tpu.memory_space<vmem>>, vector<8x8xbf16>
      %600 = arith.extf %599 : vector<8x8xbf16> to vector<8x8xf32>
      %c0_252 = arith.constant 0 : index
      %c0_253 = arith.constant 0 : index
      %601 = vector.load %arg14[%c0_252, %c0_253] : memref<8x8xf32, #tpu.memory_space<vmem>>, vector<8x8xf32>
      tpu.vector_store %arg14[%c0_252, %c0_253], %600 {strides = array<i32>} : memref<8x8xf32, #tpu.memory_space<vmem>>, vector<8x8xf32>,
      %602 = vector.shape_cast %600 : vector<8x8xf32> to vector<8x8x1xf32>
      %603 = vector.broadcast %602 : vector<8x8x1xf32> to vector<8x8x32xf32>
      %604 = arith.mulf %603, %597 : vector<8x8x32xf32>
      %cst_254 = arith.constant dense<0.000000e+00> : vector<8x32xf32>
      %605 = vector.multi_reduction <add>, %604, %cst_254 [1] : vector<8x8x32xf32> to vector<8x32xf32>
      %606 = arith.truncf %605 : vector<8x32xf32> to vector<8x32xbf16>
      %cst_255 = arith.constant dense<0.000000e+00> : vector<8x96xf32>
      %607 = tpu.matmul %606, %0, %cst_255 {dimension_numbers = #tpu.dot_dimension_numbers<[1], [0], [0], [1], [0, 0, 1, 1], [], []>} : vector<8x32xbf16>, vector<32x96xbf16>, vector<8x96xf32> -> vector<8x96xf32>
      %608 = vector.extract_strided_slice %607 {offsets = [0, 0], sizes = [8, 64], strides = [1, 1]} : vector<8x96xf32> to vector<8x64xf32>
      %c0_256 = arith.constant 0 : index
      %c0_257 = arith.constant 0 : index
      %609 = vector.load %arg13[%c0_256, %c0_257] : memref<8x64xf32, #tpu.memory_space<vmem>>, vector<8x64xf32>
      tpu.vector_store %arg13[%c0_256, %c0_257], %608 {strides = array<i32>} : memref<8x64xf32, #tpu.memory_space<vmem>>, vector<8x64xf32>,
    } else {
    }
    %c0_6 = arith.constant 0 : index
    %c0_7 = arith.constant 0 : index
    %c0_8 = arith.constant 0 : index
    %6 = vector.load %arg12[%c0_6, %c0_7, %c0_8] : memref<8x8x32xf32, #tpu.memory_space<vmem>>, vector<8x8x32xf32>
    %c0_9 = arith.constant 0 : index
    %c0_10 = arith.constant 0 : index
    %7 = vector.load %arg13[%c0_9, %c0_10] : memref<8x64xf32, #tpu.memory_space<vmem>>, vector<8x64xf32>
    %c0_11 = arith.constant 0 : index
    %c0_12 = arith.constant 0 : index
    %8 = vector.load %arg14[%c0_11, %c0_12] : memref<8x8xf32, #tpu.memory_space<vmem>>, vector<8x8xf32>
    %c0_13 = arith.constant 0 : index
    %c0_14 = arith.constant 0 : index
    %c0_15 = arith.constant 0 : index
    %9 = vector.load %arg4[%c0_13, %c0_14, %c0_15] : memref<8x8x64xbf16, #tpu.memory_space<vmem>>, vector<1x8x64xbf16>
    %10 = vector.shape_cast %9 : vector<1x8x64xbf16> to vector<8x64xbf16>
    %11 = arith.extf %10 : vector<8x64xbf16> to vector<8x64xf32>
    %12 = arith.addf %7, %11 : vector<8x64xf32>
    %13 = vector.extract_strided_slice %12 {offsets = [0, 0], sizes = [8, 32], strides = [1, 1]} : vector<8x64xf32> to vector<8x32xf32>
    %14 = math.tanh %13 : vector<8x32xf32>
    %15 = vector.extract_strided_slice %12 {offsets = [0, 32], sizes = [8, 32], strides = [1, 1]} : vector<8x64xf32> to vector<8x32xf32>
    %cst = arith.constant 5.000000e-01 : f32
    %16 = vector.broadcast %cst : f32 to vector<8x32xf32>
    %17 = arith.mulf %16, %15 : vector<8x32xf32>
    %18 = math.tanh %17 : vector<8x32xf32>
    %cst_16 = arith.constant 5.000000e-01 : f32
    %19 = vector.broadcast %cst_16 : f32 to vector<8x32xf32>
    %20 = arith.mulf %19, %18 : vector<8x32xf32>
    %cst_17 = arith.constant 5.000000e-01 : f32
    %21 = vector.broadcast %cst_17 : f32 to vector<8x32xf32>
    %22 = arith.addf %20, %21 : vector<8x32xf32>
    %cst_18 = arith.constant 1.000000e+00 : f32
    %23 = vector.broadcast %cst_18 : f32 to vector<8x32xf32>
    %24 = arith.addf %14, %23 : vector<8x32xf32>
    %25 = arith.mulf %22, %24 : vector<8x32xf32>
    %cst_19 = arith.constant 5.000000e-01 : f32
    %26 = vector.broadcast %cst_19 : f32 to vector<8x32xf32>
    %27 = arith.mulf %25, %26 : vector<8x32xf32>
    %28 = vector.shape_cast %8 : vector<8x8xf32> to vector<8x8x1xf32>
    %29 = vector.shape_cast %27 : vector<8x32xf32> to vector<8x1x32xf32>
    %30 = vector.broadcast %28 : vector<8x8x1xf32> to vector<8x8x32xf32>
    %31 = vector.broadcast %29 : vector<8x1x32xf32> to vector<8x8x32xf32>
    %32 = arith.mulf %30, %31 : vector<8x8x32xf32>
    %33 = arith.truncf %27 : vector<8x32xf32> to vector<8x32xbf16>
    %cst_20 = arith.constant dense<0.000000e+00> : vector<8x32xf32>
    %34 = tpu.matmul %33, %2, %cst_20 {dimension_numbers = #tpu.dot_dimension_numbers<[1], [0], [0], [1], [0, 0, 1, 1], [], []>} : vector<8x32xbf16>, vector<32x32xbf16>, vector<8x32xf32> -> vector<8x32xf32>
    %c0_21 = arith.constant 0 : index
    %c0_22 = arith.constant 0 : index
    %c0_23 = arith.constant 0 : index
    %35 = vector.load %arg5[%c0_21, %c0_22, %c0_23] : memref<8x8x32xbf16, #tpu.memory_space<vmem>>, vector<1x8x32xbf16>
    %36 = vector.shape_cast %35 : vector<1x8x32xbf16> to vector<8x32xbf16>
    %37 = arith.extf %36 : vector<8x32xbf16> to vector<8x32xf32>
    %38 = arith.addf %34, %37 : vector<8x32xf32>
    %39 = vector.shape_cast %6 : vector<8x8x32xf32> to vector<64x32xf32>
    %40 = arith.truncf %39 : vector<64x32xf32> to vector<64x32xbf16>
    %cst_24 = arith.constant dense<0.000000e+00> : vector<64x32xf32>
    %41 = tpu.matmul %40, %1, %cst_24 {dimension_numbers = #tpu.dot_dimension_numbers<[1], [0], [0], [1], [0, 0, 1, 1], [], []>} : vector<64x32xbf16>, vector<32x32xbf16>, vector<64x32xf32> -> vector<64x32xf32>
    %42 = vector.shape_cast %41 : vector<64x32xf32> to vector<8x8x32xf32>
    %43 = vector.shape_cast %38 : vector<8x32xf32> to vector<8x1x32xf32>
    %44 = vector.broadcast %43 : vector<8x1x32xf32> to vector<8x8x32xf32>
    %45 = arith.addf %42, %44 : vector<8x8x32xf32>
    %cst_25 = arith.constant 5.000000e-01 : f32
    %46 = vector.broadcast %cst_25 : f32 to vector<8x8x32xf32>
    %47 = arith.mulf %46, %45 : vector<8x8x32xf32>
    %48 = math.tanh %47 : vector<8x8x32xf32>
    %cst_26 = arith.constant 5.000000e-01 : f32
    %49 = vector.broadcast %cst_26 : f32 to vector<8x8x32xf32>
    %50 = arith.mulf %49, %48 : vector<8x8x32xf32>
    %cst_27 = arith.constant 5.000000e-01 : f32
    %51 = vector.broadcast %cst_27 : f32 to vector<8x8x32xf32>
    %52 = arith.addf %50, %51 : vector<8x8x32xf32>
    %53 = arith.mulf %52, %6 : vector<8x8x32xf32>
    %54 = arith.addf %32, %53 : vector<8x8x32xf32>
    %c0_28 = arith.constant 0 : index
    %c0_29 = arith.constant 0 : index
    %c0_30 = arith.constant 0 : index
    %55 = vector.load %arg3[%c0_28, %c0_29, %c0_30] : memref<8x8x8xbf16, #tpu.memory_space<vmem>>, vector<1x8x8xbf16>
    %56 = vector.shape_cast %55 : vector<1x8x8xbf16> to vector<8x8xbf16>
    %57 = arith.extf %56 : vector<8x8xbf16> to vector<8x8xf32>
    %58 = vector.shape_cast %57 : vector<8x8xf32> to vector<8x8x1xf32>
    %59 = vector.broadcast %58 : vector<8x8x1xf32> to vector<8x8x32xf32>
    %60 = arith.mulf %59, %54 : vector<8x8x32xf32>
    %cst_31 = arith.constant dense<0.000000e+00> : vector<8x32xf32>
    %61 = vector.multi_reduction <add>, %60, %cst_31 [1] : vector<8x8x32xf32> to vector<8x32xf32>
    %62 = arith.truncf %61 : vector<8x32xf32> to vector<8x32xbf16>
    %cst_32 = arith.constant dense<0.000000e+00> : vector<8x96xf32>
    %63 = tpu.matmul %62, %0, %cst_32 {dimension_numbers = #tpu.dot_dimension_numbers<[1], [0], [0], [1], [0, 0, 1, 1], [], []>} : vector<8x32xbf16>, vector<32x96xbf16>, vector<8x96xf32> -> vector<8x96xf32>
    %64 = vector.extract_strided_slice %63 {offsets = [0, 0], sizes = [8, 64], strides = [1, 1]} : vector<8x96xf32> to vector<8x64xf32>
    %65 = vector.extract_strided_slice %63 {offsets = [0, 64], sizes = [8, 32], strides = [1, 1]} : vector<8x96xf32> to vector<8x32xf32>
    %c0_33 = arith.constant 0 : index
    %c0_34 = arith.constant 0 : index
    %c0_35 = arith.constant 0 : index
    %66 = vector.load %arg6[%c0_33, %c0_34, %c0_35] : memref<8x8x32xbf16, #tpu.memory_space<vmem>>, vector<1x8x32xbf16>
    %67 = vector.shape_cast %66 : vector<1x8x32xbf16> to vector<8x32xbf16>
    %68 = arith.extf %67 : vector<8x32xbf16> to vector<8x32xf32>
    %69 = arith.addf %65, %68 : vector<8x32xf32>
    %cst_36 = arith.constant 5.000000e-01 : f32
    %70 = vector.broadcast %cst_36 : f32 to vector<8x32xf32>
    %71 = arith.mulf %70, %69 : vector<8x32xf32>
    %72 = math.tanh %71 : vector<8x32xf32>
    %cst_37 = arith.constant 5.000000e-01 : f32
    %73 = vector.broadcast %cst_37 : f32 to vector<8x32xf32>
    %74 = arith.mulf %73, %72 : vector<8x32xf32>
    %cst_38 = arith.constant 5.000000e-01 : f32
    %75 = vector.broadcast %cst_38 : f32 to vector<8x32xf32>
    %76 = arith.addf %74, %75 : vector<8x32xf32>
    %cst_39 = arith.constant dense<0.000000e+00> : vector<8xf32>
    %77 = vector.multi_reduction <add>, %76, %cst_39 [1] : vector<8x32xf32> to vector<8xf32>
    %78 = vector.shape_cast %77 : vector<8xf32> to vector<8x1xf32>
    %cst_40 = arith.constant 3.125000e-02 : f32
    %79 = vector.broadcast %cst_40 : f32 to vector<8x1xf32>
    %80 = arith.mulf %78, %79 : vector<8x1xf32>
    %c1 = arith.constant 1 : index
    %c0_41 = arith.constant 0 : index
    %c0_42 = arith.constant 0 : index
    %81 = vector.load %arg4[%c1, %c0_41, %c0_42] : memref<8x8x64xbf16, #tpu.memory_space<vmem>>, vector<1x8x64xbf16>
    %82 = vector.shape_cast %81 : vector<1x8x64xbf16> to vector<8x64xbf16>
    %83 = arith.extf %82 : vector<8x64xbf16> to vector<8x64xf32>
    %84 = arith.addf %64, %83 : vector<8x64xf32>
    %85 = vector.extract_strided_slice %84 {offsets = [0, 0], sizes = [8, 32], strides = [1, 1]} : vector<8x64xf32> to vector<8x32xf32>
    %86 = math.tanh %85 : vector<8x32xf32>
    %87 = vector.extract_strided_slice %84 {offsets = [0, 32], sizes = [8, 32], strides = [1, 1]} : vector<8x64xf32> to vector<8x32xf32>
    %cst_43 = arith.constant 5.000000e-01 : f32
    %88 = vector.broadcast %cst_43 : f32 to vector<8x32xf32>
    %89 = arith.mulf %88, %87 : vector<8x32xf32>
    %90 = math.tanh %89 : vector<8x32xf32>
    %cst_44 = arith.constant 5.000000e-01 : f32
    %91 = vector.broadcast %cst_44 : f32 to vector<8x32xf32>
    %92 = arith.mulf %91, %90 : vector<8x32xf32>
    %cst_45 = arith.constant 5.000000e-01 : f32
    %93 = vector.broadcast %cst_45 : f32 to vector<8x32xf32>
    %94 = arith.addf %92, %93 : vector<8x32xf32>
    %cst_46 = arith.constant 1.000000e+00 : f32
    %95 = vector.broadcast %cst_46 : f32 to vector<8x32xf32>
    %96 = arith.addf %86, %95 : vector<8x32xf32>
    %97 = arith.mulf %94, %96 : vector<8x32xf32>
    %cst_47 = arith.constant 5.000000e-01 : f32
    %98 = vector.broadcast %cst_47 : f32 to vector<8x32xf32>
    %99 = arith.mulf %97, %98 : vector<8x32xf32>
    %100 = vector.shape_cast %57 : vector<8x8xf32> to vector<8x8x1xf32>
    %101 = vector.shape_cast %99 : vector<8x32xf32> to vector<8x1x32xf32>
    %102 = vector.broadcast %100 : vector<8x8x1xf32> to vector<8x8x32xf32>
    %103 = vector.broadcast %101 : vector<8x1x32xf32> to vector<8x8x32xf32>
    %104 = arith.mulf %102, %103 : vector<8x8x32xf32>
    %105 = arith.truncf %99 : vector<8x32xf32> to vector<8x32xbf16>
    %cst_48 = arith.constant dense<0.000000e+00> : vector<8x32xf32>
    %106 = tpu.matmul %105, %2, %cst_48 {dimension_numbers = #tpu.dot_dimension_numbers<[1], [0], [0], [1], [0, 0, 1, 1], [], []>} : vector<8x32xbf16>, vector<32x32xbf16>, vector<8x32xf32> -> vector<8x32xf32>
    %c1_49 = arith.constant 1 : index
    %c0_50 = arith.constant 0 : index
    %c0_51 = arith.constant 0 : index
    %107 = vector.load %arg5[%c1_49, %c0_50, %c0_51] : memref<8x8x32xbf16, #tpu.memory_space<vmem>>, vector<1x8x32xbf16>
    %108 = vector.shape_cast %107 : vector<1x8x32xbf16> to vector<8x32xbf16>
    %109 = arith.extf %108 : vector<8x32xbf16> to vector<8x32xf32>
    %110 = arith.addf %106, %109 : vector<8x32xf32>
    %111 = vector.shape_cast %54 : vector<8x8x32xf32> to vector<64x32xf32>
    %112 = arith.truncf %111 : vector<64x32xf32> to vector<64x32xbf16>
    %cst_52 = arith.constant dense<0.000000e+00> : vector<64x32xf32>
    %113 = tpu.matmul %112, %1, %cst_52 {dimension_numbers = #tpu.dot_dimension_numbers<[1], [0], [0], [1], [0, 0, 1, 1], [], []>} : vector<64x32xbf16>, vector<32x32xbf16>, vector<64x32xf32> -> vector<64x32xf32>
    %114 = vector.shape_cast %113 : vector<64x32xf32> to vector<8x8x32xf32>
    %115 = vector.shape_cast %110 : vector<8x32xf32> to vector<8x1x32xf32>
    %116 = vector.broadcast %115 : vector<8x1x32xf32> to vector<8x8x32xf32>
    %117 = arith.addf %114, %116 : vector<8x8x32xf32>
    %cst_53 = arith.constant 5.000000e-01 : f32
    %118 = vector.broadcast %cst_53 : f32 to vector<8x8x32xf32>
    %119 = arith.mulf %118, %117 : vector<8x8x32xf32>
    %120 = math.tanh %119 : vector<8x8x32xf32>
    %cst_54 = arith.constant 5.000000e-01 : f32
    %121 = vector.broadcast %cst_54 : f32 to vector<8x8x32xf32>
    %122 = arith.mulf %121, %120 : vector<8x8x32xf32>
    %cst_55 = arith.constant 5.000000e-01 : f32
    %123 = vector.broadcast %cst_55 : f32 to vector<8x8x32xf32>
    %124 = arith.addf %122, %123 : vector<8x8x32xf32>
    %125 = arith.mulf %124, %54 : vector<8x8x32xf32>
    %126 = arith.addf %104, %125 : vector<8x8x32xf32>
    %c1_56 = arith.constant 1 : index
    %c0_57 = arith.constant 0 : index
    %c0_58 = arith.constant 0 : index
    %127 = vector.load %arg3[%c1_56, %c0_57, %c0_58] : memref<8x8x8xbf16, #tpu.memory_space<vmem>>, vector<1x8x8xbf16>
    %128 = vector.shape_cast %127 : vector<1x8x8xbf16> to vector<8x8xbf16>
    %129 = arith.extf %128 : vector<8x8xbf16> to vector<8x8xf32>
    %130 = vector.shape_cast %129 : vector<8x8xf32> to vector<8x8x1xf32>
    %131 = vector.broadcast %130 : vector<8x8x1xf32> to vector<8x8x32xf32>
    %132 = arith.mulf %131, %126 : vector<8x8x32xf32>
    %cst_59 = arith.constant dense<0.000000e+00> : vector<8x32xf32>
    %133 = vector.multi_reduction <add>, %132, %cst_59 [1] : vector<8x8x32xf32> to vector<8x32xf32>
    %134 = arith.truncf %133 : vector<8x32xf32> to vector<8x32xbf16>
    %cst_60 = arith.constant dense<0.000000e+00> : vector<8x96xf32>
    %135 = tpu.matmul %134, %0, %cst_60 {dimension_numbers = #tpu.dot_dimension_numbers<[1], [0], [0], [1], [0, 0, 1, 1], [], []>} : vector<8x32xbf16>, vector<32x96xbf16>, vector<8x96xf32> -> vector<8x96xf32>
    %136 = vector.extract_strided_slice %135 {offsets = [0, 0], sizes = [8, 64], strides = [1, 1]} : vector<8x96xf32> to vector<8x64xf32>
    %137 = vector.extract_strided_slice %135 {offsets = [0, 64], sizes = [8, 32], strides = [1, 1]} : vector<8x96xf32> to vector<8x32xf32>
    %c1_61 = arith.constant 1 : index
    %c0_62 = arith.constant 0 : index
    %c0_63 = arith.constant 0 : index
    %138 = vector.load %arg6[%c1_61, %c0_62, %c0_63] : memref<8x8x32xbf16, #tpu.memory_space<vmem>>, vector<1x8x32xbf16>
    %139 = vector.shape_cast %138 : vector<1x8x32xbf16> to vector<8x32xbf16>
    %140 = arith.extf %139 : vector<8x32xbf16> to vector<8x32xf32>
    %141 = arith.addf %137, %140 : vector<8x32xf32>
    %cst_64 = arith.constant 5.000000e-01 : f32
    %142 = vector.broadcast %cst_64 : f32 to vector<8x32xf32>
    %143 = arith.mulf %142, %141 : vector<8x32xf32>
    %144 = math.tanh %143 : vector<8x32xf32>
    %cst_65 = arith.constant 5.000000e-01 : f32
    %145 = vector.broadcast %cst_65 : f32 to vector<8x32xf32>
    %146 = arith.mulf %145, %144 : vector<8x32xf32>
    %cst_66 = arith.constant 5.000000e-01 : f32
    %147 = vector.broadcast %cst_66 : f32 to vector<8x32xf32>
    %148 = arith.addf %146, %147 : vector<8x32xf32>
    %cst_67 = arith.constant dense<0.000000e+00> : vector<8xf32>
    %149 = vector.multi_reduction <add>, %148, %cst_67 [1] : vector<8x32xf32> to vector<8xf32>
    %150 = vector.shape_cast %149 : vector<8xf32> to vector<8x1xf32>
    %cst_68 = arith.constant 3.125000e-02 : f32
    %151 = vector.broadcast %cst_68 : f32 to vector<8x1xf32>
    %152 = arith.mulf %150, %151 : vector<8x1xf32>
    %c2 = arith.constant 2 : index
    %c0_69 = arith.constant 0 : index
    %c0_70 = arith.constant 0 : index
    %153 = vector.load %arg4[%c2, %c0_69, %c0_70] : memref<8x8x64xbf16, #tpu.memory_space<vmem>>, vector<1x8x64xbf16>
    %154 = vector.shape_cast %153 : vector<1x8x64xbf16> to vector<8x64xbf16>
    %155 = arith.extf %154 : vector<8x64xbf16> to vector<8x64xf32>
    %156 = arith.addf %136, %155 : vector<8x64xf32>
    %157 = vector.extract_strided_slice %156 {offsets = [0, 0], sizes = [8, 32], strides = [1, 1]} : vector<8x64xf32> to vector<8x32xf32>
    %158 = math.tanh %157 : vector<8x32xf32>
    %159 = vector.extract_strided_slice %156 {offsets = [0, 32], sizes = [8, 32], strides = [1, 1]} : vector<8x64xf32> to vector<8x32xf32>
    %cst_71 = arith.constant 5.000000e-01 : f32
    %160 = vector.broadcast %cst_71 : f32 to vector<8x32xf32>
    %161 = arith.mulf %160, %159 : vector<8x32xf32>
    %162 = math.tanh %161 : vector<8x32xf32>
    %cst_72 = arith.constant 5.000000e-01 : f32
    %163 = vector.broadcast %cst_72 : f32 to vector<8x32xf32>
    %164 = arith.mulf %163, %162 : vector<8x32xf32>
    %cst_73 = arith.constant 5.000000e-01 : f32
    %165 = vector.broadcast %cst_73 : f32 to vector<8x32xf32>
    %166 = arith.addf %164, %165 : vector<8x32xf32>
    %cst_74 = arith.constant 1.000000e+00 : f32
    %167 = vector.broadcast %cst_74 : f32 to vector<8x32xf32>
    %168 = arith.addf %158, %167 : vector<8x32xf32>
    %169 = arith.mulf %166, %168 : vector<8x32xf32>
    %cst_75 = arith.constant 5.000000e-01 : f32
    %170 = vector.broadcast %cst_75 : f32 to vector<8x32xf32>
    %171 = arith.mulf %169, %170 : vector<8x32xf32>
    %172 = vector.shape_cast %129 : vector<8x8xf32> to vector<8x8x1xf32>
    %173 = vector.shape_cast %171 : vector<8x32xf32> to vector<8x1x32xf32>
    %174 = vector.broadcast %172 : vector<8x8x1xf32> to vector<8x8x32xf32>
    %175 = vector.broadcast %173 : vector<8x1x32xf32> to vector<8x8x32xf32>
    %176 = arith.mulf %174, %175 : vector<8x8x32xf32>
    %177 = arith.truncf %171 : vector<8x32xf32> to vector<8x32xbf16>
    %cst_76 = arith.constant dense<0.000000e+00> : vector<8x32xf32>
    %178 = tpu.matmul %177, %2, %cst_76 {dimension_numbers = #tpu.dot_dimension_numbers<[1], [0], [0], [1], [0, 0, 1, 1], [], []>} : vector<8x32xbf16>, vector<32x32xbf16>, vector<8x32xf32> -> vector<8x32xf32>
    %c2_77 = arith.constant 2 : index
    %c0_78 = arith.constant 0 : index
    %c0_79 = arith.constant 0 : index
    %179 = vector.load %arg5[%c2_77, %c0_78, %c0_79] : memref<8x8x32xbf16, #tpu.memory_space<vmem>>, vector<1x8x32xbf16>
    %180 = vector.shape_cast %179 : vector<1x8x32xbf16> to vector<8x32xbf16>
    %181 = arith.extf %180 : vector<8x32xbf16> to vector<8x32xf32>
    %182 = arith.addf %178, %181 : vector<8x32xf32>
    %183 = vector.shape_cast %126 : vector<8x8x32xf32> to vector<64x32xf32>
    %184 = arith.truncf %183 : vector<64x32xf32> to vector<64x32xbf16>
    %cst_80 = arith.constant dense<0.000000e+00> : vector<64x32xf32>
    %185 = tpu.matmul %184, %1, %cst_80 {dimension_numbers = #tpu.dot_dimension_numbers<[1], [0], [0], [1], [0, 0, 1, 1], [], []>} : vector<64x32xbf16>, vector<32x32xbf16>, vector<64x32xf32> -> vector<64x32xf32>
    %186 = vector.shape_cast %185 : vector<64x32xf32> to vector<8x8x32xf32>
    %187 = vector.shape_cast %182 : vector<8x32xf32> to vector<8x1x32xf32>
    %188 = vector.broadcast %187 : vector<8x1x32xf32> to vector<8x8x32xf32>
    %189 = arith.addf %186, %188 : vector<8x8x32xf32>
    %cst_81 = arith.constant 5.000000e-01 : f32
    %190 = vector.broadcast %cst_81 : f32 to vector<8x8x32xf32>
    %191 = arith.mulf %190, %189 : vector<8x8x32xf32>
    %192 = math.tanh %191 : vector<8x8x32xf32>
    %cst_82 = arith.constant 5.000000e-01 : f32
    %193 = vector.broadcast %cst_82 : f32 to vector<8x8x32xf32>
    %194 = arith.mulf %193, %192 : vector<8x8x32xf32>
    %cst_83 = arith.constant 5.000000e-01 : f32
    %195 = vector.broadcast %cst_83 : f32 to vector<8x8x32xf32>
    %196 = arith.addf %194, %195 : vector<8x8x32xf32>
    %197 = arith.mulf %196, %126 : vector<8x8x32xf32>
    %198 = arith.addf %176, %197 : vector<8x8x32xf32>
    %c2_84 = arith.constant 2 : index
    %c0_85 = arith.constant 0 : index
    %c0_86 = arith.constant 0 : index
    %199 = vector.load %arg3[%c2_84, %c0_85, %c0_86] : memref<8x8x8xbf16, #tpu.memory_space<vmem>>, vector<1x8x8xbf16>
    %200 = vector.shape_cast %199 : vector<1x8x8xbf16> to vector<8x8xbf16>
    %201 = arith.extf %200 : vector<8x8xbf16> to vector<8x8xf32>
    %202 = vector.shape_cast %201 : vector<8x8xf32> to vector<8x8x1xf32>
    %203 = vector.broadcast %202 : vector<8x8x1xf32> to vector<8x8x32xf32>
    %204 = arith.mulf %203, %198 : vector<8x8x32xf32>
    %cst_87 = arith.constant dense<0.000000e+00> : vector<8x32xf32>
    %205 = vector.multi_reduction <add>, %204, %cst_87 [1] : vector<8x8x32xf32> to vector<8x32xf32>
    %206 = arith.truncf %205 : vector<8x32xf32> to vector<8x32xbf16>
    %cst_88 = arith.constant dense<0.000000e+00> : vector<8x96xf32>
    %207 = tpu.matmul %206, %0, %cst_88 {dimension_numbers = #tpu.dot_dimension_numbers<[1], [0], [0], [1], [0, 0, 1, 1], [], []>} : vector<8x32xbf16>, vector<32x96xbf16>, vector<8x96xf32> -> vector<8x96xf32>
    %208 = vector.extract_strided_slice %207 {offsets = [0, 0], sizes = [8, 64], strides = [1, 1]} : vector<8x96xf32> to vector<8x64xf32>
    %209 = vector.extract_strided_slice %207 {offsets = [0, 64], sizes = [8, 32], strides = [1, 1]} : vector<8x96xf32> to vector<8x32xf32>
    %c2_89 = arith.constant 2 : index
    %c0_90 = arith.constant 0 : index
    %c0_91 = arith.constant 0 : index
    %210 = vector.load %arg6[%c2_89, %c0_90, %c0_91] : memref<8x8x32xbf16, #tpu.memory_space<vmem>>, vector<1x8x32xbf16>
    %211 = vector.shape_cast %210 : vector<1x8x32xbf16> to vector<8x32xbf16>
    %212 = arith.extf %211 : vector<8x32xbf16> to vector<8x32xf32>
    %213 = arith.addf %209, %212 : vector<8x32xf32>
    %cst_92 = arith.constant 5.000000e-01 : f32
    %214 = vector.broadcast %cst_92 : f32 to vector<8x32xf32>
    %215 = arith.mulf %214, %213 : vector<8x32xf32>
    %216 = math.tanh %215 : vector<8x32xf32>
    %cst_93 = arith.constant 5.000000e-01 : f32
    %217 = vector.broadcast %cst_93 : f32 to vector<8x32xf32>
    %218 = arith.mulf %217, %216 : vector<8x32xf32>
    %cst_94 = arith.constant 5.000000e-01 : f32
    %219 = vector.broadcast %cst_94 : f32 to vector<8x32xf32>
    %220 = arith.addf %218, %219 : vector<8x32xf32>
    %cst_95 = arith.constant dense<0.000000e+00> : vector<8xf32>
    %221 = vector.multi_reduction <add>, %220, %cst_95 [1] : vector<8x32xf32> to vector<8xf32>
    %222 = vector.shape_cast %221 : vector<8xf32> to vector<8x1xf32>
    %cst_96 = arith.constant 3.125000e-02 : f32
    %223 = vector.broadcast %cst_96 : f32 to vector<8x1xf32>
    %224 = arith.mulf %222, %223 : vector<8x1xf32>
    %c3 = arith.constant 3 : index
    %c0_97 = arith.constant 0 : index
    %c0_98 = arith.constant 0 : index
    %225 = vector.load %arg4[%c3, %c0_97, %c0_98] : memref<8x8x64xbf16, #tpu.memory_space<vmem>>, vector<1x8x64xbf16>
    %226 = vector.shape_cast %225 : vector<1x8x64xbf16> to vector<8x64xbf16>
    %227 = arith.extf %226 : vector<8x64xbf16> to vector<8x64xf32>
    %228 = arith.addf %208, %227 : vector<8x64xf32>
    %229 = vector.extract_strided_slice %228 {offsets = [0, 0], sizes = [8, 32], strides = [1, 1]} : vector<8x64xf32> to vector<8x32xf32>
    %230 = math.tanh %229 : vector<8x32xf32>
    %231 = vector.extract_strided_slice %228 {offsets = [0, 32], sizes = [8, 32], strides = [1, 1]} : vector<8x64xf32> to vector<8x32xf32>
    %cst_99 = arith.constant 5.000000e-01 : f32
    %232 = vector.broadcast %cst_99 : f32 to vector<8x32xf32>
    %233 = arith.mulf %232, %231 : vector<8x32xf32>
    %234 = math.tanh %233 : vector<8x32xf32>
    %cst_100 = arith.constant 5.000000e-01 : f32
    %235 = vector.broadcast %cst_100 : f32 to vector<8x32xf32>
    %236 = arith.mulf %235, %234 : vector<8x32xf32>
    %cst_101 = arith.constant 5.000000e-01 : f32
    %237 = vector.broadcast %cst_101 : f32 to vector<8x32xf32>
    %238 = arith.addf %236, %237 : vector<8x32xf32>
    %cst_102 = arith.constant 1.000000e+00 : f32
    %239 = vector.broadcast %cst_102 : f32 to vector<8x32xf32>
    %240 = arith.addf %230, %239 : vector<8x32xf32>
    %241 = arith.mulf %238, %240 : vector<8x32xf32>
    %cst_103 = arith.constant 5.000000e-01 : f32
    %242 = vector.broadcast %cst_103 : f32 to vector<8x32xf32>
    %243 = arith.mulf %241, %242 : vector<8x32xf32>
    %244 = vector.shape_cast %201 : vector<8x8xf32> to vector<8x8x1xf32>
    %245 = vector.shape_cast %243 : vector<8x32xf32> to vector<8x1x32xf32>
    %246 = vector.broadcast %244 : vector<8x8x1xf32> to vector<8x8x32xf32>
    %247 = vector.broadcast %245 : vector<8x1x32xf32> to vector<8x8x32xf32>
    %248 = arith.mulf %246, %247 : vector<8x8x32xf32>
    %249 = arith.truncf %243 : vector<8x32xf32> to vector<8x32xbf16>
    %cst_104 = arith.constant dense<0.000000e+00> : vector<8x32xf32>
    %250 = tpu.matmul %249, %2, %cst_104 {dimension_numbers = #tpu.dot_dimension_numbers<[1], [0], [0], [1], [0, 0, 1, 1], [], []>} : vector<8x32xbf16>, vector<32x32xbf16>, vector<8x32xf32> -> vector<8x32xf32>
    %c3_105 = arith.constant 3 : index
    %c0_106 = arith.constant 0 : index
    %c0_107 = arith.constant 0 : index
    %251 = vector.load %arg5[%c3_105, %c0_106, %c0_107] : memref<8x8x32xbf16, #tpu.memory_space<vmem>>, vector<1x8x32xbf16>
    %252 = vector.shape_cast %251 : vector<1x8x32xbf16> to vector<8x32xbf16>
    %253 = arith.extf %252 : vector<8x32xbf16> to vector<8x32xf32>
    %254 = arith.addf %250, %253 : vector<8x32xf32>
    %255 = vector.shape_cast %198 : vector<8x8x32xf32> to vector<64x32xf32>
    %256 = arith.truncf %255 : vector<64x32xf32> to vector<64x32xbf16>
    %cst_108 = arith.constant dense<0.000000e+00> : vector<64x32xf32>
    %257 = tpu.matmul %256, %1, %cst_108 {dimension_numbers = #tpu.dot_dimension_numbers<[1], [0], [0], [1], [0, 0, 1, 1], [], []>} : vector<64x32xbf16>, vector<32x32xbf16>, vector<64x32xf32> -> vector<64x32xf32>
    %258 = vector.shape_cast %257 : vector<64x32xf32> to vector<8x8x32xf32>
    %259 = vector.shape_cast %254 : vector<8x32xf32> to vector<8x1x32xf32>
    %260 = vector.broadcast %259 : vector<8x1x32xf32> to vector<8x8x32xf32>
    %261 = arith.addf %258, %260 : vector<8x8x32xf32>
    %cst_109 = arith.constant 5.000000e-01 : f32
    %262 = vector.broadcast %cst_109 : f32 to vector<8x8x32xf32>
    %263 = arith.mulf %262, %261 : vector<8x8x32xf32>
    %264 = math.tanh %263 : vector<8x8x32xf32>
    %cst_110 = arith.constant 5.000000e-01 : f32
    %265 = vector.broadcast %cst_110 : f32 to vector<8x8x32xf32>
    %266 = arith.mulf %265, %264 : vector<8x8x32xf32>
    %cst_111 = arith.constant 5.000000e-01 : f32
    %267 = vector.broadcast %cst_111 : f32 to vector<8x8x32xf32>
    %268 = arith.addf %266, %267 : vector<8x8x32xf32>
    %269 = arith.mulf %268, %198 : vector<8x8x32xf32>
    %270 = arith.addf %248, %269 : vector<8x8x32xf32>
    %c3_112 = arith.constant 3 : index
    %c0_113 = arith.constant 0 : index
    %c0_114 = arith.constant 0 : index
    %271 = vector.load %arg3[%c3_112, %c0_113, %c0_114] : memref<8x8x8xbf16, #tpu.memory_space<vmem>>, vector<1x8x8xbf16>
    %272 = vector.shape_cast %271 : vector<1x8x8xbf16> to vector<8x8xbf16>
    %273 = arith.extf %272 : vector<8x8xbf16> to vector<8x8xf32>
    %274 = vector.shape_cast %273 : vector<8x8xf32> to vector<8x8x1xf32>
    %275 = vector.broadcast %274 : vector<8x8x1xf32> to vector<8x8x32xf32>
    %276 = arith.mulf %275, %270 : vector<8x8x32xf32>
    %cst_115 = arith.constant dense<0.000000e+00> : vector<8x32xf32>
    %277 = vector.multi_reduction <add>, %276, %cst_115 [1] : vector<8x8x32xf32> to vector<8x32xf32>
    %278 = arith.truncf %277 : vector<8x32xf32> to vector<8x32xbf16>
    %cst_116 = arith.constant dense<0.000000e+00> : vector<8x96xf32>
    %279 = tpu.matmul %278, %0, %cst_116 {dimension_numbers = #tpu.dot_dimension_numbers<[1], [0], [0], [1], [0, 0, 1, 1], [], []>} : vector<8x32xbf16>, vector<32x96xbf16>, vector<8x96xf32> -> vector<8x96xf32>
    %280 = vector.extract_strided_slice %279 {offsets = [0, 0], sizes = [8, 64], strides = [1, 1]} : vector<8x96xf32> to vector<8x64xf32>
    %281 = vector.extract_strided_slice %279 {offsets = [0, 64], sizes = [8, 32], strides = [1, 1]} : vector<8x96xf32> to vector<8x32xf32>
    %c3_117 = arith.constant 3 : index
    %c0_118 = arith.constant 0 : index
    %c0_119 = arith.constant 0 : index
    %282 = vector.load %arg6[%c3_117, %c0_118, %c0_119] : memref<8x8x32xbf16, #tpu.memory_space<vmem>>, vector<1x8x32xbf16>
    %283 = vector.shape_cast %282 : vector<1x8x32xbf16> to vector<8x32xbf16>
    %284 = arith.extf %283 : vector<8x32xbf16> to vector<8x32xf32>
    %285 = arith.addf %281, %284 : vector<8x32xf32>
    %cst_120 = arith.constant 5.000000e-01 : f32
    %286 = vector.broadcast %cst_120 : f32 to vector<8x32xf32>
    %287 = arith.mulf %286, %285 : vector<8x32xf32>
    %288 = math.tanh %287 : vector<8x32xf32>
    %cst_121 = arith.constant 5.000000e-01 : f32
    %289 = vector.broadcast %cst_121 : f32 to vector<8x32xf32>
    %290 = arith.mulf %289, %288 : vector<8x32xf32>
    %cst_122 = arith.constant 5.000000e-01 : f32
    %291 = vector.broadcast %cst_122 : f32 to vector<8x32xf32>
    %292 = arith.addf %290, %291 : vector<8x32xf32>
    %cst_123 = arith.constant dense<0.000000e+00> : vector<8xf32>
    %293 = vector.multi_reduction <add>, %292, %cst_123 [1] : vector<8x32xf32> to vector<8xf32>
    %294 = vector.shape_cast %293 : vector<8xf32> to vector<8x1xf32>
    %cst_124 = arith.constant 3.125000e-02 : f32
    %295 = vector.broadcast %cst_124 : f32 to vector<8x1xf32>
    %296 = arith.mulf %294, %295 : vector<8x1xf32>
    %c4 = arith.constant 4 : index
    %c0_125 = arith.constant 0 : index
    %c0_126 = arith.constant 0 : index
    %297 = vector.load %arg4[%c4, %c0_125, %c0_126] : memref<8x8x64xbf16, #tpu.memory_space<vmem>>, vector<1x8x64xbf16>
    %298 = vector.shape_cast %297 : vector<1x8x64xbf16> to vector<8x64xbf16>
    %299 = arith.extf %298 : vector<8x64xbf16> to vector<8x64xf32>
    %300 = arith.addf %280, %299 : vector<8x64xf32>
    %301 = vector.extract_strided_slice %300 {offsets = [0, 0], sizes = [8, 32], strides = [1, 1]} : vector<8x64xf32> to vector<8x32xf32>
    %302 = math.tanh %301 : vector<8x32xf32>
    %303 = vector.extract_strided_slice %300 {offsets = [0, 32], sizes = [8, 32], strides = [1, 1]} : vector<8x64xf32> to vector<8x32xf32>
    %cst_127 = arith.constant 5.000000e-01 : f32
    %304 = vector.broadcast %cst_127 : f32 to vector<8x32xf32>
    %305 = arith.mulf %304, %303 : vector<8x32xf32>
    %306 = math.tanh %305 : vector<8x32xf32>
    %cst_128 = arith.constant 5.000000e-01 : f32
    %307 = vector.broadcast %cst_128 : f32 to vector<8x32xf32>
    %308 = arith.mulf %307, %306 : vector<8x32xf32>
    %cst_129 = arith.constant 5.000000e-01 : f32
    %309 = vector.broadcast %cst_129 : f32 to vector<8x32xf32>
    %310 = arith.addf %308, %309 : vector<8x32xf32>
    %cst_130 = arith.constant 1.000000e+00 : f32
    %311 = vector.broadcast %cst_130 : f32 to vector<8x32xf32>
    %312 = arith.addf %302, %311 : vector<8x32xf32>
    %313 = arith.mulf %310, %312 : vector<8x32xf32>
    %cst_131 = arith.constant 5.000000e-01 : f32
    %314 = vector.broadcast %cst_131 : f32 to vector<8x32xf32>
    %315 = arith.mulf %313, %314 : vector<8x32xf32>
    %316 = vector.shape_cast %273 : vector<8x8xf32> to vector<8x8x1xf32>
    %317 = vector.shape_cast %315 : vector<8x32xf32> to vector<8x1x32xf32>
    %318 = vector.broadcast %316 : vector<8x8x1xf32> to vector<8x8x32xf32>
    %319 = vector.broadcast %317 : vector<8x1x32xf32> to vector<8x8x32xf32>
    %320 = arith.mulf %318, %319 : vector<8x8x32xf32>
    %321 = arith.truncf %315 : vector<8x32xf32> to vector<8x32xbf16>
    %cst_132 = arith.constant dense<0.000000e+00> : vector<8x32xf32>
    %322 = tpu.matmul %321, %2, %cst_132 {dimension_numbers = #tpu.dot_dimension_numbers<[1], [0], [0], [1], [0, 0, 1, 1], [], []>} : vector<8x32xbf16>, vector<32x32xbf16>, vector<8x32xf32> -> vector<8x32xf32>
    %c4_133 = arith.constant 4 : index
    %c0_134 = arith.constant 0 : index
    %c0_135 = arith.constant 0 : index
    %323 = vector.load %arg5[%c4_133, %c0_134, %c0_135] : memref<8x8x32xbf16, #tpu.memory_space<vmem>>, vector<1x8x32xbf16>
    %324 = vector.shape_cast %323 : vector<1x8x32xbf16> to vector<8x32xbf16>
    %325 = arith.extf %324 : vector<8x32xbf16> to vector<8x32xf32>
    %326 = arith.addf %322, %325 : vector<8x32xf32>
    %327 = vector.shape_cast %270 : vector<8x8x32xf32> to vector<64x32xf32>
    %328 = arith.truncf %327 : vector<64x32xf32> to vector<64x32xbf16>
    %cst_136 = arith.constant dense<0.000000e+00> : vector<64x32xf32>
    %329 = tpu.matmul %328, %1, %cst_136 {dimension_numbers = #tpu.dot_dimension_numbers<[1], [0], [0], [1], [0, 0, 1, 1], [], []>} : vector<64x32xbf16>, vector<32x32xbf16>, vector<64x32xf32> -> vector<64x32xf32>
    %330 = vector.shape_cast %329 : vector<64x32xf32> to vector<8x8x32xf32>
    %331 = vector.shape_cast %326 : vector<8x32xf32> to vector<8x1x32xf32>
    %332 = vector.broadcast %331 : vector<8x1x32xf32> to vector<8x8x32xf32>
    %333 = arith.addf %330, %332 : vector<8x8x32xf32>
    %cst_137 = arith.constant 5.000000e-01 : f32
    %334 = vector.broadcast %cst_137 : f32 to vector<8x8x32xf32>
    %335 = arith.mulf %334, %333 : vector<8x8x32xf32>
    %336 = math.tanh %335 : vector<8x8x32xf32>
    %cst_138 = arith.constant 5.000000e-01 : f32
    %337 = vector.broadcast %cst_138 : f32 to vector<8x8x32xf32>
    %338 = arith.mulf %337, %336 : vector<8x8x32xf32>
    %cst_139 = arith.constant 5.000000e-01 : f32
    %339 = vector.broadcast %cst_139 : f32 to vector<8x8x32xf32>
    %340 = arith.addf %338, %339 : vector<8x8x32xf32>
    %341 = arith.mulf %340, %270 : vector<8x8x32xf32>
    %342 = arith.addf %320, %341 : vector<8x8x32xf32>
    %c4_140 = arith.constant 4 : index
    %c0_141 = arith.constant 0 : index
    %c0_142 = arith.constant 0 : index
    %343 = vector.load %arg3[%c4_140, %c0_141, %c0_142] : memref<8x8x8xbf16, #tpu.memory_space<vmem>>, vector<1x8x8xbf16>
    %344 = vector.shape_cast %343 : vector<1x8x8xbf16> to vector<8x8xbf16>
    %345 = arith.extf %344 : vector<8x8xbf16> to vector<8x8xf32>
    %346 = vector.shape_cast %345 : vector<8x8xf32> to vector<8x8x1xf32>
    %347 = vector.broadcast %346 : vector<8x8x1xf32> to vector<8x8x32xf32>
    %348 = arith.mulf %347, %342 : vector<8x8x32xf32>
    %cst_143 = arith.constant dense<0.000000e+00> : vector<8x32xf32>
    %349 = vector.multi_reduction <add>, %348, %cst_143 [1] : vector<8x8x32xf32> to vector<8x32xf32>
    %350 = arith.truncf %349 : vector<8x32xf32> to vector<8x32xbf16>
    %cst_144 = arith.constant dense<0.000000e+00> : vector<8x96xf32>
    %351 = tpu.matmul %350, %0, %cst_144 {dimension_numbers = #tpu.dot_dimension_numbers<[1], [0], [0], [1], [0, 0, 1, 1], [], []>} : vector<8x32xbf16>, vector<32x96xbf16>, vector<8x96xf32> -> vector<8x96xf32>
    %352 = vector.extract_strided_slice %351 {offsets = [0, 0], sizes = [8, 64], strides = [1, 1]} : vector<8x96xf32> to vector<8x64xf32>
    %353 = vector.extract_strided_slice %351 {offsets = [0, 64], sizes = [8, 32], strides = [1, 1]} : vector<8x96xf32> to vector<8x32xf32>
    %c4_145 = arith.constant 4 : index
    %c0_146 = arith.constant 0 : index
    %c0_147 = arith.constant 0 : index
    %354 = vector.load %arg6[%c4_145, %c0_146, %c0_147] : memref<8x8x32xbf16, #tpu.memory_space<vmem>>, vector<1x8x32xbf16>
    %355 = vector.shape_cast %354 : vector<1x8x32xbf16> to vector<8x32xbf16>
    %356 = arith.extf %355 : vector<8x32xbf16> to vector<8x32xf32>
    %357 = arith.addf %353, %356 : vector<8x32xf32>
    %cst_148 = arith.constant 5.000000e-01 : f32
    %358 = vector.broadcast %cst_148 : f32 to vector<8x32xf32>
    %359 = arith.mulf %358, %357 : vector<8x32xf32>
    %360 = math.tanh %359 : vector<8x32xf32>
    %cst_149 = arith.constant 5.000000e-01 : f32
    %361 = vector.broadcast %cst_149 : f32 to vector<8x32xf32>
    %362 = arith.mulf %361, %360 : vector<8x32xf32>
    %cst_150 = arith.constant 5.000000e-01 : f32
    %363 = vector.broadcast %cst_150 : f32 to vector<8x32xf32>
    %364 = arith.addf %362, %363 : vector<8x32xf32>
    %cst_151 = arith.constant dense<0.000000e+00> : vector<8xf32>
    %365 = vector.multi_reduction <add>, %364, %cst_151 [1] : vector<8x32xf32> to vector<8xf32>
    %366 = vector.shape_cast %365 : vector<8xf32> to vector<8x1xf32>
    %cst_152 = arith.constant 3.125000e-02 : f32
    %367 = vector.broadcast %cst_152 : f32 to vector<8x1xf32>
    %368 = arith.mulf %366, %367 : vector<8x1xf32>
    %c5 = arith.constant 5 : index
    %c0_153 = arith.constant 0 : index
    %c0_154 = arith.constant 0 : index
    %369 = vector.load %arg4[%c5, %c0_153, %c0_154] : memref<8x8x64xbf16, #tpu.memory_space<vmem>>, vector<1x8x64xbf16>
    %370 = vector.shape_cast %369 : vector<1x8x64xbf16> to vector<8x64xbf16>
    %371 = arith.extf %370 : vector<8x64xbf16> to vector<8x64xf32>
    %372 = arith.addf %352, %371 : vector<8x64xf32>
    %373 = vector.extract_strided_slice %372 {offsets = [0, 0], sizes = [8, 32], strides = [1, 1]} : vector<8x64xf32> to vector<8x32xf32>
    %374 = math.tanh %373 : vector<8x32xf32>
    %375 = vector.extract_strided_slice %372 {offsets = [0, 32], sizes = [8, 32], strides = [1, 1]} : vector<8x64xf32> to vector<8x32xf32>
    %cst_155 = arith.constant 5.000000e-01 : f32
    %376 = vector.broadcast %cst_155 : f32 to vector<8x32xf32>
    %377 = arith.mulf %376, %375 : vector<8x32xf32>
    %378 = math.tanh %377 : vector<8x32xf32>
    %cst_156 = arith.constant 5.000000e-01 : f32
    %379 = vector.broadcast %cst_156 : f32 to vector<8x32xf32>
    %380 = arith.mulf %379, %378 : vector<8x32xf32>
    %cst_157 = arith.constant 5.000000e-01 : f32
    %381 = vector.broadcast %cst_157 : f32 to vector<8x32xf32>
    %382 = arith.addf %380, %381 : vector<8x32xf32>
    %cst_158 = arith.constant 1.000000e+00 : f32
    %383 = vector.broadcast %cst_158 : f32 to vector<8x32xf32>
    %384 = arith.addf %374, %383 : vector<8x32xf32>
    %385 = arith.mulf %382, %384 : vector<8x32xf32>
    %cst_159 = arith.constant 5.000000e-01 : f32
    %386 = vector.broadcast %cst_159 : f32 to vector<8x32xf32>
    %387 = arith.mulf %385, %386 : vector<8x32xf32>
    %388 = vector.shape_cast %345 : vector<8x8xf32> to vector<8x8x1xf32>
    %389 = vector.shape_cast %387 : vector<8x32xf32> to vector<8x1x32xf32>
    %390 = vector.broadcast %388 : vector<8x8x1xf32> to vector<8x8x32xf32>
    %391 = vector.broadcast %389 : vector<8x1x32xf32> to vector<8x8x32xf32>
    %392 = arith.mulf %390, %391 : vector<8x8x32xf32>
    %393 = arith.truncf %387 : vector<8x32xf32> to vector<8x32xbf16>
    %cst_160 = arith.constant dense<0.000000e+00> : vector<8x32xf32>
    %394 = tpu.matmul %393, %2, %cst_160 {dimension_numbers = #tpu.dot_dimension_numbers<[1], [0], [0], [1], [0, 0, 1, 1], [], []>} : vector<8x32xbf16>, vector<32x32xbf16>, vector<8x32xf32> -> vector<8x32xf32>
    %c5_161 = arith.constant 5 : index
    %c0_162 = arith.constant 0 : index
    %c0_163 = arith.constant 0 : index
    %395 = vector.load %arg5[%c5_161, %c0_162, %c0_163] : memref<8x8x32xbf16, #tpu.memory_space<vmem>>, vector<1x8x32xbf16>
    %396 = vector.shape_cast %395 : vector<1x8x32xbf16> to vector<8x32xbf16>
    %397 = arith.extf %396 : vector<8x32xbf16> to vector<8x32xf32>
    %398 = arith.addf %394, %397 : vector<8x32xf32>
    %399 = vector.shape_cast %342 : vector<8x8x32xf32> to vector<64x32xf32>
    %400 = arith.truncf %399 : vector<64x32xf32> to vector<64x32xbf16>
    %cst_164 = arith.constant dense<0.000000e+00> : vector<64x32xf32>
    %401 = tpu.matmul %400, %1, %cst_164 {dimension_numbers = #tpu.dot_dimension_numbers<[1], [0], [0], [1], [0, 0, 1, 1], [], []>} : vector<64x32xbf16>, vector<32x32xbf16>, vector<64x32xf32> -> vector<64x32xf32>
    %402 = vector.shape_cast %401 : vector<64x32xf32> to vector<8x8x32xf32>
    %403 = vector.shape_cast %398 : vector<8x32xf32> to vector<8x1x32xf32>
    %404 = vector.broadcast %403 : vector<8x1x32xf32> to vector<8x8x32xf32>
    %405 = arith.addf %402, %404 : vector<8x8x32xf32>
    %cst_165 = arith.constant 5.000000e-01 : f32
    %406 = vector.broadcast %cst_165 : f32 to vector<8x8x32xf32>
    %407 = arith.mulf %406, %405 : vector<8x8x32xf32>
    %408 = math.tanh %407 : vector<8x8x32xf32>
    %cst_166 = arith.constant 5.000000e-01 : f32
    %409 = vector.broadcast %cst_166 : f32 to vector<8x8x32xf32>
    %410 = arith.mulf %409, %408 : vector<8x8x32xf32>
    %cst_167 = arith.constant 5.000000e-01 : f32
    %411 = vector.broadcast %cst_167 : f32 to vector<8x8x32xf32>
    %412 = arith.addf %410, %411 : vector<8x8x32xf32>
    %413 = arith.mulf %412, %342 : vector<8x8x32xf32>
    %414 = arith.addf %392, %413 : vector<8x8x32xf32>
    %c5_168 = arith.constant 5 : index
    %c0_169 = arith.constant 0 : index
    %c0_170 = arith.constant 0 : index
    %415 = vector.load %arg3[%c5_168, %c0_169, %c0_170] : memref<8x8x8xbf16, #tpu.memory_space<vmem>>, vector<1x8x8xbf16>
    %416 = vector.shape_cast %415 : vector<1x8x8xbf16> to vector<8x8xbf16>
    %417 = arith.extf %416 : vector<8x8xbf16> to vector<8x8xf32>
    %418 = vector.shape_cast %417 : vector<8x8xf32> to vector<8x8x1xf32>
    %419 = vector.broadcast %418 : vector<8x8x1xf32> to vector<8x8x32xf32>
    %420 = arith.mulf %419, %414 : vector<8x8x32xf32>
    %cst_171 = arith.constant dense<0.000000e+00> : vector<8x32xf32>
    %421 = vector.multi_reduction <add>, %420, %cst_171 [1] : vector<8x8x32xf32> to vector<8x32xf32>
    %422 = arith.truncf %421 : vector<8x32xf32> to vector<8x32xbf16>
    %cst_172 = arith.constant dense<0.000000e+00> : vector<8x96xf32>
    %423 = tpu.matmul %422, %0, %cst_172 {dimension_numbers = #tpu.dot_dimension_numbers<[1], [0], [0], [1], [0, 0, 1, 1], [], []>} : vector<8x32xbf16>, vector<32x96xbf16>, vector<8x96xf32> -> vector<8x96xf32>
    %424 = vector.extract_strided_slice %423 {offsets = [0, 0], sizes = [8, 64], strides = [1, 1]} : vector<8x96xf32> to vector<8x64xf32>
    %425 = vector.extract_strided_slice %423 {offsets = [0, 64], sizes = [8, 32], strides = [1, 1]} : vector<8x96xf32> to vector<8x32xf32>
    %c5_173 = arith.constant 5 : index
    %c0_174 = arith.constant 0 : index
    %c0_175 = arith.constant 0 : index
    %426 = vector.load %arg6[%c5_173, %c0_174, %c0_175] : memref<8x8x32xbf16, #tpu.memory_space<vmem>>, vector<1x8x32xbf16>
    %427 = vector.shape_cast %426 : vector<1x8x32xbf16> to vector<8x32xbf16>
    %428 = arith.extf %427 : vector<8x32xbf16> to vector<8x32xf32>
    %429 = arith.addf %425, %428 : vector<8x32xf32>
    %cst_176 = arith.constant 5.000000e-01 : f32
    %430 = vector.broadcast %cst_176 : f32 to vector<8x32xf32>
    %431 = arith.mulf %430, %429 : vector<8x32xf32>
    %432 = math.tanh %431 : vector<8x32xf32>
    %cst_177 = arith.constant 5.000000e-01 : f32
    %433 = vector.broadcast %cst_177 : f32 to vector<8x32xf32>
    %434 = arith.mulf %433, %432 : vector<8x32xf32>
    %cst_178 = arith.constant 5.000000e-01 : f32
    %435 = vector.broadcast %cst_178 : f32 to vector<8x32xf32>
    %436 = arith.addf %434, %435 : vector<8x32xf32>
    %cst_179 = arith.constant dense<0.000000e+00> : vector<8xf32>
    %437 = vector.multi_reduction <add>, %436, %cst_179 [1] : vector<8x32xf32> to vector<8xf32>
    %438 = vector.shape_cast %437 : vector<8xf32> to vector<8x1xf32>
    %cst_180 = arith.constant 3.125000e-02 : f32
    %439 = vector.broadcast %cst_180 : f32 to vector<8x1xf32>
    %440 = arith.mulf %438, %439 : vector<8x1xf32>
    %c6 = arith.constant 6 : index
    %c0_181 = arith.constant 0 : index
    %c0_182 = arith.constant 0 : index
    %441 = vector.load %arg4[%c6, %c0_181, %c0_182] : memref<8x8x64xbf16, #tpu.memory_space<vmem>>, vector<1x8x64xbf16>
    %442 = vector.shape_cast %441 : vector<1x8x64xbf16> to vector<8x64xbf16>
    %443 = arith.extf %442 : vector<8x64xbf16> to vector<8x64xf32>
    %444 = arith.addf %424, %443 : vector<8x64xf32>
    %445 = vector.extract_strided_slice %444 {offsets = [0, 0], sizes = [8, 32], strides = [1, 1]} : vector<8x64xf32> to vector<8x32xf32>
    %446 = math.tanh %445 : vector<8x32xf32>
    %447 = vector.extract_strided_slice %444 {offsets = [0, 32], sizes = [8, 32], strides = [1, 1]} : vector<8x64xf32> to vector<8x32xf32>
    %cst_183 = arith.constant 5.000000e-01 : f32
    %448 = vector.broadcast %cst_183 : f32 to vector<8x32xf32>
    %449 = arith.mulf %448, %447 : vector<8x32xf32>
    %450 = math.tanh %449 : vector<8x32xf32>
    %cst_184 = arith.constant 5.000000e-01 : f32
    %451 = vector.broadcast %cst_184 : f32 to vector<8x32xf32>
    %452 = arith.mulf %451, %450 : vector<8x32xf32>
    %cst_185 = arith.constant 5.000000e-01 : f32
    %453 = vector.broadcast %cst_185 : f32 to vector<8x32xf32>
    %454 = arith.addf %452, %453 : vector<8x32xf32>
    %cst_186 = arith.constant 1.000000e+00 : f32
    %455 = vector.broadcast %cst_186 : f32 to vector<8x32xf32>
    %456 = arith.addf %446, %455 : vector<8x32xf32>
    %457 = arith.mulf %454, %456 : vector<8x32xf32>
    %cst_187 = arith.constant 5.000000e-01 : f32
    %458 = vector.broadcast %cst_187 : f32 to vector<8x32xf32>
    %459 = arith.mulf %457, %458 : vector<8x32xf32>
    %460 = vector.shape_cast %417 : vector<8x8xf32> to vector<8x8x1xf32>
    %461 = vector.shape_cast %459 : vector<8x32xf32> to vector<8x1x32xf32>
    %462 = vector.broadcast %460 : vector<8x8x1xf32> to vector<8x8x32xf32>
    %463 = vector.broadcast %461 : vector<8x1x32xf32> to vector<8x8x32xf32>
    %464 = arith.mulf %462, %463 : vector<8x8x32xf32>
    %465 = arith.truncf %459 : vector<8x32xf32> to vector<8x32xbf16>
    %cst_188 = arith.constant dense<0.000000e+00> : vector<8x32xf32>
    %466 = tpu.matmul %465, %2, %cst_188 {dimension_numbers = #tpu.dot_dimension_numbers<[1], [0], [0], [1], [0, 0, 1, 1], [], []>} : vector<8x32xbf16>, vector<32x32xbf16>, vector<8x32xf32> -> vector<8x32xf32>
    %c6_189 = arith.constant 6 : index
    %c0_190 = arith.constant 0 : index
    %c0_191 = arith.constant 0 : index
    %467 = vector.load %arg5[%c6_189, %c0_190, %c0_191] : memref<8x8x32xbf16, #tpu.memory_space<vmem>>, vector<1x8x32xbf16>
    %468 = vector.shape_cast %467 : vector<1x8x32xbf16> to vector<8x32xbf16>
    %469 = arith.extf %468 : vector<8x32xbf16> to vector<8x32xf32>
    %470 = arith.addf %466, %469 : vector<8x32xf32>
    %471 = vector.shape_cast %414 : vector<8x8x32xf32> to vector<64x32xf32>
    %472 = arith.truncf %471 : vector<64x32xf32> to vector<64x32xbf16>
    %cst_192 = arith.constant dense<0.000000e+00> : vector<64x32xf32>
    %473 = tpu.matmul %472, %1, %cst_192 {dimension_numbers = #tpu.dot_dimension_numbers<[1], [0], [0], [1], [0, 0, 1, 1], [], []>} : vector<64x32xbf16>, vector<32x32xbf16>, vector<64x32xf32> -> vector<64x32xf32>
    %474 = vector.shape_cast %473 : vector<64x32xf32> to vector<8x8x32xf32>
    %475 = vector.shape_cast %470 : vector<8x32xf32> to vector<8x1x32xf32>
    %476 = vector.broadcast %475 : vector<8x1x32xf32> to vector<8x8x32xf32>
    %477 = arith.addf %474, %476 : vector<8x8x32xf32>
    %cst_193 = arith.constant 5.000000e-01 : f32
    %478 = vector.broadcast %cst_193 : f32 to vector<8x8x32xf32>
    %479 = arith.mulf %478, %477 : vector<8x8x32xf32>
    %480 = math.tanh %479 : vector<8x8x32xf32>
    %cst_194 = arith.constant 5.000000e-01 : f32
    %481 = vector.broadcast %cst_194 : f32 to vector<8x8x32xf32>
    %482 = arith.mulf %481, %480 : vector<8x8x32xf32>
    %cst_195 = arith.constant 5.000000e-01 : f32
    %483 = vector.broadcast %cst_195 : f32 to vector<8x8x32xf32>
    %484 = arith.addf %482, %483 : vector<8x8x32xf32>
    %485 = arith.mulf %484, %414 : vector<8x8x32xf32>
    %486 = arith.addf %464, %485 : vector<8x8x32xf32>
    %c6_196 = arith.constant 6 : index
    %c0_197 = arith.constant 0 : index
    %c0_198 = arith.constant 0 : index
    %487 = vector.load %arg3[%c6_196, %c0_197, %c0_198] : memref<8x8x8xbf16, #tpu.memory_space<vmem>>, vector<1x8x8xbf16>
    %488 = vector.shape_cast %487 : vector<1x8x8xbf16> to vector<8x8xbf16>
    %489 = arith.extf %488 : vector<8x8xbf16> to vector<8x8xf32>
    %490 = vector.shape_cast %489 : vector<8x8xf32> to vector<8x8x1xf32>
    %491 = vector.broadcast %490 : vector<8x8x1xf32> to vector<8x8x32xf32>
    %492 = arith.mulf %491, %486 : vector<8x8x32xf32>
    %cst_199 = arith.constant dense<0.000000e+00> : vector<8x32xf32>
    %493 = vector.multi_reduction <add>, %492, %cst_199 [1] : vector<8x8x32xf32> to vector<8x32xf32>
    %494 = arith.truncf %493 : vector<8x32xf32> to vector<8x32xbf16>
    %cst_200 = arith.constant dense<0.000000e+00> : vector<8x96xf32>
    %495 = tpu.matmul %494, %0, %cst_200 {dimension_numbers = #tpu.dot_dimension_numbers<[1], [0], [0], [1], [0, 0, 1, 1], [], []>} : vector<8x32xbf16>, vector<32x96xbf16>, vector<8x96xf32> -> vector<8x96xf32>
    %496 = vector.extract_strided_slice %495 {offsets = [0, 0], sizes = [8, 64], strides = [1, 1]} : vector<8x96xf32> to vector<8x64xf32>
    %497 = vector.extract_strided_slice %495 {offsets = [0, 64], sizes = [8, 32], strides = [1, 1]} : vector<8x96xf32> to vector<8x32xf32>
    %c6_201 = arith.constant 6 : index
    %c0_202 = arith.constant 0 : index
    %c0_203 = arith.constant 0 : index
    %498 = vector.load %arg6[%c6_201, %c0_202, %c0_203] : memref<8x8x32xbf16, #tpu.memory_space<vmem>>, vector<1x8x32xbf16>
    %499 = vector.shape_cast %498 : vector<1x8x32xbf16> to vector<8x32xbf16>
    %500 = arith.extf %499 : vector<8x32xbf16> to vector<8x32xf32>
    %501 = arith.addf %497, %500 : vector<8x32xf32>
    %cst_204 = arith.constant 5.000000e-01 : f32
    %502 = vector.broadcast %cst_204 : f32 to vector<8x32xf32>
    %503 = arith.mulf %502, %501 : vector<8x32xf32>
    %504 = math.tanh %503 : vector<8x32xf32>
    %cst_205 = arith.constant 5.000000e-01 : f32
    %505 = vector.broadcast %cst_205 : f32 to vector<8x32xf32>
    %506 = arith.mulf %505, %504 : vector<8x32xf32>
    %cst_206 = arith.constant 5.000000e-01 : f32
    %507 = vector.broadcast %cst_206 : f32 to vector<8x32xf32>
    %508 = arith.addf %506, %507 : vector<8x32xf32>
    %cst_207 = arith.constant dense<0.000000e+00> : vector<8xf32>
    %509 = vector.multi_reduction <add>, %508, %cst_207 [1] : vector<8x32xf32> to vector<8xf32>
    %510 = vector.shape_cast %509 : vector<8xf32> to vector<8x1xf32>
    %cst_208 = arith.constant 3.125000e-02 : f32
    %511 = vector.broadcast %cst_208 : f32 to vector<8x1xf32>
    %512 = arith.mulf %510, %511 : vector<8x1xf32>
    %c7 = arith.constant 7 : index
    %c0_209 = arith.constant 0 : index
    %c0_210 = arith.constant 0 : index
    %513 = vector.load %arg4[%c7, %c0_209, %c0_210] : memref<8x8x64xbf16, #tpu.memory_space<vmem>>, vector<1x8x64xbf16>
    %514 = vector.shape_cast %513 : vector<1x8x64xbf16> to vector<8x64xbf16>
    %515 = arith.extf %514 : vector<8x64xbf16> to vector<8x64xf32>
    %516 = arith.addf %496, %515 : vector<8x64xf32>
    %517 = vector.extract_strided_slice %516 {offsets = [0, 0], sizes = [8, 32], strides = [1, 1]} : vector<8x64xf32> to vector<8x32xf32>
    %518 = math.tanh %517 : vector<8x32xf32>
    %519 = vector.extract_strided_slice %516 {offsets = [0, 32], sizes = [8, 32], strides = [1, 1]} : vector<8x64xf32> to vector<8x32xf32>
    %cst_211 = arith.constant 5.000000e-01 : f32
    %520 = vector.broadcast %cst_211 : f32 to vector<8x32xf32>
    %521 = arith.mulf %520, %519 : vector<8x32xf32>
    %522 = math.tanh %521 : vector<8x32xf32>
    %cst_212 = arith.constant 5.000000e-01 : f32
    %523 = vector.broadcast %cst_212 : f32 to vector<8x32xf32>
    %524 = arith.mulf %523, %522 : vector<8x32xf32>
    %cst_213 = arith.constant 5.000000e-01 : f32
    %525 = vector.broadcast %cst_213 : f32 to vector<8x32xf32>
    %526 = arith.addf %524, %525 : vector<8x32xf32>
    %cst_214 = arith.constant 1.000000e+00 : f32
    %527 = vector.broadcast %cst_214 : f32 to vector<8x32xf32>
    %528 = arith.addf %518, %527 : vector<8x32xf32>
    %529 = arith.mulf %526, %528 : vector<8x32xf32>
    %cst_215 = arith.constant 5.000000e-01 : f32
    %530 = vector.broadcast %cst_215 : f32 to vector<8x32xf32>
    %531 = arith.mulf %529, %530 : vector<8x32xf32>
    %532 = vector.shape_cast %489 : vector<8x8xf32> to vector<8x8x1xf32>
    %533 = vector.shape_cast %531 : vector<8x32xf32> to vector<8x1x32xf32>
    %534 = vector.broadcast %532 : vector<8x8x1xf32> to vector<8x8x32xf32>
    %535 = vector.broadcast %533 : vector<8x1x32xf32> to vector<8x8x32xf32>
    %536 = arith.mulf %534, %535 : vector<8x8x32xf32>
    %537 = arith.truncf %531 : vector<8x32xf32> to vector<8x32xbf16>
    %cst_216 = arith.constant dense<0.000000e+00> : vector<8x32xf32>
    %538 = tpu.matmul %537, %2, %cst_216 {dimension_numbers = #tpu.dot_dimension_numbers<[1], [0], [0], [1], [0, 0, 1, 1], [], []>} : vector<8x32xbf16>, vector<32x32xbf16>, vector<8x32xf32> -> vector<8x32xf32>
    %c7_217 = arith.constant 7 : index
    %c0_218 = arith.constant 0 : index
    %c0_219 = arith.constant 0 : index
    %539 = vector.load %arg5[%c7_217, %c0_218, %c0_219] : memref<8x8x32xbf16, #tpu.memory_space<vmem>>, vector<1x8x32xbf16>
    %540 = vector.shape_cast %539 : vector<1x8x32xbf16> to vector<8x32xbf16>
    %541 = arith.extf %540 : vector<8x32xbf16> to vector<8x32xf32>
    %542 = arith.addf %538, %541 : vector<8x32xf32>
    %543 = vector.shape_cast %486 : vector<8x8x32xf32> to vector<64x32xf32>
    %544 = arith.truncf %543 : vector<64x32xf32> to vector<64x32xbf16>
    %cst_220 = arith.constant dense<0.000000e+00> : vector<64x32xf32>
    %545 = tpu.matmul %544, %1, %cst_220 {dimension_numbers = #tpu.dot_dimension_numbers<[1], [0], [0], [1], [0, 0, 1, 1], [], []>} : vector<64x32xbf16>, vector<32x32xbf16>, vector<64x32xf32> -> vector<64x32xf32>
    %546 = vector.shape_cast %545 : vector<64x32xf32> to vector<8x8x32xf32>
    %547 = vector.shape_cast %542 : vector<8x32xf32> to vector<8x1x32xf32>
    %548 = vector.broadcast %547 : vector<8x1x32xf32> to vector<8x8x32xf32>
    %549 = arith.addf %546, %548 : vector<8x8x32xf32>
    %cst_221 = arith.constant 5.000000e-01 : f32
    %550 = vector.broadcast %cst_221 : f32 to vector<8x8x32xf32>
    %551 = arith.mulf %550, %549 : vector<8x8x32xf32>
    %552 = math.tanh %551 : vector<8x8x32xf32>
    %cst_222 = arith.constant 5.000000e-01 : f32
    %553 = vector.broadcast %cst_222 : f32 to vector<8x8x32xf32>
    %554 = arith.mulf %553, %552 : vector<8x8x32xf32>
    %cst_223 = arith.constant 5.000000e-01 : f32
    %555 = vector.broadcast %cst_223 : f32 to vector<8x8x32xf32>
    %556 = arith.addf %554, %555 : vector<8x8x32xf32>
    %557 = arith.mulf %556, %486 : vector<8x8x32xf32>
    %558 = arith.addf %536, %557 : vector<8x8x32xf32>
    %c7_224 = arith.constant 7 : index
    %c0_225 = arith.constant 0 : index
    %c0_226 = arith.constant 0 : index
    %559 = vector.load %arg3[%c7_224, %c0_225, %c0_226] : memref<8x8x8xbf16, #tpu.memory_space<vmem>>, vector<1x8x8xbf16>
    %560 = vector.shape_cast %559 : vector<1x8x8xbf16> to vector<8x8xbf16>
    %561 = arith.extf %560 : vector<8x8xbf16> to vector<8x8xf32>
    %562 = vector.shape_cast %561 : vector<8x8xf32> to vector<8x8x1xf32>
    %563 = vector.broadcast %562 : vector<8x8x1xf32> to vector<8x8x32xf32>
    %564 = arith.mulf %563, %558 : vector<8x8x32xf32>
    %cst_227 = arith.constant dense<0.000000e+00> : vector<8x32xf32>
    %565 = vector.multi_reduction <add>, %564, %cst_227 [1] : vector<8x8x32xf32> to vector<8x32xf32>
    %566 = arith.truncf %565 : vector<8x32xf32> to vector<8x32xbf16>
    %cst_228 = arith.constant dense<0.000000e+00> : vector<8x96xf32>
    %567 = tpu.matmul %566, %0, %cst_228 {dimension_numbers = #tpu.dot_dimension_numbers<[1], [0], [0], [1], [0, 0, 1, 1], [], []>} : vector<8x32xbf16>, vector<32x96xbf16>, vector<8x96xf32> -> vector<8x96xf32>
    %568 = vector.extract_strided_slice %567 {offsets = [0, 0], sizes = [8, 64], strides = [1, 1]} : vector<8x96xf32> to vector<8x64xf32>
    %569 = vector.extract_strided_slice %567 {offsets = [0, 64], sizes = [8, 32], strides = [1, 1]} : vector<8x96xf32> to vector<8x32xf32>
    %c7_229 = arith.constant 7 : index
    %c0_230 = arith.constant 0 : index
    %c0_231 = arith.constant 0 : index
    %570 = vector.load %arg6[%c7_229, %c0_230, %c0_231] : memref<8x8x32xbf16, #tpu.memory_space<vmem>>, vector<1x8x32xbf16>
    %571 = vector.shape_cast %570 : vector<1x8x32xbf16> to vector<8x32xbf16>
    %572 = arith.extf %571 : vector<8x32xbf16> to vector<8x32xf32>
    %573 = arith.addf %569, %572 : vector<8x32xf32>
    %cst_232 = arith.constant 5.000000e-01 : f32
    %574 = vector.broadcast %cst_232 : f32 to vector<8x32xf32>
    %575 = arith.mulf %574, %573 : vector<8x32xf32>
    %576 = math.tanh %575 : vector<8x32xf32>
    %cst_233 = arith.constant 5.000000e-01 : f32
    %577 = vector.broadcast %cst_233 : f32 to vector<8x32xf32>
    %578 = arith.mulf %577, %576 : vector<8x32xf32>
    %cst_234 = arith.constant 5.000000e-01 : f32
    %579 = vector.broadcast %cst_234 : f32 to vector<8x32xf32>
    %580 = arith.addf %578, %579 : vector<8x32xf32>
    %cst_235 = arith.constant dense<0.000000e+00> : vector<8xf32>
    %581 = vector.multi_reduction <add>, %580, %cst_235 [1] : vector<8x32xf32> to vector<8xf32>
    %582 = vector.shape_cast %581 : vector<8xf32> to vector<8x1xf32>
    %cst_236 = arith.constant 3.125000e-02 : f32
    %583 = vector.broadcast %cst_236 : f32 to vector<8x1xf32>
    %584 = arith.mulf %582, %583 : vector<8x1xf32>
    %c0_237 = arith.constant 0 : index
    %c0_238 = arith.constant 0 : index
    %c0_239 = arith.constant 0 : index
    %585 = vector.load %arg12[%c0_237, %c0_238, %c0_239] : memref<8x8x32xf32, #tpu.memory_space<vmem>>, vector<8x8x32xf32>
    tpu.vector_store %arg12[%c0_237, %c0_238, %c0_239], %558 {strides = array<i32>} : memref<8x8x32xf32, #tpu.memory_space<vmem>>, vector<8x8x32xf32>,
    %c0_240 = arith.constant 0 : index
    %c0_241 = arith.constant 0 : index
    %586 = vector.load %arg13[%c0_240, %c0_241] : memref<8x64xf32, #tpu.memory_space<vmem>>, vector<8x64xf32>
    tpu.vector_store %arg13[%c0_240, %c0_241], %568 {strides = array<i32>} : memref<8x64xf32, #tpu.memory_space<vmem>>, vector<8x64xf32>,
    %c0_242 = arith.constant 0 : index
    %c0_243 = arith.constant 0 : index
    %587 = vector.load %arg14[%c0_242, %c0_243] : memref<8x8xf32, #tpu.memory_space<vmem>>, vector<8x8xf32>
    tpu.vector_store %arg14[%c0_242, %c0_243], %561 {strides = array<i32>} : memref<8x8xf32, #tpu.memory_space<vmem>>, vector<8x8xf32>,
    %588 = tpu.concatenate %80, %152, %224, %296, %368, %440, %512, %584 in 1 : vector<8x1xf32>, vector<8x1xf32>, vector<8x1xf32>, vector<8x1xf32>, vector<8x1xf32>, vector<8x1xf32>, vector<8x1xf32>, vector<8x1xf32> -> vector<8x8xf32>
    %589 = tpu.transpose %588, [1, 0] : vector<8x8xf32> -> vector<8x8xf32>
    %c8_i32 = arith.constant 8 : i32
    %590 = arith.muli %arg1, %c8_i32 : i32
    %591 = tpu.assume_multiple %590, 8 : i32
    %592 = arith.index_cast %591 : i32 to index
    %c0_244 = arith.constant 0 : index
    %593 = vector.load %arg11[%592, %c0_244] : memref<16x8xf32, #tpu.memory_space<vmem>>, vector<8x8xf32>
    tpu.vector_store %arg11[%592, %c0_244], %589 {strides = array<i32>} : memref<16x8xf32, #tpu.memory_space<vmem>>, vector<8x8xf32>,
    return
  }
  func.func @transform_0(%arg0: i32, %arg1: i32) -> (i32, i32) {
    %c0_i32 = arith.constant 0 : i32
    %c0_i32_0 = arith.constant 0 : i32
    return %arg0, %c0_i32 : i32, i32
  }
  func.func @transform_1(%arg0: i32, %arg1: i32) -> (i32, i32, i32) {
    %c0_i32 = arith.constant 0 : i32
    %c0_i32_0 = arith.constant 0 : i32
    return %arg1, %arg0, %c0_i32 : i32, i32, i32
  }
  func.func @transform_2(%arg0: i32, %arg1: i32) -> (i32, i32, i32) {
    %c0_i32 = arith.constant 0 : i32
    %c0_i32_0 = arith.constant 0 : i32
    return %arg1, %arg0, %c0_i32 : i32, i32, i32
  }
  func.func @transform_3(%arg0: i32, %arg1: i32) -> (i32, i32, i32) {
    %c0_i32 = arith.constant 0 : i32
    %c0_i32_0 = arith.constant 0 : i32
    return %arg1, %arg0, %c0_i32 : i32, i32, i32
  }
  func.func @transform_4(%arg0: i32, %arg1: i32) -> (i32, i32, i32) {
    %c0_i32 = arith.constant 0 : i32
    %c0_i32_0 = arith.constant 0 : i32
    return %arg1, %arg0, %c0_i32 : i32, i32, i32
  }
  func.func @transform_5(%arg0: i32, %arg1: i32) -> (i32, i32) {
    %c0_i32 = arith.constant 0 : i32
    %c0_i32_0 = arith.constant 0 : i32
    %c0_i32_1 = arith.constant 0 : i32
    return %c0_i32, %c0_i32_0 : i32, i32
  }
  func.func @transform_6(%arg0: i32, %arg1: i32) -> (i32, i32) {
    %c0_i32 = arith.constant 0 : i32
    %c0_i32_0 = arith.constant 0 : i32
    %c0_i32_1 = arith.constant 0 : i32
    return %c0_i32, %c0_i32_0 : i32, i32
  }
  func.func @transform_7(%arg0: i32, %arg1: i32) -> (i32, i32) {
    %c0_i32 = arith.constant 0 : i32
    %c0_i32_0 = arith.constant 0 : i32
    %c0_i32_1 = arith.constant 0 : i32
    return %c0_i32, %c0_i32_0 : i32, i32
  }
  func.func @transform_8(%arg0: i32, %arg1: i32) -> (i32, i32) {
    %c0_i32 = arith.constant 0 : i32
    %c0_i32_0 = arith.constant 0 : i32
    %c0_i32_1 = arith.constant 0 : i32
    return %c0_i32, %c0_i32_0 : i32, i32
  }
  func.func @transform_9(%arg0: i32, %arg1: i32) -> (i32, i32) {
    %c0_i32 = arith.constant 0 : i32
    %c0_i32_0 = arith.constant 0 : i32
    return %c0_i32, %arg0 : i32, i32
  }
}

</mosaic_0001>

<bundles_post_ra>
// kernel: tpu_custom_call.1
= control target key start
LH: loop header
LB: loop body
LE: loop exit
PB: predicated region body
PF: predicated region fallthrough
CT: control target
= control target key end

     0   :  { %s7303_s0 = inlined_call_operand.hbm [shape: bf16[8,8], index: 0, kind: input, shape index: {}]   ;;  %s7304_s1 = inlined_call_operand.vmem [shape: bf16[16,8,8], index: 1, kind: input, shape index: {}]   ;;  %s7305_s2 = inlined_call_operand.vmem [shape: bf16[16,8,64], index: 2, kind: input, shape index: {}]   ;;  %s7306_s3 = inlined_call_operand.hbm [shape: bf16[16,8,32], index: 3, kind: input, shape index: {}]   ;;  %s7307_s4 = inlined_call_operand.hbm [shape: bf16[16,8,32], index: 4, kind: input, shape index: {}]   ;;  %s7308_s5 = inlined_call_operand.hbm [shape: f32[8,32], index: 5, kind: input, shape index: {}]   ;;  %s7309_s6 = inlined_call_operand.vmem [shape: bf16[32,96], index: 6, kind: input, shape index: {}]   ;;  %s7310_s7 = inlined_call_operand.vmem [shape: bf16[32,32], index: 7, kind: input, shape index: {}]   ;;  %s7311_s8 = inlined_call_operand.hbm [shape: bf16[32,32], index: 8, kind: input, shape index: {}]   ;;  %s7312_s9 = inlined_call_operand.vmem [shape: f32[16,8], index: 9, kind: output, shape index: {}]  }
   0x1   :  { %7318 = sst [smem:[#allocation19_spill]] %s7306_s3 }
   0x2   :  { %7319 = sst [smem:[#allocation20_spill]] %s7308_s5 }
   0x3   :  { %7320 = sst [smem:[#allocation21_spill]] %s7309_s6 }
   0x4   :  { %7321 = sst [smem:[#allocation22_spill]] %s7310_s7 }
   0x5   :  { %7322 = sst [smem:[#allocation23_spill]] %s7312_s9 }
   0x6   :  { %14 = vsyncpa [#allocation6], 0 }
   0x7   :  { %15 = vsyncpa [#allocation8], 0 }
   0x8   :  { %17 = vsyncpa [#allocation8 + $0x1], 0 }
   0x9   :  { %18 = vsyncpa [#allocation11], 0  ;;  %s5680_s30 = smov 0   ;;  %s5682_s10 = smov 0  }
   0xa   :  { %s5684_s11 = smov 0   ;;  %s5686_s12 = smov 0  }
   0xb   :  { %s5688_s13 = smov 0   ;;  %s5690_s14 = smov 0  }
   0xc LB: > { %7323 = sst [smem:[#allocation16_spill]] %s5616_s13  ;;  %s7313_s15 = sadd.s32 4294967295, %s5620_s14   ;;  %s5620_s14 = sphi %s5690_s14, %s24_s14   ;;  %s5616_s13 = sphi %s5688_s13, %s7340_s13   ;;  %s5612_s12 = sphi %s5686_s12, %s7339_s12   ;;  %s5608_s11 = sphi %s5684_s11, %s7343_s11   ;;  %s5604_s10 = sphi %s5682_s10, %s7342_s10   ;;  %s5600_s30 = sphi %s5680_s30, %s7341_s30  }
   0xd   : > { %p140_p0 = scmp.ne.s32.totalorder %s5604_s10, %s5600_s30  ;;  %p5712_p1 = scmp.eq.s32.totalorder %s7313_s15, 0 }
   0xe   : > { %p4787_p2 = scmp.ge.s32.totalorder %s5620_s14, 1  ;;  %p289_p3 = scmp.lt.s32.totalorder %s5620_s14, 3 }
   0xf   : > { %p5720_p4 = por %p5712_p1, %p140_p0  ;;  %s7326_s5 = sld [smem:[#allocation20_spill]] }
  0x10   : > { %p5727_p5 = pnand %p4787_p2, %p289_p3  ;;  %s5622_s22 = smov [#allocation10]  }
  0x11   : > { %s317_s23 = sshll.u32 %s5622_s22, 4  ;;  %s33_s25 = sadd.s32 1, %s5616_s13  ;;  %s318_s23 = int_to_ptr.vmem [resolvable:$true] %s317_s23 }
  0x12   : > { %p4950_p6 = pneg %p5727_p5  ;;  %p34_p8 = scmp.ge.s32.totalorder %s33_s25, 2 }
  0x13   : > { %s127_s26 = sadd.s32 1, %s5608_s11  ;;  %p134_p9 = scmp.ne.s32.totalorder %s5608_s11, %s5604_s10 }
  0x14   : > { %p5735_p7 = pnand %p4950_p6, %p5712_p1  ;;  %p135_p10 = scmp.eq.s32.totalorder %s5620_s14, 0 }
  0x15   : > { %s315_s20 = sshll.u32 %s7326_s5, 4  ;;  %s7345_s25 = smov (%p34_p8, %s33_s25), 0  ;;  %s316_s20 = int_to_ptr.hbm [resolvable:$true] %s315_s20 }
  0x16   : > { %4956 = dma.hbm_to_vmem [thread:$0]  (!%p5735_p7), %s316_s20, 128, %s318_s23, [#allocation11]  }
  0x17   : > { %7329 = sst [smem:[#allocation17_spill]] %s7345_s25  ;;  %p5748_p11 = por %p135_p10, %p134_p9 }
  0x18   : > { %s122_s28 = ssub.s32 %s5616_s13, %s7345_s25  ;;  %p4970_p13 = scmp.lt.s32.totalorder %s5620_s14, 2 }
  0x19   : > { %p125_p12 = scmp.eq.s32.totalorder %s122_s28, 0  ;;  %s372_s29 = sand.u32 1, %s5620_s14  }
  0x1a   : > { %s374_s30 = sand.u32 1, %s5608_s11   ;;  %s4922_s20 = sshll.u32 %s5616_s13, 5 }
  0x1b   : > { %s5758_s18 = scalar_select %p125_p12, %s5608_s11, %s127_s26  }
  0x1c   : > { %s4792_s19 = sshll.u32 %s374_s30, 5  ;;  %s7332_s3 = sld [smem:[#allocation19_spill]] }
  0x1d   : > { %7331 = sst [smem:[#allocation18_spill]] %s5758_s18  ;;  %s376_s5 = scalar_lea.vmem [#allocation7], %s4792_s19 }
  0x1e   : > { %s385_s9 = sshll.u32 %s376_s5, 4  ;;  %p5766_p0 = pnand %p4970_p13, %p5748_p11  ;;  %s386_s9 = int_to_ptr.vmem [resolvable:$true] %s385_s9 }
  0x1f   : > { %s405_s26 = scalar_lea.hbm %s7307_s4, %s4922_s20  ;;  %s373_s13 = scalar_lea.sflag [#allocation8], %s372_s29 }
  0x20   : > { %s406_s30 = sshll.u32 %s405_s26, 4  ;;  %s5623_s22 = smov 64   ;;  %s407_s30 = int_to_ptr.hbm [resolvable:$true] %s406_s30 }
  0x21   : > { %s5624_s23 = smov 4   ;;  %s303_s27 = sshll.u32 %s7303_s0, 4  ;;  %s304_s27 = int_to_ptr.hbm [resolvable:$true] %s303_s27 }
  0x22   : > { %s382_s15 = scalar_lea.hbm %s7332_s3, %s4922_s20  ;;  %s5625_s3 = smov [#allocation5]  }
  0x23   : > { %s383_s7 = sshll.u32 %s382_s15, 4  ;;  %s305_s18 = sshll.u32 %s5625_s3, 4  ;;  %s384_s7 = int_to_ptr.hbm [resolvable:$true] %s383_s7  ;;  %s306_s18 = int_to_ptr.vmem [resolvable:$true] %s305_s18 }
  0x24   : > { %4963 = dma.hbm_to_vmem [thread:$0]  (!%p5766_p0), %s384_s7, 512, %s386_s9, %s373_s13, %s5623_s22, %s5623_s22, %s5624_s23  }
  0x25   : > { %s332_s20 = sshll.u32 %s7311_s8, 4  ;;  %s399_s26 = scalar_lea.vmem [#allocation9], %s4792_s19  ;;  %s333_s20 = int_to_ptr.hbm [resolvable:$true] %s332_s20 }
  0x26   : > { %s408_s29 = sshll.u32 %s399_s26, 4  ;;  %s5626_s7 = smov [#allocation12]   ;;  %s409_s29 = int_to_ptr.vmem [resolvable:$true] %s408_s29 }
  0x27   : > { %4953 = dma.hbm_to_vmem [thread:$0]  (!%p5735_p7), %s304_s27, 64, %s306_s18, [#allocation6]  }
  0x28   : > { %s334_s9 = sshll.u32 %s5626_s7, 4  ;;  %420 = sbr.rel (%p5727_p5) target bundleno = 7082 (0x1baa), region = 56  ;;  %s335_s9 = int_to_ptr.vmem [resolvable:$true] %s334_s9 }
  0x29   : > { %4959 = dma.hbm_to_vmem [thread:$0]  (!%p5735_p7), %s333_s20, 256, %s335_s9, [#allocation11], %s5623_s22, %s5623_s22, %s5624_s23  }
  0x2a   : > { %4966 = dma.hbm_to_vmem [thread:$0]  (!%p5766_p0), %s407_s30, 512, %s409_s29, %s373_s13, %s5623_s22, %s5623_s22, %s5624_s23  }
  0x2d   : > { %5587 = dma.done.wait (%p5712_p1), [#allocation6], 64  }
  0x2e   : > { %5589 = vsyncadd (%p5712_p1), [#allocation6], 4294967232  ;;  %s7334_s3 = sadd.s32 4294967295, %s5620_s14   ;;  %s429_s19 = sand.u32 1, %s5604_s10  }
  0x2f   : > { %s427_s18 = sand.u32 1, %s7334_s3   ;;  %s4800_s5 = sshll.u32 %s429_s19, 5 }
  0x30   : > { %s428_s24 = scalar_lea.sflag [#allocation8], %s427_s18  ;;  %s5796_s15 = scalar_lea.vmem [#allocation7], %s4800_s5 }
  0x31   : > { %5591 = dma.done.wait (%p5720_p4), %s428_s24, 1024  }
  0x32   : > { %5593 = vsyncadd (%p5720_p4), %s428_s24, 4294966272  ;;  %s5802_s13 = scalar_lea.vmem [#allocation9], %s4800_s5 }
  0x33   : > { %5595 = dma.done.wait (%p5712_p1), [#allocation11], 384  }
  0x34   : > { %5597 = vsyncadd (%p5712_p1), [#allocation11], 4294966912  ;;  %s5809_s21 = sshll.u32 %s5612_s12, 3  ;;  %s7335_s26 = sld [smem:[#allocation21_spill]]  ;;  %v5877_v12 = vld [vmem:[#allocation12] sm:$0xf] }
  0x35   : > { %p508_p2 = scmp.lt.s32.totalorder %s5809_s21, 15  ;;  %s7336_s29 = sld [smem:[#allocation22_spill]]  ;;  %v5879_v13 = vld [vmem:[#allocation12] sm:$0xf0]  ;;  %v5881_v14 = vld [vmem:[#allocation12 + $0x8] sm:$0xf] }
  0x36   : > { %v5883_v15 = vld [vmem:[#allocation12 + $0x8] sm:$0xf0]  ;;  %p4808_p1 = scmp.ne.s32.totalorder %s5612_s12, 0 }
  0x37   : > { %s509_s25 = scalar_select %p508_p2, %s5809_s21, 15 }
  0x39   : > { %s4805_s30 = sshll.u32 %s509_s25, 2 }
  0x3a   : > { %s5816_s17 = scalar_lea.vmem %s7304_s1, %s4805_s30  ;;  %s5821_s28 = scalar_lea.vmem %s7305_s2, %s4805_s30  ;;  %v5826_v0 = vld [vmem:[%s7335_s26] sm:$0xf]  ;;  %v5836_v2 = vld [vmem:[%s7335_s26] sm:$0xf0]  ;;  %v5844_v4 = vld [vmem:[%s7335_s26 + $0x8] sm:$0xf] }
  0x3b   : > { %v5831_v1 = vld [vmem:[%s7335_s26] sm:$0xf]  ;;  %v4925_v3 = vld [vmem:[%s7335_s26] sm:$0xf0]  ;;  %v4815_v5 = vld [vmem:[%s7335_s26 + $0x8] sm:$0xf] }
  0x3c   : > { %v5852_v6 = vld [vmem:[%s7335_s26 + $0x8] sm:$0xf0]  ;;  %v5860_v8 = vld [vmem:[%s7336_s29] sm:$0xf]  ;;  %v5865_v9 = vld [vmem:[%s7336_s29] sm:$0xf0] }
  0x3d   : > { %v4927_v7 = vld [vmem:[%s7335_s26 + $0x8] sm:$0xf0]  ;;  %v5870_v10 = vld [vmem:[%s7336_s29 + $0x8] sm:$0xf]  ;;  %547 = sbr.rel (%p4808_p1) target bundleno = 365 (0x16d), region = 80 }
  0x3e   : > { %v5875_v11 = vld [vmem:[%s7336_s29 + $0x8] sm:$0xf0] }
  0x42   : > { %v563_v16 = vlaneseq  ;;  %v558_v17 = vld [vmem:[#allocation5] sm:$0xf]  ;;  %vm560_vm0 = vcmask 64512   ;;  %v548_v32 = vld [vmem:[#allocation10] sm:$0xff]  ;;  %vm549_vm1 = vcmask 261120   ;;  %v4816_v33 = vor.u32 %v4927_v7, %v4815_v5 }
  0x43   : > { %v559_v18 = vunpack.c.l.bf16 %v558_v17  ;;  %550 = vst.msk [vmem:[#allocation2] sm:$0xff] %vm549_vm1, %v548_v32  ;;  %v4812_v36 = vor.u32 %v4925_v3, %v5831_v1  ;;  %vm706_vm2 = vcmask 1041409   ;;  %vm708_vm3 = vcmask 1042434  }
  0x44   : > { %v564_v19 = vshrl.u32 %v563_v16, 7  ;;  %551 = vst.msk [vmem:[#allocation2 + $0x8] sm:$0xff] %vm549_vm1, %v548_v32  ;;  %742 = vmatpush.bf16.msra.mxu0 %v4816_v33  ;;  %vm710_vm4 = vcmask 1043459   ;;  %vm712_vm5 = vcmask 1044484   ;;  %vm714_vm6 = vcmask 1045509  }
  0x45   : > { %561 = vst.msk [vmem:[#allocation4] sm:$0xff] %vm560_vm0, %v559_v18  ;;  %v590_v20 = vperm.slane %v559_v18, 4  ;;  %v597_v21 = vperm.slane %v559_v18, 5  ;;  %v562_v22 = vperm.slane %v559_v18, 0  ;;  %v569_v23 = vperm.slane %v559_v18, 1 }
  0x46   : > { %5042 = vset.pattern.permute.xlu1 %v564_v19  ;;  %5031 = vset.pattern.permute.xlu0 %v564_v19  ;;  %v604_v26 = vperm.slane %v559_v18, 6  ;;  %v611_v27 = vperm.slane %v559_v18, 7  ;;  %v576_v28 = vperm.slane %v559_v18, 2  ;;  %v583_v29 = vperm.slane %v559_v18, 3  ;;  %552 = vst.msk [vmem:[#allocation2 + $0x10] sm:$0xff] %vm549_vm1, %v548_v32 }
  0x47   : > { %v5043_v24 = vpack.i.bf16 %v597_v21, %v590_v20  ;;  %v5032_v25 = vpack.i.bf16 %v569_v23, %v562_v22  ;;  %553 = vst.msk [vmem:[#allocation2 + $0x18] sm:$0xff] %vm549_vm1, %v548_v32  ;;  %vm716_vm7 = vcmask 1046534   ;;  %vm718_vm8 = vcmask 1047559  }
  0x48   : > { %v5048_v30 = vpack.i.bf16 %v611_v27, %v604_v26  ;;  %v5037_v31 = vpack.i.bf16 %v583_v29, %v576_v28  ;;  %554 = vst.msk [vmem:[#allocation2 + $0x20] sm:$0xff] %vm549_vm1, %v548_v32  ;;  %743 = vmatpush.bf16.msra.mxu0 %v4812_v36  ;;  %vm749_vm9 = vcmask 523264  }
  0x49   : > { %555 = vst.msk [vmem:[#allocation2 + $0x28] sm:$0xff] %vm549_vm1, %v548_v32 }
  0x4a   : > { %556 = vst.msk [vmem:[#allocation2 + $0x30] sm:$0xff] %vm549_vm1, %v548_v32 }
  0x4b   : > { %557 = vst.msk [vmem:[#allocation2 + $0x38] sm:$0xff] %vm549_vm1, %v548_v32 }
  0x4e   : > { %5044 = vperm.xlu1 %5042, %v5043_v24   ;;  %5033 = vperm.xlu0 %5031, %v5032_v25  }
  0x56   : > { %5049 = vperm.xlu1 %5042, %v5048_v30   ;;  %5038 = vperm.xlu0 %5031, %v5037_v31  }
  0xc0   : > { %v5045_v34 = vpop.permute.xlu1 %5044  ;;  %v5034_v35 = vpop.permute.xlu0 %5033 }
  0xc1   : > { %v5047_v37 = vunpack.i.h.bf16 %v5045_v34  ;;  %v5046_v38 = vunpack.i.l.bf16 %v5045_v34  ;;  %v5036_v39 = vunpack.i.h.bf16 %v5034_v35  ;;  %v5035_v40 = vunpack.i.l.bf16 %v5034_v35 }
  0xc3   : > { %v622_v41 = vmul.f32 %v5046_v38, %v548_v32  ;;  %v623_v42 = vmul.f32 %v5047_v37, %v548_v32  ;;  %v618_v43 = vmul.f32 %v5035_v40, %v548_v32  ;;  %v619_v44 = vmul.f32 %v5036_v39, %v548_v32 }
  0xc5   : > { %v654_v45 = vsel %vm549_vm1, %v622_v41, 0.0  ;;  %v661_v46 = vsel %vm549_vm1, %v623_v42, 0.0  ;;  %v626_v47 = vsel %vm549_vm1, %v618_v43, 0.0  ;;  %v633_v48 = vsel %vm549_vm1, %v619_v44, 0.0 }
  0xc6   : > { %v655_v49 = vrot.slane %v654_v45, 4  ;;  %v662_v50 = vrot.slane %v661_v46, 4  ;;  %v627_v51 = vrot.slane %v626_v47, 4  ;;  %v634_v52 = vrot.slane %v633_v48, 4 }
  0xc8   : > { %v656_v53 = vadd.f32 %v655_v49, %v654_v45  ;;  %v663_v54 = vadd.f32 %v662_v50, %v661_v46  ;;  %v628_v55 = vadd.f32 %v627_v51, %v626_v47  ;;  %v635_v56 = vadd.f32 %v634_v52, %v633_v48  ;;  %v5050_v57 = vpop.permute.xlu1 %5049  ;;  %v5039_v58 = vpop.permute.xlu0 %5038 }
  0xc9   : > { %v5052_v59 = vunpack.i.h.bf16 %v5050_v57  ;;  %v5051_v60 = vunpack.i.l.bf16 %v5050_v57  ;;  %v5041_v61 = vunpack.i.h.bf16 %v5039_v58  ;;  %v5040_v62 = vunpack.i.l.bf16 %v5039_v58 }
  0xca   : > { %v657_v63 = vrot.slane %v656_v53, 2  ;;  %v629_v1 = vrot.slane %v628_v55, 2  ;;  %v636_v3 = vrot.slane %v635_v56, 2  ;;  %v664_v18 = vrot.slane %v663_v54, 2 }
  0xcb   : > { %v624_v5 = vmul.f32 %v5051_v60, %v548_v32  ;;  %v625_v7 = vmul.f32 %v5052_v59, %v548_v32  ;;  %v620_v16 = vmul.f32 %v5040_v62, %v548_v32  ;;  %v621_v17 = vmul.f32 %v5041_v61, %v548_v32 }
  0xcc   : > { %v630_v19 = vadd.f32 %v629_v1, %v628_v55  ;;  %v637_v20 = vadd.f32 %v636_v3, %v635_v56  ;;  %v658_v25 = vadd.f32 %v657_v63, %v656_v53  ;;  %v665_v33 = vadd.f32 %v664_v18, %v663_v54 }
  0xcd   : > { %v668_v21 = vsel %vm549_vm1, %v624_v5, 0.0  ;;  %v675_v22 = vsel %vm549_vm1, %v625_v7, 0.0  ;;  %v640_v23 = vsel %vm549_vm1, %v620_v16, 0.0  ;;  %v647_v24 = vsel %vm549_vm1, %v621_v17, 0.0 }
  0xce   : > { %v631_v26 = vrot.slane %v630_v19, 1  ;;  %v638_v27 = vrot.slane %v637_v20, 1  ;;  %v669_v28 = vrot.slane %v668_v21, 4  ;;  %v676_v29 = vrot.slane %v675_v22, 4 }
  0xcf   : > { %v641_v30 = vrot.slane %v640_v23, 4  ;;  %v648_v31 = vrot.slane %v647_v24, 4  ;;  %v659_v37 = vrot.slane %v658_v25, 1  ;;  %v666_v44 = vrot.slane %v665_v33, 1 }
  0xd0   : > { %v670_v32 = vadd.f32 %v669_v28, %v668_v21  ;;  %v677_v34 = vadd.f32 %v676_v29, %v675_v22  ;;  %v632_v38 = vadd.f32 %v631_v26, %v630_v19  ;;  %v639_v39 = vadd.f32 %v638_v27, %v637_v20 }
  0xd1   : > { %v642_v35 = vadd.f32 %v641_v30, %v640_v23  ;;  %v649_v36 = vadd.f32 %v648_v31, %v647_v24  ;;  %v660_v49 = vadd.f32 %v659_v37, %v658_v25  ;;  %v667_v56 = vadd.f32 %v666_v44, %v665_v33 }
  0xd2   : > { %v671_v40 = vrot.slane %v670_v32, 2  ;;  %v678_v41 = vrot.slane %v677_v34, 2  ;;  %v682_v50 = vpack.c.bf16 %v632_v38, %v632_v38  ;;  %v683_v51 = vpack.c.bf16 %v639_v39, %v639_v39 }
  0xd3   : > { %v643_v42 = vrot.slane %v642_v35, 2  ;;  %v650_v43 = vrot.slane %v649_v36, 2  ;;  %v686_v63 = vpack.c.bf16 %v660_v49, %v660_v49  ;;  %v687_v5 = vpack.c.bf16 %v667_v56, %v667_v56 }
  0xd4   : > { %v672_v45 = vadd.f32 %v671_v40, %v670_v32  ;;  %v679_v46 = vadd.f32 %v678_v41, %v677_v34  ;;  %v698_v60 = vunpack.c.l.b16 %v682_v50  ;;  %v699_v61 = vunpack.c.l.b16 %v683_v51 }
  0xd5   : > { %v644_v47 = vadd.f32 %v643_v42, %v642_v35  ;;  %v651_v48 = vadd.f32 %v650_v43, %v649_v36  ;;  %v702_v20 = vunpack.c.l.b16 %v686_v63  ;;  %v703_v22 = vunpack.c.l.b16 %v687_v5 }
  0xd6   : > { %v673_v52 = vrot.slane %v672_v45, 1  ;;  %v680_v53 = vrot.slane %v679_v46, 1  ;;  %v707_v18 = vsel %vm706_vm2, %v699_v61, %v698_v60 }
  0xd7   : > { %v645_v54 = vrot.slane %v644_v47, 1  ;;  %v652_v55 = vrot.slane %v651_v48, 1 }
  0xd8   : > { %v674_v57 = vadd.f32 %v673_v52, %v672_v45  ;;  %v681_v62 = vadd.f32 %v680_v53, %v679_v46 }
  0xd9   : > { %v646_v58 = vadd.f32 %v645_v54, %v644_v47  ;;  %v653_v59 = vadd.f32 %v652_v55, %v651_v48 }
  0xda   : > { %v688_v7 = vpack.c.bf16 %v674_v57, %v674_v57  ;;  %v689_v19 = vpack.c.bf16 %v681_v62, %v681_v62 }
  0xdb   : > { %v684_v1 = vpack.c.bf16 %v646_v58, %v646_v58  ;;  %v685_v3 = vpack.c.bf16 %v653_v59, %v653_v59 }
  0xdc   : > { %v704_v24 = vunpack.c.l.b16 %v688_v7  ;;  %v705_v26 = vunpack.c.l.b16 %v689_v19 }
  0xdd   : > { %v700_v16 = vunpack.c.l.b16 %v684_v1  ;;  %v701_v17 = vunpack.c.l.b16 %v685_v3 }
  0xdf   : > { %v709_v21 = vsel %vm708_vm3, %v700_v16, %v707_v18 }
  0xe0   : > { %v711_v23 = vsel %vm710_vm4, %v701_v17, %v709_v21 }
  0xe1   : > { %v713_v25 = vsel %vm712_vm5, %v702_v20, %v711_v23 }
  0xe2   : > { %v715_v27 = vsel %vm714_vm6, %v703_v22, %v713_v25 }
  0xe3   : > { %v717_v28 = vsel %vm716_vm7, %v704_v24, %v715_v27 }
  0xe4   : > { %v719_v29 = vsel %vm718_vm8, %v705_v26, %v717_v28 }
  0xe5   : > { %v720_v30 = vpack.c.b16 %v719_v29, %v719_v29 }
  0xe7   : > { %4817 = vmatmul.msk.bf16.vlgmr.msra.gmra.mxu0 %vm549_vm1, %v720_v30 }
 0x164   : > { %v745_v31 = vpop.f32.mrf.mxu0 }
 0x165   : > { %750 = vst.msk [vmem:[#allocation3] sm:$0xff] %vm749_vm9, %v745_v31 }
 0x16c   : > { %v747_v33 = vpop.f32.mrf.mxu0 }
 0x16d PF: > { %v777_v32 = vlaneseq  ;;  %v759_v34 = vld [vmem:[#allocation3] sm:$0xff]  ;;  %v760_v39 = vld [vmem:[#allocation4] sm:$0xff]  ;;  %s5627_s12 = smov 32   ;;  %v5908_v52 = vor.u32 %v5875_v11, %v5870_v10  ;;  %v5912_v53 = vor.u32 %v5883_v15, %v5881_v14  ;;  %v5920_v56 = vor.u32 %v5865_v9, %v5860_v8  ;;  %s5628_s24 = smov 96   ;;  %v5957_v60 = vld [vmem:[#allocation2 + $0x10] sm:$0xff] }
 0x16e   : > { %v761_v35 = vld [vmem:[%s5821_s28] sm:$0xf]  ;;  %v776_v40 = vperm.slane %v760_v39, 0  ;;  %v790_v41 = vperm.slane %v760_v39, 2  ;;  %v783_v44 = vperm.slane %v760_v39, 1  ;;  %v797_v45 = vperm.slane %v760_v39, 3 }
 0x16f   : > { %v762_v36 = vunpack.c.l.bf16 %v761_v35  ;;  %v778_v37 = vshrl.u32 %v777_v32, 7  ;;  %v811_v46 = vperm.slane %v760_v39, 5  ;;  %v804_v47 = vperm.slane %v760_v39, 4  ;;  %v5914_v54 = vld [vmem:[#allocation2] sm:$0xff]  ;;  %933 = vmatpush.bf16.msra.mxu0 %v5908_v52  ;;  %4932 = vmatpush.bf16.msra.mxu1 %v5908_v52  ;;  %v5922_v57 = vld [vmem:[#allocation2 + $0x8] sm:$0xff]  ;;  %v5959_v61 = vld [vmem:[#allocation2 + $0x18] sm:$0xff] }
 0x170   : > { %v818_v48 = vperm.slane %v760_v39, 6  ;;  %v825_v49 = vperm.slane %v760_v39, 7  ;;  %v5924_v58 = vld [vmem:[#allocation2 + $0x20] sm:$0xff]  ;;  %v5926_v10 = vld [vmem:[#allocation2 + $0x28] sm:$0xff]  ;;  %892 = vmatpush.bf16.msra.mxu3 %v5912_v53  ;;  %v5931_v11 = vor.u32 %v5879_v13, %v5877_v12  ;;  %v899_v14 = vpack.c.bf16 %v5922_v57, %v5914_v54  ;;  %v5961_v62 = vld [vmem:[#allocation2 + $0x30] sm:$0xff] }
 0x171   : > { %v763_v38 = vadd.f32 %v762_v36, %v759_v34  ;;  %5053 = vset.pattern.permute.xlu1 %v778_v37  ;;  %5054 = vset.pattern.permute.xlu2 %v778_v37  ;;  %v901_v15 = vpack.c.bf16 %v5926_v10, %v5924_v58  ;;  %vm882_vm10 = vcmask 261120   ;;  %v900_v63 = vpack.c.bf16 %v5959_v61, %v5957_v60  ;;  %v5965_v1 = vld [vmem:[#allocation2 + $0x38] sm:$0xff]  ;;  %v5971_v5 = vld [vmem:[%s5816_s17] sm:$0xff]   ;;  %v865_v27 = vld [vmem:[%s5796_s15] sm:$0xf] }
 0x172   : > { %5055 = vset.pattern.permute.xlu0 %v778_v37  ;;  %v902_v3 = vpack.c.bf16 %v5965_v1, %v5961_v62  ;;  %v5975_v7 = vunpack.c.l.bf16 %v5971_v5  ;;  %v866_v29 = vunpack.c.l.bf16 %v865_v27  ;;  %vm1134_vm11 = vcmask 523520  }
 0x173   : > { %5236 = vtanh.f32 %v763_v38  ;;  %v765_v50 = vmul.f32 0.5, %v763_v38  ;;  %934 = vmatpush.bf16.msra.mxu0 %v5920_v56  ;;  %4933 = vmatpush.bf16.msra.mxu1 %v5920_v56  ;;  %vm1215_vm12 = vcmask 1041409   ;;  %vm1217_vm13 = vcmask 1042434  }
 0x174   : > { %893 = vmatpush.bf16.msra.mxu3 %v5931_v11  ;;  %v1084_v16 = vperm.slane %v5975_v7, 2  ;;  %v1091_v17 = vperm.slane %v5975_v7, 3  ;;  %v1070_v21 = vperm.slane %v5975_v7, 0  ;;  %v1077_v22 = vperm.slane %v5975_v7, 1 }
 0x175   : > { %5238 = vtanh.f32 %v765_v50  ;;  %vm1219_vm14 = vcmask 1043459   ;;  %vm1221_vm15 = vcmask 1044484   ;;  %vm1223_vm0 = vcmask 1045509  }
 0x176   : > { %4835 = vmatmul.msk.bf16.vlgmr.msra.gmra.mxu0 %vm882_vm10, %v899_v14  ;;  %4837 = vmatmul.msk.bf16.vlgmr.msra.gmra.mxu1 %vm882_vm10, %v901_v15  ;;  %v5061_v18 = vpack.i.bf16 %v1091_v17, %v1084_v16  ;;  %v5056_v23 = vpack.i.bf16 %v1077_v22, %v1070_v21  ;;  %vm1225_vm1 = vcmask 1046534   ;;  %vm1227_vm2 = vcmask 1047559  }
 0x177   : > { %1384 = vmatpush.bf16.msrb.mxu0 %v5908_v52  ;;  %2314 = vmatpush.bf16.msrb.mxu1 %v5908_v52  ;;  %vm4574_vm3 = vcmask 523264   ;;  %vm4578_vm4 = vcmask 7168   ;;  %vm4580_vm5 = vcmask 15360   ;;  %vm4582_vm6 = vcmask 23552  }
 0x178   : > { %1343 = vmatpush.bf16.msrb.mxu3 %v5912_v53  ;;  %vm4584_vm7 = vcmask 31744   ;;  %vm4586_vm8 = vcmask 39936   ;;  %vm4588_vm9 = vcmask 48128  }
 0x179   : > { %v5237_v42 = vpop.eup %5236  ;;  %781 = vperm.xlu1 %5053, %v776_v40   ;;  %795 = vperm.xlu2 %5054, %v790_v41  }
 0x17a   : > { %v769_v43 = vadd.f32 1.0, %v5237_v42 }
 0x17b   : > { %v5239_v51 = vpop.eup %5238  ;;  %1385 = vmatpush.bf16.msrb.mxu0 %v5920_v56  ;;  %2315 = vmatpush.bf16.msrb.mxu1 %v5920_v56 }
 0x17c   : > { %771 = vrot.lane.b32.xlu0 %v769_v43, %s5627_s12  ;;  %v767_v55 = vmul.f32 0.5, %v5239_v51  ;;  %1344 = vmatpush.bf16.msrb.mxu3 %v5931_v11 }
 0x17e   : > { %v768_v8 = vadd.f32 0.5, %v767_v55 }
 0x17f   : > { %2738 = vmatpush.bf16.msra.mxu0 %v5912_v53  ;;  %3668 = vmatpush.bf16.msra.mxu1 %v5912_v53 }
 0x181   : > { %788 = vperm.xlu1 %5053, %v783_v44   ;;  %802 = vperm.xlu2 %5054, %v797_v45  }
 0x183   : > { %2739 = vmatpush.bf16.msra.mxu0 %v5931_v11  ;;  %3669 = vmatpush.bf16.msra.mxu1 %v5931_v11 }
 0x186   : > { %4836 = vmatmul.msk.bf16.gmra.mxu0 %vm882_vm10, %v900_v63  ;;  %4838 = vmatmul.msk.bf16.gmra.mxu1 %vm882_vm10, %v902_v3 }
 0x189   : > { %816 = vperm.xlu1 %5053, %v811_v46   ;;  %809 = vperm.xlu2 %5054, %v804_v47  }
 0x191   : > { %823 = vperm.xlu1 %5053, %v818_v48   ;;  %830 = vperm.xlu2 %5054, %v825_v49  }
 0x199   : > { %5062 = vperm.xlu1 %5053, %v5061_v18  }
 0x1ee   : > { %v772_v9 = vpop.permute.xlu0 %771 }
 0x1ef   : > { %v774_v12 = vmul.f32 %v772_v9, %v768_v8 }
 0x1f1   : > { %v5946_v13 = vmul.f32 0.5, %v774_v12 }
 0x1f3   : > { %v864_v59 = vpack.c.bf16 %v5946_v13, %v5946_v13  ;;  %v936_v20 = vpop.f32.mrf.mxu0  ;;  %v946_v25 = vpop.f32.mrf.mxu1 }
 0x1f5   : > { %868 = vrot.lane.b32.xlu0 %v864_v59, %s5628_s24 }
 0x1fb   : > { %v938_v24 = vpop.f32.mrf.mxu0  ;;  %v948_v28 = vpop.f32.mrf.mxu1 }
 0x1fd   : > { %5057 = vperm.xlu0 %5055, %v5056_v23  }
 0x203   : > { %v941_v26 = vpop.f32.mrf.mxu0  ;;  %v951_v43 = vpop.f32.mrf.mxu1 }
 0x20b   : > { %v943_v35 = vpop.f32.mrf.mxu0 }
 0x267   : > { %v869_v19 = vpop.permute.xlu0 %868 }
 0x268   : > { %4826 = vmatmul.msk.bf16.vlgmr.msra.gmra.mxu3 %vm882_vm10, %v869_v19 }
 0x269   : > { %1808 = vmatpush.bf16.msra.mxu3 %v5912_v53 }
 0x26d   : > { %1809 = vmatpush.bf16.msra.mxu3 %v5931_v11 }
 0x2eb   : > { %v895_v30 = vpop.f32.mrf.mxu3 }
 0x2ec   : > { %v896_v31 = vadd.f32 %v895_v30, %v866_v29 }
 0x2ee   : > { %v959_v33 = vrot.slane %v896_v31, 3  ;;  %v964_v32 = vperm.slane %v896_v31, 0  ;;  %v957_v34 = vrot.slane %v896_v31, 1  ;;  %v958_v36 = vrot.slane %v896_v31, 2 }
 0x2ef   : > { %v962_v37 = vrot.slane %v896_v31, 6  ;;  %v960_v38 = vrot.slane %v896_v31, 4  ;;  %v961_v39 = vrot.slane %v896_v31, 5  ;;  %v963_v59 = vrot.slane %v896_v31, 7 }
 0x2f0   : > { %v967_v40 = vperm.slane %v959_v33, 0  ;;  %v980_v41 = vadd.f32 %v964_v32, %v936_v20  ;;  %v965_v42 = vperm.slane %v957_v34, 0  ;;  %v966_v44 = vperm.slane %v958_v36, 0  ;;  %v953_v20 = vpop.f32.mrf.mxu1 }
 0x2f1   : > { %v970_v45 = vperm.slane %v962_v37, 0  ;;  %v968_v46 = vperm.slane %v960_v38, 0  ;;  %v969_v50 = vperm.slane %v961_v39, 0  ;;  %v971_v18 = vperm.slane %v963_v59, 0 }
 0x2f2   : > { %v983_v47 = vadd.f32 %v967_v40, %v943_v35  ;;  %v988_v48 = vmul.f32 0.5, %v980_v41  ;;  %v981_v49 = vadd.f32 %v965_v42, %v938_v24  ;;  %v982_v55 = vadd.f32 %v966_v44, %v941_v26 }
 0x2f3   : > { %v897_v51 = vpop.f32.mrf.mxu3  ;;  %v986_v14 = vadd.f32 %v970_v45, %v951_v43  ;;  %v984_v15 = vadd.f32 %v968_v46, %v946_v25  ;;  %v985_v3 = vadd.f32 %v969_v50, %v948_v28  ;;  %v987_v26 = vadd.f32 %v971_v18, %v953_v20 }
 0x2f4   : > { %v991_v8 = vmul.f32 0.5, %v983_v47  ;;  %5240 = vtanh.f32 %v988_v48  ;;  %v989_v9 = vmul.f32 0.5, %v981_v49  ;;  %v990_v12 = vmul.f32 0.5, %v982_v55 }
 0x2f5   : > { %v994_v63 = vmul.f32 0.5, %v986_v14  ;;  %v992_v16 = vmul.f32 0.5, %v984_v15  ;;  %v993_v19 = vmul.f32 0.5, %v985_v3  ;;  %v995_v36 = vmul.f32 0.5, %v987_v26  ;;  %v796_v15 = vpop.permute.xlu2 %795 }
 0x2f6   : > { %5242 = vtanh.f32 %v991_v8  ;;  %v1098_v46 = vperm.slane %v5975_v7, 4  ;;  %v1105_v47 = vperm.slane %v5975_v7, 5  ;;  %v1119_v49 = vperm.slane %v5975_v7, 7 }
 0x2f7   : > { %5244 = vtanh.f32 %v989_v9  ;;  %v782_v9 = vpop.permute.xlu1 %781  ;;  %v835_v3 = vrot.slane %v5946_v13, 3  ;;  %v836_v20 = vrot.slane %v5946_v13, 4 }
 0x2f8   : > { %5246 = vtanh.f32 %v990_v12 }
 0x2f9   : > { %5248 = vtanh.f32 %v994_v63  ;;  %v843_v18 = vperm.slane %v835_v3, 0  ;;  %v844_v26 = vperm.slane %v836_v20, 0 }
 0x2fa   : > { %v5241_v17 = vpop.eup %5240  ;;  %5250 = vtanh.f32 %v992_v16 }
 0x2fb   : > { %v1004_v21 = vmul.f32 0.5, %v5241_v17  ;;  %5252 = vtanh.f32 %v993_v19  ;;  %v6012_v19 = vpop.permute.xlu0 %5057 }
 0x2fc   : > { %v5243_v22 = vpop.eup %5242  ;;  %5254 = vtanh.f32 %v995_v36 }
 0x2fd   : > { %v1007_v23 = vmul.f32 0.5, %v5243_v22  ;;  %v1012_v24 = vadd.f32 0.5, %v1004_v21  ;;  %v5245_v25 = vpop.eup %5244  ;;  %v803_v8 = vpop.permute.xlu2 %802 }
 0x2fe   : > { %v5247_v27 = vpop.eup %5246  ;;  %v1005_v30 = vmul.f32 0.5, %v5245_v25 }
 0x2ff   : > { %v1015_v29 = vadd.f32 0.5, %v1007_v23  ;;  %v1020_v28 = vmul.f32 %v1012_v24, %v5914_v54  ;;  %v5249_v31 = vpop.eup %5248  ;;  %v1006_v33 = vmul.f32 0.5, %v5247_v27  ;;  %v789_v59 = vpop.permute.xlu1 %788  ;;  %v833_v23 = vrot.slane %v5946_v13, 1 }
 0x300   : > { %v5251_v32 = vpop.eup %5250  ;;  %v1013_v34 = vadd.f32 0.5, %v1005_v30  ;;  %v1010_v40 = vmul.f32 0.5, %v5249_v31  ;;  %v840_v24 = vperm.slane %v5946_v13, 0  ;;  %v834_v31 = vrot.slane %v5946_v13, 2 }
 0x301   : > { %1036 = vrot.lane.b32.xlu0 %v1020_v28, %s5627_s12  ;;  %v1023_v35 = vmul.f32 %v1015_v29, %v5959_v61  ;;  %v1008_v37 = vmul.f32 0.5, %v5251_v32  ;;  %v1014_v39 = vadd.f32 0.5, %v1006_v33  ;;  %v5253_v41 = vpop.eup %5252  ;;  %v841_v28 = vperm.slane %v833_v23, 0 }
 0x302   : > { %v1021_v38 = vmul.f32 %v1013_v34, %v5922_v57  ;;  %v1018_v43 = vadd.f32 0.5, %v1010_v40  ;;  %v1009_v44 = vmul.f32 0.5, %v5253_v41  ;;  %v5255_v48 = vpop.eup %5254  ;;  %v856_v30 = vmul.f32 %v840_v24, %v782_v9 }
 0x303   : > { %1042 = vrot.lane.b32.xlu2 %v1023_v35, %s5627_s12  ;;  %v1016_v54 = vadd.f32 0.5, %v1008_v37  ;;  %v1022_v42 = vmul.f32 %v1014_v39, %v5957_v60  ;;  %v1112_v60 = vperm.slane %v5975_v7, 6  ;;  %v1011_v50 = vmul.f32 0.5, %v5255_v48 }
 0x304   : > { %1038 = vrot.lane.b32.xlu1 %v1021_v38, %s5627_s12  ;;  %v1026_v45 = vmul.f32 %v1018_v43, %v5961_v62  ;;  %v1017_v57 = vadd.f32 0.5, %v1009_v44  ;;  %v5059_v35 = vunpack.i.l.bf16 %v6012_v19  ;;  %v857_v39 = vmul.f32 %v841_v28, %v789_v59 }
 0x305   : > { %v1024_v61 = vmul.f32 %v1016_v54, %v5924_v58  ;;  %v5066_v58 = vpack.i.bf16 %v1105_v47, %v1098_v46  ;;  %v5071_v62 = vpack.i.bf16 %v1119_v49, %v1112_v60  ;;  %v1019_v55 = vadd.f32 0.5, %v1011_v50  ;;  %v810_v12 = vpop.permute.xlu2 %809 }
 0x306   : > { %v1025_v51 = vmul.f32 %v1017_v57, %v5926_v10  ;;  %v860_v33 = vmul.f32 %v844_v26, %v810_v12  ;;  %v842_v41 = vperm.slane %v834_v31, 0  ;;  %v5060_v44 = vunpack.i.h.bf16 %v6012_v19 }
 0x307   : > { %v1027_v14 = vmul.f32 %v1019_v55, %v5965_v1  ;;  %v6007_v63 = vpop.permute.xlu1 %816  ;;  %v859_v1 = vmul.f32 %v843_v18, %v803_v8  ;;  %v837_v60 = vrot.slane %v5946_v13, 5  ;;  %v839_v24 = vrot.slane %v5946_v13, 7 }
 0x308   : > { %v858_v48 = vmul.f32 %v842_v41, %v796_v15 }
 0x309   : > { %1040 = vrot.lane.b32.xlu0 %v1022_v42, %s5627_s12  ;;  %v845_v3 = vperm.slane %v837_v60, 0 }
 0x30b   : > { %1044 = vrot.lane.b32.xlu2 %v1024_v61, %s5627_s12  ;;  %v861_v26 = vmul.f32 %v845_v3, %v6007_v63 }
 0x30c   : > { %1048 = vrot.lane.b32.xlu1 %v1026_v45, %s5627_s12 }
 0x30d   : > { %v6005_v7 = vpop.permute.xlu2 %830 }
 0x30f   : > { %v6010_v16 = vpop.permute.xlu1 %823 }
 0x311   : > { %1046 = vrot.lane.b32.xlu0 %v1025_v51, %s5627_s12 }
 0x313   : > { %5067 = vperm.xlu2 %5054, %v5066_v58  }
 0x314   : > { %5072 = vperm.xlu1 %5053, %v5071_v62  }
 0x317   : > { %v6015_v21 = vpop.permute.xlu1 %5062 }
 0x318   : > { %v5065_v25 = vunpack.i.h.bf16 %v6015_v21  ;;  %v5064_v58 = vunpack.i.l.bf16 %v6015_v21 }
 0x319   : > { %1050 = vrot.lane.b32.xlu0 %v1027_v14, %s5627_s12 }
 0x35d   : > { %v1043_v10 = vpop.permute.xlu2 %1042 }
 0x35e   : > { %v6017_v22 = vadd.f32 %v1043_v10, %v859_v1 }
 0x360   : > { %v1129_v29 = vmul.f32 %v5065_v25, %v6017_v22 }
 0x362   : > { %v1156_v37 = vsel %vm1134_vm11, %v1129_v29, 0.0 }
 0x363   : > { %v1157_v43 = vrot.slane %v1156_v37, 4 }
 0x365   : > { %v1045_v17 = vpop.permute.xlu2 %1044  ;;  %v1158_v62 = vadd.f32 %v1157_v43, %v1156_v37 }
 0x366   : > { %v6033_v38 = vadd.f32 %v1045_v17, %v860_v33  ;;  %v838_v17 = vrot.slane %v5946_v13, 6 }
 0x367   : > { %v1159_v18 = vrot.slane %v1158_v62, 2 }
 0x369   : > { %v1160_v37 = vadd.f32 %v1159_v18, %v1158_v62 }
 0x36d   : > { %v6022_v27 = vpop.permute.xlu2 %5067 }
 0x36e   : > { %v5069_v32 = vunpack.i.l.bf16 %v6022_v27 }
 0x370   : > { %v1130_v54 = vmul.f32 %v5069_v32, %v6033_v38 }
 0x372   : > { %v1163_v49 = vsel %vm1134_vm11, %v1130_v54, 0.0 }
 0x373   : > { %v1037_v34 = vpop.permute.xlu0 %1036  ;;  %v1164_v9 = vrot.slane %v1163_v49, 4 }
 0x374   : > { %v6030_v36 = vadd.f32 %v1037_v34, %v856_v30  ;;  %v846_v34 = vperm.slane %v838_v17, 0 }
 0x375   : > { %v1165_v29 = vadd.f32 %v1164_v9, %v1163_v49 }
 0x376   : > { %v1126_v40 = vmul.f32 %v5059_v35, %v6030_v36  ;;  %v1039_v42 = vpop.permute.xlu1 %1038  ;;  %v862_v43 = vmul.f32 %v846_v34, %v6010_v16 }
 0x377   : > { %v6043_v45 = vadd.f32 %v1039_v42, %v857_v39  ;;  %v5070_v39 = vunpack.i.h.bf16 %v6022_v27  ;;  %v847_v42 = vperm.slane %v839_v24, 0 }
 0x378   : > { %v1135_v61 = vsel %vm1134_vm11, %v1126_v40, 0.0 }
 0x379   : > { %v1136_v57 = vrot.slane %v1135_v61, 4  ;;  %v1127_v46 = vmul.f32 %v5060_v44, %v6043_v45  ;;  %v1350_v47 = vpack.c.bf16 %v6043_v45, %v6030_v36  ;;  %v863_v16 = vmul.f32 %v847_v42, %v6005_v7 }
 0x37b   : > { %v1137_v50 = vadd.f32 %v1136_v57, %v1135_v61  ;;  %v1041_v51 = vpop.permute.xlu0 %1040  ;;  %v1142_v55 = vsel %vm1134_vm11, %v1127_v46, 0.0  ;;  %1358 = vrot.lane.b32.xlu1 %v1350_v47, %s5628_s24  ;;  %v1166_v61 = vrot.slane %v1165_v29, 2  ;;  %v1161_v47 = vrot.slane %v1160_v37, 1 }
 0x37c   : > { %v6055_v14 = vadd.f32 %v1041_v51, %v858_v48  ;;  %v1143_v8 = vrot.slane %v1142_v55, 4 }
 0x37d   : > { %v1138_v12 = vrot.slane %v1137_v50, 2 }
 0x37e   : > { %v1128_v15 = vmul.f32 %v5064_v58, %v6055_v14  ;;  %v1144_v59 = vadd.f32 %v1143_v8, %v1142_v55  ;;  %v1049_v10 = vpop.permute.xlu1 %1048  ;;  %v1167_v55 = vadd.f32 %v1166_v61, %v1165_v29 }
 0x37f   : > { %v1139_v28 = vadd.f32 %v1138_v12, %v1137_v50  ;;  %v6073_v48 = vadd.f32 %v1049_v10, %v862_v43  ;;  %v1162_v10 = vadd.f32 %v1161_v47, %v1160_v37 }
 0x380   : > { %v1149_v1 = vsel %vm1134_vm11, %v1128_v15, 0.0  ;;  %v1145_v20 = vrot.slane %v1144_v59, 2  ;;  %v1168_v7 = vrot.slane %v1167_v55, 1 }
 0x381   : > { %v1150_v23 = vrot.slane %v1149_v1, 4  ;;  %v1140_v63 = vrot.slane %v1139_v28, 1 }
 0x382   : > { %v1146_v30 = vadd.f32 %v1145_v20, %v1144_v59  ;;  %v1169_v42 = vadd.f32 %v1168_v7, %v1167_v55 }
 0x383   : > { %v1151_v31 = vadd.f32 %v1150_v23, %v1149_v1  ;;  %v1047_v33 = vpop.permute.xlu0 %1046  ;;  %v1141_v9 = vadd.f32 %v1140_v63, %v1139_v28 }
 0x384   : > { %v6065_v40 = vadd.f32 %v1047_v33, %v861_v26  ;;  %v1147_v41 = vrot.slane %v1146_v30, 1 }
 0x385   : > { %v1152_v54 = vrot.slane %v1151_v31, 2  ;;  %v1191_v29 = vpack.c.bf16 %v1141_v9, %v1141_v9 }
 0x386   : > { %v1131_v13 = vmul.f32 %v5070_v39, %v6065_v40  ;;  %v6071_v46 = vpop.permute.xlu1 %5072  ;;  %v1148_v50 = vadd.f32 %v1147_v41, %v1146_v30 }
 0x387   : > { %v1153_v57 = vadd.f32 %v1152_v54, %v1151_v31  ;;  %v5074_v49 = vunpack.i.l.bf16 %v6071_v46  ;;  %v5075_v3 = vunpack.i.h.bf16 %v6071_v46  ;;  %v1194_v31 = vpack.c.bf16 %v1162_v10, %v1162_v10 }
 0x388   : > { %v1170_v60 = vsel %vm1134_vm11, %v1131_v13, 0.0  ;;  %v1192_v1 = vpack.c.bf16 %v1148_v50, %v1148_v50  ;;  %v1207_v61 = vunpack.c.l.b16 %v1191_v29 }
 0x389   : > { %v1154_v51 = vrot.slane %v1153_v57, 1  ;;  %v1171_v62 = vrot.slane %v1170_v60, 4  ;;  %v1132_v8 = vmul.f32 %v5074_v49, %v6073_v48 }
 0x38a   : > { %v1208_v34 = vunpack.c.l.b16 %v1192_v1 }
 0x38b   : > { %v1155_v15 = vadd.f32 %v1154_v51, %v1153_v57  ;;  %v1172_v12 = vadd.f32 %v1171_v62, %v1170_v60  ;;  %v1051_v59 = vpop.permute.xlu0 %1050  ;;  %v1177_v17 = vsel %vm1134_vm11, %v1132_v8, 0.0  ;;  %v1195_v62 = vpack.c.bf16 %v1169_v42, %v1169_v42 }
 0x38c   : > { %v6083_v18 = vadd.f32 %v1051_v59, %v863_v16  ;;  %v1178_v23 = vrot.slane %v1177_v17, 4  ;;  %v1216_v51 = vsel %vm1215_vm12, %v1208_v34, %v1207_v61  ;;  %v1210_v8 = vunpack.c.l.b16 %v1194_v31 }
 0x38d   : > { %v1173_v20 = vrot.slane %v1172_v12, 2  ;;  %v1193_v24 = vpack.c.bf16 %v1155_v15, %v1155_v15  ;;  %v1351_v31 = vpack.c.bf16 %v6017_v22, %v6055_v14  ;;  %v6106_v34 = vunpack.c.h.bf16 %v5971_v5 }
 0x38e   : > { %v1133_v26 = vmul.f32 %v5075_v3, %v6083_v18  ;;  %v1179_v30 = vadd.f32 %v1178_v23, %v1177_v17  ;;  %v1211_v17 = vunpack.c.l.b16 %v1195_v62  ;;  %v6114_v42 = vor.u32 %v5852_v6, %v5844_v4 }
 0x38f   : > { %v1174_v28 = vadd.f32 %v1173_v20, %v1172_v12  ;;  %v1209_v43 = vunpack.c.l.b16 %v1193_v24  ;;  %v6119_v5 = vor.u32 %v5836_v2, %v5826_v0  ;;  %v4848_v2 = vld [vmem:[%s5821_s28 + $0x4] sm:$0xf] }
 0x390   : > { %v1184_v33 = vsel %vm1134_vm11, %v1133_v26, 0.0  ;;  %v1180_v41 = vrot.slane %v1179_v30, 2  ;;  %1253 = vmatpush.bf16.msra.mxu2 %v6114_v42  ;;  %v1281_v6 = vunpack.c.l.bf16 %v4848_v2 }
 0x391   : > { %v1175_v37 = vrot.slane %v1174_v28, 1  ;;  %v1185_v54 = vrot.slane %v1184_v33, 4  ;;  %v1218_v16 = vsel %vm1217_vm13, %v1209_v43, %v1216_v51 }
 0x392   : > { %v1181_v63 = vadd.f32 %v1180_v41, %v1179_v30  ;;  %v1220_v10 = vsel %vm1219_vm14, %v1210_v8, %v1218_v16  ;;  %v1575_v41 = vperm.slane %v6106_v34, 3 }
 0x393   : > { %v1176_v13 = vadd.f32 %v1175_v37, %v1174_v28  ;;  %v1186_v57 = vadd.f32 %v1185_v54, %v1184_v33  ;;  %v1222_v23 = vsel %vm1221_vm15, %v1211_v17, %v1220_v10  ;;  %v1353_v33 = vpack.c.bf16 %v6083_v18, %v6073_v48 }
 0x394   : > { %v1182_v47 = vrot.slane %v1181_v63, 1  ;;  %v1568_v37 = vperm.slane %v6106_v34, 2  ;;  %1254 = vmatpush.bf16.msra.mxu2 %v6119_v5 }
 0x395   : > { %v1187_v60 = vrot.slane %v1186_v57, 2  ;;  %v1196_v50 = vpack.c.bf16 %v1176_v13, %v1176_v13 }
 0x396   : > { %v1183_v15 = vadd.f32 %v1182_v47, %v1181_v63  ;;  %v5081_v54 = vpack.i.bf16 %v1575_v41, %v1568_v37  ;;  %v1352_v47 = vpack.c.bf16 %v6065_v40, %v6033_v38 }
 0x397   : > { %v1188_v9 = vadd.f32 %v1187_v60, %v1186_v57  ;;  %v1212_v59 = vunpack.c.l.b16 %v1196_v50  ;;  %v1554_v60 = vperm.slane %v6106_v34, 0  ;;  %v1561_v50 = vperm.slane %v6106_v34, 1 }
 0x398   : > { %v1197_v12 = vpack.c.bf16 %v1183_v15, %v1183_v15  ;;  %1717 = vmatpush.bf16.msrb.mxu2 %v6114_v42 }
 0x399   : > { %v1189_v55 = vrot.slane %v1188_v9, 1  ;;  %v1224_v24 = vsel %vm1223_vm0, %v1212_v59, %v1222_v23  ;;  %v5076_v51 = vpack.i.bf16 %v1561_v50, %v1554_v60 }
 0x39a   : > { %v1213_v20 = vunpack.c.l.b16 %v1197_v12 }
 0x39b   : > { %v1190_v1 = vadd.f32 %v1189_v55, %v1188_v9 }
 0x39c   : > { %v1226_v29 = vsel %vm1225_vm1, %v1213_v20, %v1224_v24  ;;  %1718 = vmatpush.bf16.msrb.mxu2 %v6119_v5 }
 0x39d   : > { %v1198_v7 = vpack.c.bf16 %v1190_v1, %v1190_v1 }
 0x39f   : > { %v1214_v26 = vunpack.c.l.b16 %v1198_v7 }
 0x3a1   : > { %v1228_v28 = vsel %vm1227_vm2, %v1214_v26, %v1226_v29 }
 0x3a2   : > { %v1229_v30 = vpack.c.b16 %v1228_v28, %v1228_v28 }
 0x3a4   : > { %1230 = vrot.lane.b32.xlu2 %v1229_v30, %s5628_s24 }
 0x3ac   : > { %1360 = vrot.lane.b32.xlu2 %v1351_v31, %s5628_s24 }
 0x3b4   : > { %1364 = vrot.lane.b32.xlu2 %v1353_v33, %s5628_s24 }
 0x3bc   : > { %1483 = vrot.lane.b32.xlu2 %v6055_v14, %s5628_s24 }
 0x3c4   : > { %1489 = vrot.lane.b32.xlu2 %v6065_v40, %s5628_s24 }
 0x3cc   : > { %5082 = vperm.xlu2 %5054, %v5081_v54  }
 0x3ed   : > { %v1359_v14 = vpop.permute.xlu1 %1358 }
 0x3ee   : > { %4851 = vmatmul.msk.bf16.vlgmr.msrb.gmra.mxu0 %vm882_vm10, %v1359_v14 }
 0x3ef   : > { %3112 = vmatpush.bf16.msrb.mxu0 %v6114_v42 }
 0x3f3   : > { %3113 = vmatpush.bf16.msrb.mxu0 %v6119_v5 }
 0x3fe   : > { %v1231_v4 = vpop.permute.xlu2 %1230 }
 0x3ff   : > { %4847 = vmatmul.msk.bf16.vlgmr.msra.gmra.mxu2 %vm882_vm10, %v1231_v4 }
 0x400   : > { %1849 = vmatpush.bf16.msra.mxu2 %v5908_v52 }
 0x404   : > { %1850 = vmatpush.bf16.msra.mxu2 %v5920_v56 }
 0x406   : > { %v1361_v0 = vpop.permute.xlu2 %1360 }
 0x407   : > { %4852 = vmatmul.msk.bf16.gmra.mxu0 %vm882_vm10, %v1361_v0 }
 0x40e   : > { %v1365_v55 = vpop.permute.xlu2 %1364 }
 0x46b   : > { %v1387_v59 = vpop.f32.mrf.mxu0 }
 0x473   : > { %v1389_v10 = vpop.f32.mrf.mxu0 }
 0x482   : > { %v6132_v43 = vpop.f32.mrf.mxu2 }
 0x483   : > { %v1282_v61 = vadd.f32 %v1281_v6, %v6132_v43 }
 0x484   : > { %v1392_v17 = vpop.f32.mrf.mxu0 }
 0x485   : > { %5256 = vtanh.f32 %v1282_v61  ;;  %v1284_v62 = vmul.f32 0.5, %v1282_v61 }
 0x487   : > { %5258 = vtanh.f32 %v1284_v62 }
 0x48a   : > { %v1258_v13 = vpop.f32.mrf.mxu2 }
 0x48b   : > { %v5257_v63 = vpop.eup %5256 }
 0x48c   : > { %v1288_v57 = vadd.f32 1.0, %v5257_v63 }
 0x48d   : > { %v5259_v40 = vpop.eup %5258 }
 0x48e   : > { %1290 = vrot.lane.b32.xlu0 %v1288_v57, %s5627_s12  ;;  %v1286_v16 = vmul.f32 0.5, %v5259_v40 }
 0x490   : > { %v1287_v8 = vadd.f32 0.5, %v1286_v16 }
 0x496   : > { %1362 = vrot.lane.b32.xlu0 %v1352_v47, %s5628_s24 }
 0x49e   : > { %1479 = vrot.lane.b32.xlu0 %v6030_v36, %s5628_s24 }
 0x4a6   : > { %1485 = vrot.lane.b32.xlu0 %v6017_v22, %s5628_s24 }
 0x4ae   : > { %1491 = vrot.lane.b32.xlu0 %v6073_v48, %s5628_s24 }
 0x4b6   : > { %5077 = vperm.xlu0 %5055, %v5076_v51  }
 0x500   : > { %v1291_v9 = vpop.permute.xlu0 %1290 }
 0x501   : > { %v1293_v15 = vmul.f32 %v1291_v9, %v1287_v8 }
 0x503   : > { %v6147_v36 = vmul.f32 0.5, %v1293_v15 }
 0x505   : > { %v1327_v22 = vpack.c.bf16 %v6147_v36, %v6147_v36 }
 0x507   : > { %1332 = vrot.lane.b32.xlu1 %v1327_v22, %s5628_s24 }
 0x508   : > { %v1363_v48 = vpop.permute.xlu0 %1362 }
 0x509   : > { %4853 = vmatmul.msk.bf16.gmra.mxu0 %vm882_vm10, %v1363_v48 }
 0x50f   : > { %1481 = vrot.lane.b32.xlu1 %v6043_v45, %s5628_s24  ;;  %v1394_v45 = vpop.f32.mrf.mxu0 }
 0x517   : > { %1487 = vrot.lane.b32.xlu1 %v6033_v38, %s5628_s24  ;;  %v4849_v38 = vld [vmem:[%s5796_s15 + $0x4] sm:$0xf] }
 0x518   : > { %v1330_v23 = vunpack.c.l.bf16 %v4849_v38 }
 0x519   : > { %4854 = vmatmul.msk.bf16.gmra.mxu0 %vm882_vm10, %v1365_v55 }
 0x51f   : > { %1493 = vrot.lane.b32.xlu1 %v6083_v18, %s5628_s24 }
 0x579   : > { %v1333_v12 = vpop.permute.xlu1 %1332 }
 0x57a   : > { %4850 = vmatmul.msk.bf16.vlgmr.msrb.gmra.mxu3 %vm882_vm10, %v1333_v12 }
 0x57b   : > { %2182 = vmatpush.bf16.msrb.mxu3 %v6114_v42 }
 0x57f   : > { %2183 = vmatpush.bf16.msrb.mxu3 %v6119_v5 }
 0x586   : > { %v1397_v1 = vpop.f32.mrf.mxu0 }
 0x58e   : > { %v1399_v20 = vpop.f32.mrf.mxu0 }
 0x596   : > { %v1402_v26 = vpop.f32.mrf.mxu0 }
 0x59e   : > { %v1404_v22 = vpop.f32.mrf.mxu0 }
 0x5fd   : > { %v1346_v7 = vpop.f32.mrf.mxu3 }
 0x5fe   : > { %v1347_v24 = vadd.f32 %v1346_v7, %v1330_v23 }
 0x600   : > { %v1415_v29 = vperm.slane %v1347_v24, 0  ;;  %v1408_v18 = vrot.slane %v1347_v24, 1  ;;  %v1409_v28 = vrot.slane %v1347_v24, 2  ;;  %v1410_v30 = vrot.slane %v1347_v24, 3 }
 0x601   : > { %v1411_v31 = vrot.slane %v1347_v24, 4  ;;  %v1412_v33 = vrot.slane %v1347_v24, 5  ;;  %v1413_v2 = vrot.slane %v1347_v24, 6  ;;  %v1414_v6 = vrot.slane %v1347_v24, 7 }
 0x602   : > { %v1431_v37 = vadd.f32 %v1415_v29, %v1387_v59  ;;  %v1416_v41 = vperm.slane %v1408_v18, 0  ;;  %v1417_v54 = vperm.slane %v1409_v28, 0  ;;  %v1418_v14 = vperm.slane %v1410_v30, 0  ;;  %v1484_v29 = vpop.permute.xlu2 %1483 }
 0x603   : > { %v1419_v4 = vperm.slane %v1411_v31, 0  ;;  %v1420_v0 = vperm.slane %v1412_v33, 0  ;;  %v1422_v51 = vperm.slane %v1414_v6, 0  ;;  %v1421_v9 = vperm.slane %v1413_v2, 0 }
 0x604   : > { %v1439_v61 = vmul.f32 0.5, %v1431_v37  ;;  %v1432_v13 = vadd.f32 %v1416_v41, %v1389_v10  ;;  %v1433_v63 = vadd.f32 %v1417_v54, %v1392_v17  ;;  %v1434_v57 = vadd.f32 %v1418_v14, %v1394_v45  ;;  %v1480_v17 = vpop.permute.xlu0 %1479  ;;  %v1482_v45 = vpop.permute.xlu1 %1481 }
 0x605   : > { %v1348_v47 = vpop.f32.mrf.mxu3  ;;  %v1435_v60 = vadd.f32 %v1419_v4, %v1397_v1  ;;  %v1436_v50 = vadd.f32 %v1420_v0, %v1399_v20  ;;  %v1438_v48 = vadd.f32 %v1422_v51, %v1404_v22  ;;  %v1437_v55 = vadd.f32 %v1421_v9, %v1402_v26 }
 0x606   : > { %5260 = vtanh.f32 %v1439_v61  ;;  %v1440_v62 = vmul.f32 0.5, %v1432_v13  ;;  %v1441_v40 = vmul.f32 0.5, %v1433_v63  ;;  %v1442_v16 = vmul.f32 0.5, %v1434_v57 }
 0x607   : > { %v1443_v8 = vmul.f32 0.5, %v1435_v60  ;;  %v1444_v15 = vmul.f32 0.5, %v1436_v50  ;;  %v1446_v1 = vmul.f32 0.5, %v1438_v48  ;;  %v1445_v7 = vmul.f32 0.5, %v1437_v55 }
 0x608   : > { %5262 = vtanh.f32 %v1440_v62  ;;  %v1582_v51 = vperm.slane %v6106_v34, 4  ;;  %v1589_v62 = vperm.slane %v6106_v34, 5 }
 0x609   : > { %5264 = vtanh.f32 %v1441_v40 }
 0x60a   : > { %5266 = vtanh.f32 %v1442_v16  ;;  %v1490_v60 = vpop.permute.xlu2 %1489  ;;  %v5086_v9 = vpack.i.bf16 %v1589_v62, %v1582_v51 }
 0x60b   : > { %5268 = vtanh.f32 %v1443_v8 }
 0x60c   : > { %v5261_v12 = vpop.eup %5260  ;;  %5270 = vtanh.f32 %v1444_v15  ;;  %v1486_v61 = vpop.permute.xlu0 %1485 }
 0x60d   : > { %v1455_v59 = vmul.f32 0.5, %v5261_v12  ;;  %5272 = vtanh.f32 %v1446_v1  ;;  %v1488_v13 = vpop.permute.xlu1 %1487 }
 0x60e   : > { %v5263_v10 = vpop.eup %5262  ;;  %5274 = vtanh.f32 %v1445_v7  ;;  %v1296_v7 = vrot.slane %v6147_v36, 1 }
 0x60f   : > { %v5265_v20 = vpop.eup %5264  ;;  %v1463_v38 = vadd.f32 0.5, %v1455_v59  ;;  %v1456_v23 = vmul.f32 0.5, %v5263_v10  ;;  %v1596_v10 = vperm.slane %v6106_v34, 6 }
 0x610   : > { %v5267_v24 = vpop.eup %5266  ;;  %v1457_v18 = vmul.f32 0.5, %v5265_v20 }
 0x611   : > { %v5269_v28 = vpop.eup %5268  ;;  %v1503_v30 = vmul.f32 %v1480_v17, %v1463_v38  ;;  %v1464_v31 = vadd.f32 0.5, %v1456_v23  ;;  %v1458_v33 = vmul.f32 0.5, %v5267_v24  ;;  %v1603_v17 = vperm.slane %v6106_v34, 7 }
 0x612   : > { %v5271_v37 = vpop.eup %5270  ;;  %v1465_v26 = vadd.f32 0.5, %v1457_v18  ;;  %v1459_v4 = vmul.f32 0.5, %v5269_v28  ;;  %v6176_v1 = vpop.permute.xlu2 %5082  ;;  %v1303_v38 = vperm.slane %v6147_v36, 0  ;;  %v1298_v23 = vrot.slane %v6147_v36, 3 }
 0x613   : > { %1519 = vrot.lane.b32.xlu2 %v1503_v30, %s5627_s12  ;;  %v1504_v41 = vmul.f32 %v1482_v45, %v1464_v31  ;;  %v1460_v54 = vmul.f32 0.5, %v5271_v37  ;;  %v1466_v0 = vadd.f32 0.5, %v1458_v33  ;;  %v5273_v6 = vpop.eup %5272  ;;  %v5091_v45 = vpack.i.bf16 %v1603_v17, %v1596_v10 }
 0x614   : > { %v1505_v14 = vmul.f32 %v1484_v29, %v1465_v26  ;;  %v1467_v63 = vadd.f32 0.5, %v1459_v4  ;;  %v5275_v57 = vpop.eup %5274  ;;  %v1462_v40 = vmul.f32 0.5, %v5273_v6  ;;  %v1492_v55 = vpop.permute.xlu0 %1491  ;;  %v1319_v29 = vmul.f32 %v5059_v35, %v1303_v38 }
 0x615   : > { %1521 = vrot.lane.b32.xlu0 %v1504_v41, %s5627_s12  ;;  %v1468_v2 = vadd.f32 0.5, %v1460_v54  ;;  %v1506_v47 = vmul.f32 %v1486_v61, %v1466_v0  ;;  %v1461_v8 = vmul.f32 0.5, %v5275_v57  ;;  %v1494_v48 = vpop.permute.xlu1 %1493  ;;  %v1297_v18 = vrot.slane %v6147_v36, 2 }
 0x616   : > { %1523 = vrot.lane.b32.xlu1 %v1505_v14, %s5627_s12  ;;  %v1507_v16 = vmul.f32 %v1488_v13, %v1467_v63  ;;  %v1470_v15 = vadd.f32 0.5, %v1462_v40  ;;  %v1306_v34 = vperm.slane %v1298_v23, 0  ;;  %v1304_v30 = vperm.slane %v1296_v7, 0 }
 0x617   : > { %v1508_v50 = vmul.f32 %v1490_v60, %v1468_v2  ;;  %v1469_v22 = vadd.f32 0.5, %v1461_v8  ;;  %v1305_v37 = vperm.slane %v1297_v18, 0  ;;  %v1300_v54 = vrot.slane %v6147_v36, 5 }
 0x618   : > { %v1510_v12 = vmul.f32 %v1494_v48, %v1470_v15  ;;  %v1322_v41 = vmul.f32 %v5065_v25, %v1306_v34  ;;  %v1320_v35 = vmul.f32 %v5060_v44, %v1304_v30  ;;  %v1299_v0 = vrot.slane %v6147_v36, 4 }
 0x619   : > { %v1509_v59 = vmul.f32 %v1492_v55, %v1469_v22  ;;  %v1321_v4 = vmul.f32 %v5064_v58, %v1305_v37  ;;  %v5084_v25 = vunpack.i.l.bf16 %v6176_v1  ;;  %v5085_v63 = vunpack.i.h.bf16 %v6176_v1 }
 0x61a   : > { %v1308_v57 = vperm.slane %v1300_v54, 0  ;;  %v1307_v60 = vperm.slane %v1299_v0, 0  ;;  %v1301_v54 = vrot.slane %v6147_v36, 6 }
 0x61b   : > { %1525 = vrot.lane.b32.xlu2 %v1506_v47, %s5627_s12 }
 0x61c   : > { %v6181_v24 = vpop.permute.xlu0 %5077  ;;  %v1324_v15 = vmul.f32 %v5070_v39, %v1308_v57  ;;  %v1323_v48 = vmul.f32 %v5069_v32, %v1307_v60  ;;  %v1309_v60 = vperm.slane %v1301_v54, 0 }
 0x61d   : > { %1529 = vrot.lane.b32.xlu0 %v1508_v50, %s5627_s12  ;;  %v5079_v31 = vunpack.i.l.bf16 %v6181_v24  ;;  %v5080_v2 = vunpack.i.h.bf16 %v6181_v24 }
 0x61e   : > { %1527 = vrot.lane.b32.xlu1 %v1507_v16, %s5627_s12 }
 0x623   : > { %5087 = vperm.xlu2 %5054, %v5086_v9  }
 0x625   : > { %1533 = vrot.lane.b32.xlu0 %v1510_v12, %s5627_s12 }
 0x626   : > { %1531 = vrot.lane.b32.xlu1 %v1509_v59, %s5627_s12 }
 0x62e   : > { %5092 = vperm.xlu1 %5053, %v5091_v45  }
 0x66d   : > { %v1520_v20 = vpop.permute.xlu2 %1519 }
 0x66e   : > { %v6186_v28 = vadd.f32 %v1520_v20, %v1319_v29 }
 0x670   : > { %v1610_v26 = vmul.f32 %v5079_v31, %v6186_v28 }
 0x672   : > { %v1618_v19 = vsel %vm1134_vm11, %v1610_v26, 0.0  ;;  %v1302_v26 = vrot.slane %v6147_v36, 7 }
 0x673   : > { %v1619_v50 = vrot.slane %v1618_v19, 4 }
 0x675   : > { %v1526_v33 = vpop.permute.xlu2 %1525  ;;  %v1620_v12 = vadd.f32 %v1619_v50, %v1618_v19 }
 0x676   : > { %v6201_v6 = vadd.f32 %v1526_v33, %v1322_v41 }
 0x677   : > { %v1621_v29 = vrot.slane %v1620_v12, 2 }
 0x678   : > { %v1613_v51 = vmul.f32 %v5085_v63, %v6201_v6 }
 0x67a   : > { %v1639_v59 = vsel %vm1134_vm11, %v1613_v51, 0.0 }
 0x67b   : > { %v1640_v27 = vrot.slane %v1639_v59, 4 }
 0x67d   : > { %v6223_v40 = vpop.permute.xlu2 %5087  ;;  %v1641_v41 = vadd.f32 %v1640_v27, %v1639_v59 }
 0x67e   : > { %v5090_v10 = vunpack.i.h.bf16 %v6223_v40  ;;  %v5089_v20 = vunpack.i.l.bf16 %v6223_v40 }
 0x67f   : > { %v1642_v57 = vrot.slane %v1641_v41, 2 }
 0x687   : > { %v1522_v14 = vpop.permute.xlu0 %1521 }
 0x688   : > { %v6203_v61 = vadd.f32 %v1522_v14, %v1320_v35  ;;  %v1524_v13 = vpop.permute.xlu1 %1523  ;;  %v1622_v14 = vadd.f32 %v1621_v29, %v1620_v12 }
 0x689   : > { %v6207_v44 = vadd.f32 %v1524_v13, %v1321_v4 }
 0x68a   : > { %v1611_v21 = vmul.f32 %v5080_v2, %v6203_v61  ;;  %v1815_v58 = vpack.c.bf16 %v6203_v61, %v6186_v28  ;;  %v1623_v50 = vrot.slane %v1622_v14, 1 }
 0x68b   : > { %v1612_v47 = vmul.f32 %v5084_v25, %v6207_v44 }
 0x68c   : > { %v1625_v62 = vsel %vm1134_vm11, %v1611_v21, 0.0  ;;  %1823 = vrot.lane.b32.xlu1 %v1815_v58, %s5628_s24  ;;  %v1310_v58 = vperm.slane %v1302_v26, 0 }
 0x68d   : > { %v1626_v16 = vrot.slane %v1625_v62, 4  ;;  %v1632_v8 = vsel %vm1134_vm11, %v1612_v47, 0.0 }
 0x68e   : > { %v1633_v9 = vrot.slane %v1632_v8, 4 }
 0x68f   : > { %v1627_v22 = vadd.f32 %v1626_v16, %v1625_v62  ;;  %v1530_v55 = vpop.permute.xlu0 %1529 }
 0x690   : > { %v1528_v17 = vpop.permute.xlu1 %1527  ;;  %v6232_v45 = vadd.f32 %v1530_v55, %v1324_v15  ;;  %v1634_v23 = vadd.f32 %v1633_v9, %v1632_v8  ;;  %v1326_v9 = vmul.f32 %v5075_v3, %v1310_v58  ;;  %v1643_v15 = vadd.f32 %v1642_v57, %v1641_v41 }
 0x691   : > { %v6235_v38 = vadd.f32 %v1528_v17, %v1323_v48  ;;  %v1628_v32 = vrot.slane %v1627_v22, 2  ;;  %v1624_v48 = vadd.f32 %v1623_v50, %v1622_v14 }
 0x692   : > { %v1615_v39 = vmul.f32 %v5090_v10, %v6232_v45  ;;  %v1635_v33 = vrot.slane %v1634_v23, 2  ;;  %v1644_v3 = vrot.slane %v1643_v15, 1 }
 0x693   : > { %v1614_v7 = vmul.f32 %v5089_v20, %v6235_v38  ;;  %v1629_v35 = vadd.f32 %v1628_v32, %v1627_v22  ;;  %v1325_v22 = vmul.f32 %v5074_v49, %v1309_v60  ;;  %v1674_v29 = vpack.c.bf16 %v1624_v48, %v1624_v48 }
 0x694   : > { %v1653_v18 = vsel %vm1134_vm11, %v1615_v39, 0.0  ;;  %v1636_v19 = vadd.f32 %v1635_v33, %v1634_v23 }
 0x695   : > { %v1646_v34 = vsel %vm1134_vm11, %v1614_v7, 0.0  ;;  %v1654_v30 = vrot.slane %v1653_v18, 4  ;;  %v1630_v47 = vrot.slane %v1629_v35, 1 }
 0x696   : > { %v1647_v37 = vrot.slane %v1646_v34, 4  ;;  %v1637_v16 = vrot.slane %v1636_v19, 1 }
 0x697   : > { %v1655_v13 = vadd.f32 %v1654_v30, %v1653_v18  ;;  %v1534_v62 = vpop.permute.xlu0 %1533  ;;  %v1631_v36 = vadd.f32 %v1630_v47, %v1629_v35  ;;  %v1645_v35 = vadd.f32 %v1644_v3, %v1643_v15 }
 0x698   : > { %v1648_v4 = vadd.f32 %v1647_v37, %v1646_v34  ;;  %v1532_v0 = vpop.permute.xlu1 %1531  ;;  %v6251_v55 = vadd.f32 %v1534_v62, %v1326_v9  ;;  %v1638_v27 = vadd.f32 %v1637_v16, %v1636_v19 }
 0x699   : > { %v1656_v51 = vrot.slane %v1655_v13, 2  ;;  %v6255_v17 = vadd.f32 %v1532_v0, %v1325_v22  ;;  %v1675_v7 = vpack.c.bf16 %v1631_v36, %v1631_v36  ;;  %v1690_v0 = vunpack.c.l.b16 %v1674_v29 }
 0x69a   : > { %v1649_v21 = vrot.slane %v1648_v4, 2  ;;  %v1676_v33 = vpack.c.bf16 %v1638_v27, %v1638_v27  ;;  %v1677_v47 = vpack.c.bf16 %v1645_v35, %v1645_v35 }
 0x69b   : > { %v1657_v59 = vadd.f32 %v1656_v51, %v1655_v13  ;;  %v1691_v54 = vunpack.c.l.b16 %v1675_v7 }
 0x69c   : > { %v1650_v8 = vadd.f32 %v1649_v21, %v1648_v4  ;;  %v1692_v19 = vunpack.c.l.b16 %v1676_v33  ;;  %v1693_v36 = vunpack.c.l.b16 %v1677_v47  ;;  %v1816_v33 = vpack.c.bf16 %v6201_v6, %v6207_v44 }
 0x69d   : > { %v1658_v18 = vrot.slane %v1657_v59, 1  ;;  %v1698_v60 = vsel %vm1215_vm12, %v1691_v54, %v1690_v0 }
 0x69e   : > { %v1651_v32 = vrot.slane %v1650_v8, 1  ;;  %v1699_v15 = vsel %vm1217_vm13, %v1692_v19, %v1698_v60 }
 0x69f   : > { %v1659_v13 = vadd.f32 %v1658_v18, %v1657_v59  ;;  %v1700_v59 = vsel %vm1219_vm14, %v1693_v36, %v1699_v15 }
 0x6a0   : > { %v6253_v12 = vpop.permute.xlu1 %5092  ;;  %v1652_v37 = vadd.f32 %v1651_v32, %v1650_v8 }
 0x6a1   : > { %v5095_v23 = vunpack.i.h.bf16 %v6253_v12  ;;  %v5094_v39 = vunpack.i.l.bf16 %v6253_v12  ;;  %v1679_v62 = vpack.c.bf16 %v1659_v13, %v1659_v13  ;;  %v4858_v13 = vld [vmem:[%s5821_s28 + $0x8] sm:$0xf] }
 0x6a2   : > { %v1678_v21 = vpack.c.bf16 %v1652_v37, %v1652_v37  ;;  %v1818_v37 = vpack.c.bf16 %v6251_v55, %v6255_v17  ;;  %v1746_v19 = vunpack.c.l.bf16 %v4858_v13 }
 0x6a3   : > { %v1616_v46 = vmul.f32 %v5094_v39, %v6255_v17  ;;  %v1617_v49 = vmul.f32 %v5095_v23, %v6251_v55  ;;  %v1695_v27 = vunpack.c.l.b16 %v1679_v62 }
 0x6a4   : > { %v1694_v16 = vunpack.c.l.b16 %v1678_v21 }
 0x6a5   : > { %v1660_v34 = vsel %vm1134_vm11, %v1616_v46, 0.0  ;;  %v1667_v30 = vsel %vm1134_vm11, %v1617_v49, 0.0 }
 0x6a6   : > { %v1661_v26 = vrot.slane %v1660_v34, 4  ;;  %v1668_v41 = vrot.slane %v1667_v30, 4  ;;  %v1701_v7 = vsel %vm1221_vm15, %v1694_v16, %v1700_v59 }
 0x6a7   : > { %v1702_v29 = vsel %vm1223_vm0, %v1695_v27, %v1701_v7 }
 0x6a8   : > { %v1662_v14 = vadd.f32 %v1661_v26, %v1660_v34  ;;  %v1669_v4 = vadd.f32 %v1668_v41, %v1667_v30  ;;  %v4865_v26 = vld [vmem:[%s5816_s17 + $0x8] sm:$0xf] }
 0x6a9   : > { %v6284_v41 = vunpack.c.l.bf16 %v4865_v26 }
 0x6aa   : > { %v1663_v58 = vrot.slane %v1662_v14, 2  ;;  %v1670_v57 = vrot.slane %v1669_v4, 2 }
 0x6ab   : > { %v2033_v35 = vperm.slane %v6284_v41, 2  ;;  %v2040_v54 = vperm.slane %v6284_v41, 3  ;;  %v2026_v62 = vperm.slane %v6284_v41, 1 }
 0x6ac   : > { %v1664_v50 = vadd.f32 %v1663_v58, %v1662_v14  ;;  %v1671_v51 = vadd.f32 %v1670_v57, %v1669_v4 }
 0x6ad   : > { %v5101_v14 = vpack.i.bf16 %v2040_v54, %v2033_v35 }
 0x6ae   : > { %v1665_v8 = vrot.slane %v1664_v50, 1  ;;  %v1672_v9 = vrot.slane %v1671_v51, 1 }
 0x6b0   : > { %v1666_v22 = vadd.f32 %v1665_v8, %v1664_v50  ;;  %v1673_v48 = vadd.f32 %v1672_v9, %v1671_v51  ;;  %v1817_v50 = vpack.c.bf16 %v6232_v45, %v6235_v38  ;;  %v2019_v51 = vperm.slane %v6284_v41, 0 }
 0x6b2   : > { %v1680_v32 = vpack.c.bf16 %v1666_v22, %v1666_v22  ;;  %v1681_v3 = vpack.c.bf16 %v1673_v48, %v1673_v48  ;;  %v5096_v16 = vpack.i.bf16 %v2026_v62, %v2019_v51 }
 0x6b4   : > { %v1696_v46 = vunpack.c.l.b16 %v1680_v32  ;;  %v1697_v49 = vunpack.c.l.b16 %v1681_v3 }
 0x6b6   : > { %v1703_v18 = vsel %vm1225_vm1, %v1696_v46, %v1702_v29 }
 0x6b7   : > { %v1704_v34 = vsel %vm1227_vm2, %v1697_v49, %v1703_v18 }
 0x6b8   : > { %v1705_v30 = vpack.c.b16 %v1704_v34, %v1704_v34 }
 0x6ba   : > { %1706 = vrot.lane.b32.xlu2 %v1705_v30, %s5628_s24 }
 0x6c2   : > { %1825 = vrot.lane.b32.xlu2 %v1816_v33, %s5628_s24 }
 0x6ca   : > { %1829 = vrot.lane.b32.xlu2 %v1818_v37, %s5628_s24 }
 0x6d2   : > { %1948 = vrot.lane.b32.xlu2 %v6207_v44, %s5628_s24 }
 0x6da   : > { %1954 = vrot.lane.b32.xlu2 %v6232_v45, %s5628_s24 }
 0x6e2   : > { %5102 = vperm.xlu2 %5054, %v5101_v14  }
 0x6fe   : > { %v1824_v44 = vpop.permute.xlu1 %1823 }
 0x714   : > { %v1707_v4 = vpop.permute.xlu2 %1706 }
 0x715   : > { %4856 = vmatmul.msk.bf16.vlgmr.msrb.gmra.mxu2 %vm882_vm10, %v1707_v4 }
 0x716   : > { %3203 = vmatpush.bf16.msrb.mxu2 %v5912_v53 }
 0x71a   : > { %3204 = vmatpush.bf16.msrb.mxu2 %v5931_v11 }
 0x71c   : > { %v1826_v0 = vpop.permute.xlu2 %1825 }
 0x724   : > { %v1830_v48 = vpop.permute.xlu2 %1829 }
 0x725   : > { %4861 = vmatmul.msk.bf16.vlgmr.msra.gmra.mxu2 %vm882_vm10, %v1824_v44 }
 0x726   : > { %3577 = vmatpush.bf16.msra.mxu2 %v6114_v42 }
 0x72a   : > { %3578 = vmatpush.bf16.msra.mxu2 %v6119_v5 }
 0x735   : > { %4862 = vmatmul.msk.bf16.gmra.mxu2 %vm882_vm10, %v1826_v0 }
 0x798   : > { %v6298_v21 = vpop.f32.mrf.mxu2 }
 0x799   : > { %v1747_v58 = vadd.f32 %v1746_v19, %v6298_v21 }
 0x79b   : > { %5276 = vtanh.f32 %v1747_v58  ;;  %v1749_v8 = vmul.f32 0.5, %v1747_v58 }
 0x79d   : > { %5278 = vtanh.f32 %v1749_v8 }
 0x7a0   : > { %v1722_v57 = vpop.f32.mrf.mxu2 }
 0x7a1   : > { %v5277_v47 = vpop.eup %5276 }
 0x7a2   : > { %v1753_v60 = vadd.f32 1.0, %v5277_v47 }
 0x7a3   : > { %v5279_v45 = vpop.eup %5278 }
 0x7a4   : > { %1755 = vrot.lane.b32.xlu0 %v1753_v60, %s5627_s12  ;;  %v1751_v9 = vmul.f32 0.5, %v5279_v45 }
 0x7a6   : > { %v1752_v15 = vadd.f32 0.5, %v1751_v9 }
 0x7a8   : > { %v1852_v59 = vpop.f32.mrf.mxu2 }
 0x7ac   : > { %1827 = vrot.lane.b32.xlu0 %v1817_v50, %s5628_s24 }
 0x7b0   : > { %v1854_v32 = vpop.f32.mrf.mxu2 }
 0x7b4   : > { %1944 = vrot.lane.b32.xlu0 %v6186_v28, %s5628_s24 }
 0x7b8   : > { %v1857_v3 = vpop.f32.mrf.mxu2 }
 0x7bc   : > { %1950 = vrot.lane.b32.xlu0 %v6201_v6, %s5628_s24 }
 0x7c4   : > { %1956 = vrot.lane.b32.xlu0 %v6255_v17, %s5628_s24 }
 0x7cc   : > { %5097 = vperm.xlu0 %5055, %v5096_v16  }
 0x816   : > { %v1756_v36 = vpop.permute.xlu0 %1755 }
 0x817   : > { %v1758_v22 = vmul.f32 %v1756_v36, %v1752_v15 }
 0x819   : > { %v6313_v28 = vmul.f32 0.5, %v1758_v22 }
 0x81b   : > { %v1792_v6 = vpack.c.bf16 %v6313_v28, %v6313_v28 }
 0x81d   : > { %1797 = vrot.lane.b32.xlu1 %v1792_v6, %s5628_s24 }
 0x81e   : > { %v1828_v17 = vpop.permute.xlu0 %1827 }
 0x81f   : > { %4863 = vmatmul.msk.bf16.gmra.mxu2 %vm882_vm10, %v1828_v17 }
 0x825   : > { %1946 = vrot.lane.b32.xlu1 %v6203_v61, %s5628_s24  ;;  %v1859_v61 = vpop.f32.mrf.mxu2 }
 0x82d   : > { %1952 = vrot.lane.b32.xlu1 %v6235_v38, %s5628_s24  ;;  %v4859_v38 = vld [vmem:[%s5796_s15 + $0x8] sm:$0xf] }
 0x82e   : > { %v1795_v49 = vunpack.c.l.bf16 %v4859_v38 }
 0x82f   : > { %4864 = vmatmul.msk.bf16.gmra.mxu2 %vm882_vm10, %v1830_v48 }
 0x835   : > { %1958 = vrot.lane.b32.xlu1 %v6251_v55, %s5628_s24 }
 0x88f   : > { %v1798_v27 = vpop.permute.xlu1 %1797 }
 0x890   : > { %4860 = vmatmul.msk.bf16.vlgmr.msra.gmra.mxu3 %vm882_vm10, %v1798_v27 }
 0x891   : > { %2273 = vmatpush.bf16.msra.mxu3 %v5912_v53 }
 0x895   : > { %2274 = vmatpush.bf16.msra.mxu3 %v5931_v11 }
 0x8a2   : > { %v1862_v7 = vpop.f32.mrf.mxu2 }
 0x8aa   : > { %v1864_v46 = vpop.f32.mrf.mxu2 }
 0x8b2   : > { %v1867_v34 = vpop.f32.mrf.mxu2 }
 0x8ba   : > { %v1869_v17 = vpop.f32.mrf.mxu2 }
 0x913   : > { %v1811_v29 = vpop.f32.mrf.mxu3 }
 0x914   : > { %v1812_v18 = vadd.f32 %v1811_v29, %v1795_v49 }
 0x916   : > { %v1880_v30 = vperm.slane %v1812_v18, 0  ;;  %v1873_v55 = vrot.slane %v1812_v18, 1  ;;  %v1874_v33 = vrot.slane %v1812_v18, 2  ;;  %v1875_v37 = vrot.slane %v1812_v18, 3 }
 0x917   : > { %v1876_v26 = vrot.slane %v1812_v18, 4  ;;  %v1877_v35 = vrot.slane %v1812_v18, 5  ;;  %v1878_v19 = vrot.slane %v1812_v18, 6  ;;  %v1879_v58 = vrot.slane %v1812_v18, 7 }
 0x918   : > { %v1896_v54 = vadd.f32 %v1880_v30, %v1852_v59  ;;  %v1881_v14 = vperm.slane %v1873_v55, 0  ;;  %v1882_v4 = vperm.slane %v1874_v33, 0  ;;  %v1883_v44 = vperm.slane %v1875_v37, 0  ;;  %v1949_v55 = vpop.permute.xlu2 %1948 }
 0x919   : > { %v1884_v0 = vperm.slane %v1876_v26, 0  ;;  %v1885_v13 = vperm.slane %v1877_v35, 0  ;;  %v1887_v8 = vperm.slane %v1879_v58, 0  ;;  %v1886_v22 = vperm.slane %v1878_v19, 0 }
 0x91a   : > { %v1904_v57 = vmul.f32 0.5, %v1896_v54  ;;  %v1897_v47 = vadd.f32 %v1881_v14, %v1854_v32  ;;  %v1898_v60 = vadd.f32 %v1882_v4, %v1857_v3  ;;  %v1899_v50 = vadd.f32 %v1883_v44, %v1859_v61  ;;  %v1945_v61 = vpop.permute.xlu0 %1944 }
 0x91b   : > { %v1813_v51 = vpop.f32.mrf.mxu3  ;;  %v1900_v62 = vadd.f32 %v1884_v0, %v1862_v7  ;;  %v1901_v16 = vadd.f32 %v1885_v13, %v1864_v46  ;;  %v1903_v48 = vadd.f32 %v1887_v8, %v1869_v17  ;;  %v1902_v27 = vadd.f32 %v1886_v22, %v1867_v34  ;;  %v1947_v7 = vpop.permute.xlu1 %1946 }
 0x91c   : > { %5280 = vtanh.f32 %v1904_v57  ;;  %v1905_v45 = vmul.f32 0.5, %v1897_v47  ;;  %v1906_v9 = vmul.f32 0.5, %v1898_v60  ;;  %v1907_v15 = vmul.f32 0.5, %v1899_v50 }
 0x91d   : > { %v1908_v36 = vmul.f32 0.5, %v1900_v62  ;;  %v1909_v6 = vmul.f32 0.5, %v1901_v16  ;;  %v1911_v46 = vmul.f32 0.5, %v1903_v48  ;;  %v1910_v18 = vmul.f32 0.5, %v1902_v27 }
 0x91e   : > { %5282 = vtanh.f32 %v1905_v45  ;;  %v2047_v45 = vperm.slane %v6284_v41, 4 }
 0x91f   : > { %5284 = vtanh.f32 %v1906_v9  ;;  %v2054_v9 = vperm.slane %v6284_v41, 5 }
 0x920   : > { %5286 = vtanh.f32 %v1907_v15  ;;  %v1955_v16 = vpop.permute.xlu2 %1954 }
 0x921   : > { %5288 = vtanh.f32 %v1908_v36 }
 0x922   : > { %v5281_v59 = vpop.eup %5280  ;;  %5290 = vtanh.f32 %v1909_v6  ;;  %v1951_v47 = vpop.permute.xlu0 %1950  ;;  %v5106_v6 = vpack.i.bf16 %v2054_v9, %v2047_v45 }
 0x923   : > { %v1920_v32 = vmul.f32 0.5, %v5281_v59  ;;  %5292 = vtanh.f32 %v1911_v46  ;;  %v1953_v60 = vpop.permute.xlu1 %1952 }
 0x924   : > { %v5283_v3 = vpop.eup %5282  ;;  %5294 = vtanh.f32 %v1910_v18  ;;  %v1763_v18 = vrot.slane %v6313_v28, 3 }
 0x925   : > { %v5285_v38 = vpop.eup %5284  ;;  %v1928_v49 = vadd.f32 0.5, %v1920_v32  ;;  %v1921_v29 = vmul.f32 0.5, %v5283_v3 }
 0x926   : > { %v5287_v30 = vpop.eup %5286  ;;  %v1922_v33 = vmul.f32 0.5, %v5285_v38 }
 0x927   : > { %v5289_v37 = vpop.eup %5288  ;;  %v1968_v26 = vmul.f32 %v1945_v61, %v1928_v49  ;;  %v1929_v35 = vadd.f32 0.5, %v1921_v29  ;;  %v1923_v54 = vmul.f32 0.5, %v5287_v30  ;;  %v2061_v61 = vperm.slane %v6284_v41, 6 }
 0x928   : > { %v5291_v14 = vpop.eup %5290  ;;  %v1930_v34 = vadd.f32 0.5, %v1922_v33  ;;  %v1924_v13 = vmul.f32 0.5, %v5289_v37  ;;  %v6342_v38 = vpop.permute.xlu2 %5102  ;;  %v1768_v29 = vperm.slane %v6313_v28, 0  ;;  %v1761_v30 = vrot.slane %v6313_v28, 1 }
 0x929   : > { %1984 = vrot.lane.b32.xlu2 %v1968_v26, %s5627_s12  ;;  %v1969_v4 = vmul.f32 %v1947_v7, %v1929_v35  ;;  %v1925_v44 = vmul.f32 0.5, %v5291_v14  ;;  %v1931_v19 = vadd.f32 0.5, %v1923_v54  ;;  %v5293_v57 = vpop.eup %5292  ;;  %v2068_v7 = vperm.slane %v6284_v41, 7 }
 0x92a   : > { %v1970_v0 = vmul.f32 %v1949_v55, %v1930_v34  ;;  %v1932_v50 = vadd.f32 0.5, %v1924_v13  ;;  %v5295_v51 = vpop.eup %5294  ;;  %v1927_v15 = vmul.f32 0.5, %v5293_v57  ;;  %v1957_v59 = vpop.permute.xlu0 %1956  ;;  %v1784_v33 = vmul.f32 %v5079_v31, %v1768_v29 }
 0x92b   : > { %1986 = vrot.lane.b32.xlu0 %v1969_v4, %s5627_s12  ;;  %v1933_v58 = vadd.f32 0.5, %v1925_v44  ;;  %v1971_v62 = vmul.f32 %v1951_v47, %v1931_v19  ;;  %v1926_v22 = vmul.f32 0.5, %v5295_v51  ;;  %v1959_v27 = vpop.permute.xlu1 %1958  ;;  %v5111_v46 = vpack.i.bf16 %v2068_v7, %v2061_v61 }
 0x92c   : > { %1988 = vrot.lane.b32.xlu1 %v1970_v0, %s5627_s12  ;;  %v1972_v36 = vmul.f32 %v1953_v60, %v1932_v50  ;;  %v1935_v17 = vadd.f32 0.5, %v1927_v15  ;;  %v1762_v37 = vrot.slane %v6313_v28, 2  ;;  %v1771_v41 = vperm.slane %v1763_v18, 0 }
 0x92d   : > { %v1973_v8 = vmul.f32 %v1955_v16, %v1933_v58  ;;  %v1934_v48 = vadd.f32 0.5, %v1926_v22  ;;  %v1769_v35 = vperm.slane %v1761_v30, 0  ;;  %v1765_v0 = vrot.slane %v6313_v28, 5 }
 0x92e   : > { %v1975_v32 = vmul.f32 %v1959_v27, %v1935_v17  ;;  %v1770_v34 = vperm.slane %v1762_v37, 0  ;;  %v1787_v44 = vmul.f32 %v5085_v63, %v1771_v41  ;;  %v1764_v58 = vrot.slane %v6313_v28, 4 }
 0x92f   : > { %v1974_v3 = vmul.f32 %v1957_v59, %v1934_v48  ;;  %v1785_v31 = vmul.f32 %v5080_v2, %v1769_v35  ;;  %v5104_v63 = vunpack.i.l.bf16 %v6342_v38  ;;  %v5105_v51 = vunpack.i.h.bf16 %v6342_v38 }
 0x930   : > { %v1786_v19 = vmul.f32 %v5084_v25, %v1770_v34 }
 0x931   : > { %1990 = vrot.lane.b32.xlu2 %v1971_v62, %s5627_s12  ;;  %v1773_v62 = vperm.slane %v1765_v0, 0 }
 0x932   : > { %v6347_v55 = vpop.permute.xlu0 %5097 }
 0x933   : > { %1994 = vrot.lane.b32.xlu0 %v1973_v8, %s5627_s12  ;;  %v5099_v54 = vunpack.i.l.bf16 %v6347_v55  ;;  %v5100_v57 = vunpack.i.h.bf16 %v6347_v55  ;;  %v1772_v8 = vperm.slane %v1764_v58, 0  ;;  %v1789_v48 = vmul.f32 %v5090_v10, %v1773_v62 }
 0x934   : > { %1992 = vrot.lane.b32.xlu1 %v1972_v36, %s5627_s12 }
 0x935   : > { %v1788_v59 = vmul.f32 %v5089_v20, %v1772_v8 }
 0x939   : > { %5107 = vperm.xlu2 %5054, %v5106_v6  }
 0x93b   : > { %1998 = vrot.lane.b32.xlu0 %v1975_v32, %s5627_s12 }
 0x93c   : > { %1996 = vrot.lane.b32.xlu1 %v1974_v3, %s5627_s12 }
 0x944   : > { %5112 = vperm.xlu1 %5053, %v5111_v46  }
 0x983   : > { %v1985_v49 = vpop.permute.xlu2 %1984 }
 0x984   : > { %v6352_v26 = vadd.f32 %v1985_v49, %v1784_v33 }
 0x986   : > { %v2075_v4 = vmul.f32 %v5099_v54, %v6352_v26 }
 0x988   : > { %v2083_v24 = vsel %vm1134_vm11, %v2075_v4, 0.0 }
 0x989   : > { %v2084_v45 = vrot.slane %v2083_v24, 4 }
 0x98b   : > { %v1991_v14 = vpop.permute.xlu2 %1990  ;;  %v2085_v3 = vadd.f32 %v2084_v45, %v2083_v24 }
 0x98c   : > { %v6367_v47 = vadd.f32 %v1991_v14, %v1787_v44  ;;  %v1767_v44 = vrot.slane %v6313_v28, 7 }
 0x98d   : > { %v2086_v37 = vrot.slane %v2085_v3, 2 }
 0x98e   : > { %v2078_v9 = vmul.f32 %v5105_v51, %v6367_v47  ;;  %v1775_v62 = vperm.slane %v1767_v44, 0 }
 0x990   : > { %v2104_v61 = vsel %vm1134_vm11, %v2078_v9, 0.0 }
 0x991   : > { %v2105_v40 = vrot.slane %v2104_v61, 4 }
 0x993   : > { %v6389_v36 = vpop.permute.xlu2 %5107 }
 0x994   : > { %v5110_v7 = vunpack.i.h.bf16 %v6389_v36  ;;  %v5109_v29 = vunpack.i.l.bf16 %v6389_v36 }
 0x99d   : > { %v1987_v13 = vpop.permute.xlu0 %1986 }
 0x99e   : > { %v6369_v60 = vadd.f32 %v1987_v13, %v1785_v31  ;;  %v1989_v50 = vpop.permute.xlu1 %1988  ;;  %v2106_v31 = vadd.f32 %v2105_v40, %v2104_v61  ;;  %v1766_v13 = vrot.slane %v6313_v28, 6 }
 0x99f   : > { %v6373_v2 = vadd.f32 %v1989_v50, %v1786_v19  ;;  %v2087_v19 = vadd.f32 %v2086_v37, %v2085_v3 }
 0x9a0   : > { %v2076_v1 = vmul.f32 %v5100_v57, %v6369_v60  ;;  %v2280_v25 = vpack.c.bf16 %v6369_v60, %v6352_v26  ;;  %v1774_v45 = vperm.slane %v1766_v13, 0 }
 0x9a1   : > { %v2077_v16 = vmul.f32 %v5104_v63, %v6373_v2  ;;  %v2088_v9 = vrot.slane %v2087_v19, 1 }
 0x9a2   : > { %v2090_v15 = vsel %vm1134_vm11, %v2076_v1, 0.0  ;;  %2288 = vrot.lane.b32.xlu1 %v2280_v25, %s5628_s24 }
 0x9a3   : > { %v2091_v22 = vrot.slane %v2090_v15, 4  ;;  %v2097_v6 = vsel %vm1134_vm11, %v2077_v16, 0.0  ;;  %v2107_v16 = vrot.slane %v2106_v31, 2 }
 0x9a4   : > { %v2098_v17 = vrot.slane %v2097_v6, 4 }
 0x9a5   : > { %v2092_v27 = vadd.f32 %v2091_v22, %v2090_v15  ;;  %v1995_v32 = vpop.permute.xlu0 %1994 }
 0x9a6   : > { %v1993_v46 = vpop.permute.xlu1 %1992  ;;  %v6398_v49 = vadd.f32 %v1995_v32, %v1789_v48  ;;  %v2099_v30 = vadd.f32 %v2098_v17, %v2097_v6  ;;  %v1791_v48 = vmul.f32 %v5095_v23, %v1775_v62  ;;  %v2089_v32 = vadd.f32 %v2088_v9, %v2087_v19 }
 0x9a7   : > { %v6401_v18 = vadd.f32 %v1993_v46, %v1788_v59  ;;  %v2093_v20 = vrot.slane %v2092_v27, 2  ;;  %v1790_v59 = vmul.f32 %v5094_v39, %v1774_v45 }
 0x9a8   : > { %v2080_v10 = vmul.f32 %v5110_v7, %v6398_v49  ;;  %v2100_v34 = vrot.slane %v2099_v30, 2 }
 0x9a9   : > { %v2079_v33 = vmul.f32 %v5109_v29, %v6401_v18  ;;  %v2094_v0 = vadd.f32 %v2093_v20, %v2092_v27  ;;  %v2108_v27 = vadd.f32 %v2107_v16, %v2106_v31 }
 0x9aa   : > { %v2118_v41 = vsel %vm1134_vm11, %v2080_v10, 0.0  ;;  %v2101_v1 = vadd.f32 %v2100_v34, %v2099_v30 }
 0x9ab   : > { %v2111_v35 = vsel %vm1134_vm11, %v2079_v33, 0.0  ;;  %v2119_v14 = vrot.slane %v2118_v41, 4  ;;  %v2095_v8 = vrot.slane %v2094_v0, 1  ;;  %v2109_v23 = vrot.slane %v2108_v27, 1 }
 0x9ac   : > { %v2112_v4 = vrot.slane %v2111_v35, 4  ;;  %v2102_v6 = vrot.slane %v2101_v1, 1 }
 0x9ad   : > { %v2120_v24 = vadd.f32 %v2119_v14, %v2118_v41  ;;  %v1999_v22 = vpop.permute.xlu0 %1998  ;;  %v2096_v28 = vadd.f32 %v2095_v8, %v2094_v0  ;;  %v2139_v41 = vpack.c.bf16 %v2089_v32, %v2089_v32  ;;  %v2110_v13 = vadd.f32 %v2109_v23, %v2108_v27 }
 0x9ae   : > { %v2113_v58 = vadd.f32 %v2112_v4, %v2111_v35  ;;  %v1997_v50 = vpop.permute.xlu1 %1996  ;;  %v6417_v3 = vadd.f32 %v1999_v22, %v1791_v48  ;;  %v2103_v20 = vadd.f32 %v2102_v6, %v2101_v1 }
 0x9af   : > { %v2121_v15 = vrot.slane %v2120_v24, 2  ;;  %v6421_v30 = vadd.f32 %v1997_v50, %v1790_v59  ;;  %v2140_v37 = vpack.c.bf16 %v2096_v28, %v2096_v28  ;;  %v2142_v45 = vpack.c.bf16 %v2110_v13, %v2110_v13 }
 0x9b0   : > { %v2114_v25 = vrot.slane %v2113_v58, 2  ;;  %v2141_v4 = vpack.c.bf16 %v2103_v20, %v2103_v20 }
 0x9b1   : > { %v2122_v46 = vadd.f32 %v2121_v15, %v2120_v24  ;;  %v2156_v19 = vunpack.c.l.b16 %v2140_v37  ;;  %v2155_v24 = vunpack.c.l.b16 %v2139_v41  ;;  %v2158_v59 = vunpack.c.l.b16 %v2142_v45 }
 0x9b2   : > { %v2115_v17 = vadd.f32 %v2114_v25, %v2113_v58  ;;  %v2157_v25 = vunpack.c.l.b16 %v2141_v4 }
 0x9b3   : > { %v2123_v35 = vrot.slane %v2122_v46, 1  ;;  %v2163_v9 = vsel %vm1215_vm12, %v2156_v19, %v2155_v24 }
 0x9b4   : > { %v2116_v33 = vrot.slane %v2115_v17, 1  ;;  %v2164_v27 = vsel %vm1217_vm13, %v2157_v25, %v2163_v9  ;;  %v4868_v25 = vld [vmem:[%s5821_s28 + $0xc] sm:$0xf] }
 0x9b5   : > { %v2124_v1 = vadd.f32 %v2123_v35, %v2122_v46  ;;  %v2165_v46 = vsel %vm1219_vm14, %v2158_v59, %v2164_v27 }
 0x9b6   : > { %v6419_v61 = vpop.permute.xlu1 %5112  ;;  %v2117_v44 = vadd.f32 %v2116_v33, %v2115_v17 }
 0x9b7   : > { %v5115_v10 = vunpack.i.h.bf16 %v6419_v61  ;;  %v5114_v40 = vunpack.i.l.bf16 %v6419_v61  ;;  %v2144_v6 = vpack.c.bf16 %v2124_v1, %v2124_v1 }
 0x9b8   : > { %v2143_v62 = vpack.c.bf16 %v2117_v44, %v2117_v44  ;;  %v2281_v44 = vpack.c.bf16 %v6367_v47, %v6373_v2 }
 0x9b9   : > { %v2081_v12 = vmul.f32 %v5114_v40, %v6421_v30  ;;  %v2082_v39 = vmul.f32 %v5115_v10, %v6417_v3  ;;  %v2160_v33 = vunpack.c.l.b16 %v2144_v6 }
 0x9ba   : > { %v2159_v48 = vunpack.c.l.b16 %v2143_v62  ;;  %v2211_v62 = vunpack.c.l.bf16 %v4868_v25 }
 0x9bb   : > { %v2125_v14 = vsel %vm1134_vm11, %v2081_v12, 0.0  ;;  %v2132_v34 = vsel %vm1134_vm11, %v2082_v39, 0.0 }
 0x9bc   : > { %v2126_v31 = vrot.slane %v2125_v14, 4  ;;  %v2133_v0 = vrot.slane %v2132_v34, 4  ;;  %v2166_v12 = vsel %vm1221_vm15, %v2159_v48, %v2165_v46 }
 0x9bd   : > { %v2167_v35 = vsel %vm1223_vm0, %v2160_v33, %v2166_v12 }
 0x9be   : > { %v2127_v58 = vadd.f32 %v2126_v31, %v2125_v14  ;;  %v2134_v50 = vadd.f32 %v2133_v0, %v2132_v34  ;;  %v2283_v31 = vpack.c.bf16 %v6417_v3, %v6421_v30  ;;  %v4875_v0 = vld [vmem:[%s5816_s17 + $0xc] sm:$0xf] }
 0x9bf   : > { %v6450_v13 = vunpack.c.l.bf16 %v4875_v0 }
 0x9c0   : > { %v2128_v16 = vrot.slane %v2127_v58, 2  ;;  %v2135_v8 = vrot.slane %v2134_v50, 2 }
 0x9c1   : > { %v2498_v19 = vperm.slane %v6450_v13, 2  ;;  %v2484_v6 = vperm.slane %v6450_v13, 0  ;;  %v2491_v48 = vperm.slane %v6450_v13, 1 }
 0x9c2   : > { %v2129_v15 = vadd.f32 %v2128_v16, %v2127_v58  ;;  %v2136_v22 = vadd.f32 %v2135_v8, %v2134_v50  ;;  %v2505_v58 = vperm.slane %v6450_v13, 3 }
 0x9c4   : > { %v2130_v17 = vrot.slane %v2129_v15, 1  ;;  %v2137_v28 = vrot.slane %v2136_v22, 1  ;;  %v5121_v50 = vpack.i.bf16 %v2505_v58, %v2498_v19 }
 0x9c6   : > { %v2131_v32 = vadd.f32 %v2130_v17, %v2129_v15  ;;  %v2138_v20 = vadd.f32 %v2137_v28, %v2136_v22  ;;  %v2282_v22 = vpack.c.bf16 %v6398_v49, %v6401_v18  ;;  %v5116_v17 = vpack.i.bf16 %v2491_v48, %v2484_v6 }
 0x9c8   : > { %v2145_v23 = vpack.c.bf16 %v2131_v32, %v2131_v32  ;;  %v2146_v37 = vpack.c.bf16 %v2138_v20, %v2138_v20 }
 0x9ca   : > { %v2161_v39 = vunpack.c.l.b16 %v2145_v23  ;;  %v2162_v41 = vunpack.c.l.b16 %v2146_v37 }
 0x9cc   : > { %v2168_v14 = vsel %vm1225_vm1, %v2161_v39, %v2167_v35 }
 0x9cd   : > { %v2169_v34 = vsel %vm1227_vm2, %v2162_v41, %v2168_v14 }
 0x9ce   : > { %v2170_v4 = vpack.c.b16 %v2169_v34, %v2169_v34 }
 0x9d0   : > { %2171 = vrot.lane.b32.xlu2 %v2170_v4, %s5628_s24 }
 0x9d8   : > { %2290 = vrot.lane.b32.xlu2 %v2281_v44, %s5628_s24 }
 0x9e0   : > { %2294 = vrot.lane.b32.xlu2 %v2283_v31, %s5628_s24 }
 0x9e8   : > { %2413 = vrot.lane.b32.xlu2 %v6373_v2, %s5628_s24 }
 0x9f0   : > { %2419 = vrot.lane.b32.xlu2 %v6398_v49, %s5628_s24 }
 0x9f8   : > { %5122 = vperm.xlu2 %5054, %v5121_v50  }
 0xa14   : > { %v2289_v24 = vpop.permute.xlu1 %2288 }
 0xa15   : > { %4871 = vmatmul.msk.bf16.vlgmr.msrb.gmra.mxu1 %vm882_vm10, %v2289_v24 }
 0xa16   : > { %4042 = vmatpush.bf16.msrb.mxu1 %v6114_v42 }
 0xa1a   : > { %4043 = vmatpush.bf16.msrb.mxu1 %v6119_v5 }
 0xa2a   : > { %v2172_v2 = vpop.permute.xlu2 %2171 }
 0xa2b   : > { %4866 = vmatmul.msk.bf16.vlgmr.msrb.gmra.mxu3 %vm882_vm10, %v2172_v2 }
 0xa2c   : > { %2647 = vmatpush.bf16.msrb.mxu3 %v6114_v42 }
 0xa30   : > { %2648 = vmatpush.bf16.msrb.mxu3 %v6119_v5 }
 0xa32   : > { %v2291_v1 = vpop.permute.xlu2 %2290 }
 0xa33   : > { %4872 = vmatmul.msk.bf16.gmra.mxu1 %vm882_vm10, %v2291_v1 }
 0xa3a   : > { %v2295_v33 = vpop.permute.xlu2 %2294 }
 0xa92   : > { %v2317_v23 = vpop.f32.mrf.mxu1 }
 0xa9a   : > { %v2319_v37 = vpop.f32.mrf.mxu1 }
 0xaae   : > { %v6464_v16 = vpop.f32.mrf.mxu3 }
 0xaaf   : > { %v2212_v8 = vadd.f32 %v2211_v62, %v6464_v16 }
 0xab0   : > { %v2322_v12 = vpop.f32.mrf.mxu1 }
 0xab1   : > { %5296 = vtanh.f32 %v2212_v8  ;;  %v2214_v28 = vmul.f32 0.5, %v2212_v8 }
 0xab3   : > { %5298 = vtanh.f32 %v2214_v28 }
 0xab6   : > { %v2187_v45 = vpop.f32.mrf.mxu3 }
 0xab7   : > { %v5297_v9 = vpop.eup %5296 }
 0xab8   : > { %v2218_v15 = vadd.f32 1.0, %v5297_v9 }
 0xab9   : > { %v5299_v49 = vpop.eup %5298 }
 0xaba   : > { %2220 = vrot.lane.b32.xlu0 %v2218_v15, %s5627_s12  ;;  %v2216_v27 = vmul.f32 0.5, %v5299_v49 }
 0xabc   : > { %v2217_v59 = vadd.f32 0.5, %v2216_v27 }
 0xac2   : > { %2292 = vrot.lane.b32.xlu0 %v2282_v22, %s5628_s24 }
 0xaca   : > { %2409 = vrot.lane.b32.xlu0 %v6352_v26, %s5628_s24 }
 0xad2   : > { %2415 = vrot.lane.b32.xlu0 %v6367_v47, %s5628_s24 }
 0xada   : > { %2421 = vrot.lane.b32.xlu0 %v6421_v30, %s5628_s24 }
 0xae2   : > { %5117 = vperm.xlu0 %5055, %v5116_v17  }
 0xb2c   : > { %v2221_v32 = vpop.permute.xlu0 %2220 }
 0xb2d   : > { %v2223_v20 = vmul.f32 %v2221_v32, %v2217_v59 }
 0xb2f   : > { %v6479_v26 = vmul.f32 0.5, %v2223_v20 }
 0xb31   : > { %v2257_v47 = vpack.c.bf16 %v6479_v26, %v6479_v26 }
 0xb33   : > { %2262 = vrot.lane.b32.xlu1 %v2257_v47, %s5628_s24 }
 0xb34   : > { %v2293_v30 = vpop.permute.xlu0 %2292 }
 0xb35   : > { %4873 = vmatmul.msk.bf16.gmra.mxu1 %vm882_vm10, %v2293_v30 }
 0xb3b   : > { %2411 = vrot.lane.b32.xlu1 %v6369_v60, %s5628_s24  ;;  %v2324_v60 = vpop.f32.mrf.mxu1 }
 0xb43   : > { %2417 = vrot.lane.b32.xlu1 %v6401_v18, %s5628_s24  ;;  %v4869_v18 = vld [vmem:[%s5796_s15 + $0xc] sm:$0xf] }
 0xb44   : > { %v2260_v35 = vunpack.c.l.bf16 %v4869_v18 }
 0xb45   : > { %4874 = vmatmul.msk.bf16.gmra.mxu1 %vm882_vm10, %v2295_v33 }
 0xb4b   : > { %2423 = vrot.lane.b32.xlu1 %v6417_v3, %s5628_s24 }
 0xba5   : > { %v2263_v46 = vpop.permute.xlu1 %2262 }
 0xba6   : > { %4870 = vmatmul.msk.bf16.vlgmr.msra.gmra.mxu3 %vm882_vm10, %v2263_v46 }
 0xba7   : > { %2779 = vmatpush.bf16.msra.mxu3 %v5908_v52 }
 0xbab   : > { %2780 = vmatpush.bf16.msra.mxu3 %v5920_v56 }
 0xbb2   : > { %v2327_v39 = vpop.f32.mrf.mxu1 }
 0xbba   : > { %v2329_v41 = vpop.f32.mrf.mxu1 }
 0xbc2   : > { %v2332_v4 = vpop.f32.mrf.mxu1 }
 0xbca   : > { %v2334_v33 = vpop.f32.mrf.mxu1 }
 0xc29   : > { %v2276_v14 = vpop.f32.mrf.mxu3 }
 0xc2a   : > { %v2277_v34 = vadd.f32 %v2276_v14, %v2260_v35 }
 0xc2c   : > { %v2345_v44 = vperm.slane %v2277_v34, 0  ;;  %v2338_v3 = vrot.slane %v2277_v34, 1  ;;  %v2339_v31 = vrot.slane %v2277_v34, 2  ;;  %v2340_v0 = vrot.slane %v2277_v34, 3 }
 0xc2d   : > { %v2341_v19 = vrot.slane %v2277_v34, 4  ;;  %v2342_v58 = vrot.slane %v2277_v34, 5  ;;  %v2343_v8 = vrot.slane %v2277_v34, 6  ;;  %v2344_v45 = vrot.slane %v2277_v34, 7 }
 0xc2e   : > { %v2361_v50 = vadd.f32 %v2345_v44, %v2317_v23  ;;  %v2346_v24 = vperm.slane %v2338_v3, 0  ;;  %v2347_v2 = vperm.slane %v2339_v31, 0  ;;  %v2348_v1 = vperm.slane %v2340_v0, 0  ;;  %v2414_v31 = vpop.permute.xlu2 %2413 }
 0xc2f   : > { %v2349_v25 = vperm.slane %v2341_v19, 0  ;;  %v2350_v62 = vperm.slane %v2342_v58, 0  ;;  %v2352_v49 = vperm.slane %v2344_v45, 0  ;;  %v2351_v47 = vperm.slane %v2343_v8, 0 }
 0xc30   : > { %v2369_v9 = vmul.f32 0.5, %v2361_v50  ;;  %v2362_v15 = vadd.f32 %v2346_v24, %v2319_v37  ;;  %v2363_v22 = vadd.f32 %v2347_v2, %v2322_v12  ;;  %v2364_v6 = vadd.f32 %v2348_v1, %v2324_v60 }
 0xc31   : > { %v2278_v48 = vpop.f32.mrf.mxu3  ;;  %v2365_v17 = vadd.f32 %v2349_v25, %v2327_v39  ;;  %v2366_v28 = vadd.f32 %v2350_v62, %v2329_v41  ;;  %v2368_v46 = vadd.f32 %v2352_v49, %v2334_v33  ;;  %v2367_v23 = vadd.f32 %v2351_v47, %v2332_v4  ;;  %v2410_v39 = vpop.permute.xlu0 %2409 }
 0xc32   : > { %5300 = vtanh.f32 %v2369_v9  ;;  %v2370_v27 = vmul.f32 0.5, %v2362_v15  ;;  %v2371_v59 = vmul.f32 0.5, %v2363_v22  ;;  %v2372_v32 = vmul.f32 0.5, %v2364_v6  ;;  %v2412_v41 = vpop.permute.xlu1 %2411 }
 0xc33   : > { %v2373_v20 = vmul.f32 0.5, %v2365_v17  ;;  %v2374_v30 = vmul.f32 0.5, %v2366_v28  ;;  %v2376_v18 = vmul.f32 0.5, %v2368_v46  ;;  %v2375_v44 = vmul.f32 0.5, %v2367_v23 }
 0xc34   : > { %5302 = vtanh.f32 %v2370_v27 }
 0xc35   : > { %5304 = vtanh.f32 %v2371_v59  ;;  %v2512_v59 = vperm.slane %v6450_v13, 4 }
 0xc36   : > { %5306 = vtanh.f32 %v2372_v32  ;;  %v2420_v49 = vpop.permute.xlu2 %2419  ;;  %v2519_v32 = vperm.slane %v6450_v13, 5 }
 0xc37   : > { %5308 = vtanh.f32 %v2373_v20 }
 0xc38   : > { %v5301_v37 = vpop.eup %5300  ;;  %5310 = vtanh.f32 %v2374_v30  ;;  %v5126_v33 = vpack.i.bf16 %v2519_v32, %v2512_v59 }
 0xc39   : > { %v2385_v12 = vmul.f32 0.5, %v5301_v37  ;;  %5312 = vtanh.f32 %v2376_v18  ;;  %v2416_v22 = vpop.permute.xlu0 %2415  ;;  %v2533_v18 = vperm.slane %v6450_v13, 7 }
 0xc3a   : > { %v5303_v60 = vpop.eup %5302  ;;  %5314 = vtanh.f32 %v2375_v44  ;;  %v2418_v6 = vpop.permute.xlu1 %2417  ;;  %v2233_v44 = vperm.slane %v6479_v26, 0 }
 0xc3b   : > { %v5305_v35 = vpop.eup %5304  ;;  %v2393_v14 = vadd.f32 0.5, %v2385_v12  ;;  %v2386_v34 = vmul.f32 0.5, %v5303_v60 }
 0xc3c   : > { %v5307_v3 = vpop.eup %5306  ;;  %v2387_v0 = vmul.f32 0.5, %v5305_v35 }
 0xc3d   : > { %v5309_v19 = vpop.eup %5308  ;;  %v2433_v58 = vmul.f32 %v2410_v39, %v2393_v14  ;;  %v2394_v50 = vadd.f32 0.5, %v2386_v34  ;;  %v2388_v24 = vmul.f32 0.5, %v5307_v3  ;;  %v2228_v3 = vrot.slane %v6479_v26, 3 }
 0xc3e   : > { %v5311_v2 = vpop.eup %5310  ;;  %v2395_v4 = vadd.f32 0.5, %v2387_v0  ;;  %v2389_v8 = vmul.f32 0.5, %v5309_v19  ;;  %v6508_v14 = vpop.permute.xlu2 %5122  ;;  %v2249_v19 = vmul.f32 %v5099_v54, %v2233_v44 }
 0xc3f   : > { %2449 = vrot.lane.b32.xlu2 %v2433_v58, %s5627_s12  ;;  %v2434_v1 = vmul.f32 %v2412_v41, %v2394_v50  ;;  %v2390_v25 = vmul.f32 0.5, %v5311_v2  ;;  %v2396_v45 = vadd.f32 0.5, %v2388_v24  ;;  %v5313_v15 = vpop.eup %5312  ;;  %v2526_v41 = vperm.slane %v6450_v13, 6 }
 0xc40   : > { %v2435_v62 = vmul.f32 %v2414_v31, %v2395_v4  ;;  %v2397_v48 = vadd.f32 0.5, %v2389_v8  ;;  %v5315_v17 = vpop.eup %5314  ;;  %v2392_v20 = vmul.f32 0.5, %v5313_v15  ;;  %v2226_v31 = vrot.slane %v6479_v26, 1 }
 0xc41   : > { %2451 = vrot.lane.b32.xlu0 %v2434_v1, %s5627_s12  ;;  %v2398_v9 = vadd.f32 0.5, %v2390_v25  ;;  %v2436_v28 = vmul.f32 %v2416_v22, %v2396_v45  ;;  %v2391_v30 = vmul.f32 0.5, %v5315_v17  ;;  %v2422_v12 = vpop.permute.xlu0 %2421  ;;  %v5131_v35 = vpack.i.bf16 %v2533_v18, %v2526_v41 }
 0xc42   : > { %2453 = vrot.lane.b32.xlu1 %v2435_v62, %s5627_s12  ;;  %v2437_v47 = vmul.f32 %v2418_v6, %v2397_v48  ;;  %v2400_v46 = vadd.f32 0.5, %v2392_v20  ;;  %v2424_v37 = vpop.permute.xlu1 %2423  ;;  %v2227_v58 = vrot.slane %v6479_v26, 2  ;;  %v2236_v13 = vperm.slane %v2228_v3, 0 }
 0xc43   : > { %v2438_v27 = vmul.f32 %v2420_v49, %v2398_v9  ;;  %v2399_v23 = vadd.f32 0.5, %v2391_v30  ;;  %v2234_v24 = vperm.slane %v2226_v31, 0  ;;  %v2230_v8 = vrot.slane %v6479_v26, 5 }
 0xc44   : > { %v2440_v60 = vmul.f32 %v2424_v37, %v2400_v46  ;;  %v2235_v1 = vperm.slane %v2227_v58, 0  ;;  %v2252_v62 = vmul.f32 %v5105_v51, %v2236_v13  ;;  %v2229_v15 = vrot.slane %v6479_v26, 4 }
 0xc45   : > { %v2439_v39 = vmul.f32 %v2422_v12, %v2399_v23  ;;  %v2250_v54 = vmul.f32 %v5100_v57, %v2234_v24  ;;  %v5124_v51 = vunpack.i.l.bf16 %v6508_v14  ;;  %v2238_v49 = vperm.slane %v2230_v8, 0 }
 0xc46   : > { %v2251_v9 = vmul.f32 %v5104_v63, %v2235_v1  ;;  %v2237_v59 = vperm.slane %v2229_v15, 0  ;;  %v2232_v8 = vrot.slane %v6479_v26, 7  ;;  %v2231_v15 = vrot.slane %v6479_v26, 6 }
 0xc47   : > { %2455 = vrot.lane.b32.xlu2 %v2436_v28, %s5627_s12  ;;  %v5125_v28 = vunpack.i.h.bf16 %v6508_v14  ;;  %v2254_v37 = vmul.f32 %v5110_v7, %v2238_v49 }
 0xc49   : > { %2459 = vrot.lane.b32.xlu0 %v2438_v27, %s5627_s12  ;;  %v6513_v0 = vpop.permute.xlu0 %5117 }
 0xc4a   : > { %2457 = vrot.lane.b32.xlu1 %v2437_v47, %s5627_s12  ;;  %v5119_v2 = vunpack.i.l.bf16 %v6513_v0  ;;  %v5120_v22 = vunpack.i.h.bf16 %v6513_v0 }
 0xc4f   : > { %5127 = vperm.xlu2 %5054, %v5126_v33  }
 0xc51   : > { %2463 = vrot.lane.b32.xlu0 %v2440_v60, %s5627_s12  ;;  %v2253_v60 = vmul.f32 %v5109_v29, %v2237_v59  ;;  %v2240_v59 = vperm.slane %v2232_v8, 0 }
 0xc52   : > { %2461 = vrot.lane.b32.xlu1 %v2439_v39, %s5627_s12 }
 0xc53   : > { %v2256_v26 = vmul.f32 %v5115_v10, %v2240_v59 }
 0xc5a   : > { %5132 = vperm.xlu1 %5053, %v5131_v35  }
 0xc99   : > { %v2450_v34 = vpop.permute.xlu2 %2449 }
 0xc9a   : > { %v6518_v50 = vadd.f32 %v2450_v34, %v2249_v19 }
 0xc9c   : > { %v2540_v25 = vmul.f32 %v5119_v2, %v6518_v50 }
 0xc9e   : > { %v2548_v55 = vsel %vm1134_vm11, %v2540_v25, 0.0 }
 0xc9f   : > { %v2549_v32 = vrot.slane %v2548_v55, 4 }
 0xca1   : > { %v2456_v4 = vpop.permute.xlu2 %2455  ;;  %v2550_v41 = vadd.f32 %v2549_v32, %v2548_v55 }
 0xca2   : > { %v6533_v6 = vadd.f32 %v2456_v4, %v2252_v62 }
 0xca3   : > { %v2551_v24 = vrot.slane %v2550_v41, 2 }
 0xca4   : > { %v2543_v20 = vmul.f32 %v5125_v28, %v6533_v6 }
 0xca6   : > { %v2569_v18 = vsel %vm1134_vm11, %v2543_v20, 0.0 }
 0xca7   : > { %v2570_v36 = vrot.slane %v2569_v18, 4 }
 0xca9   : > { %v6555_v30 = vpop.permute.xlu2 %5127 }
 0xcaa   : > { %v5130_v35 = vunpack.i.h.bf16 %v6555_v30  ;;  %v5129_v3 = vunpack.i.l.bf16 %v6555_v30 }
 0xcb3   : > { %v2452_v45 = vpop.permute.xlu0 %2451 }
 0xcb4   : > { %v6535_v48 = vadd.f32 %v2452_v45, %v2250_v54  ;;  %v2454_v17 = vpop.permute.xlu1 %2453  ;;  %v2571_v45 = vadd.f32 %v2570_v36, %v2569_v18 }
 0xcb5   : > { %v6539_v57 = vadd.f32 %v2454_v17, %v2251_v9  ;;  %v2552_v17 = vadd.f32 %v2551_v24, %v2550_v41 }
 0xcb6   : > { %v2541_v38 = vmul.f32 %v5120_v22, %v6535_v48  ;;  %v2745_v63 = vpack.c.bf16 %v6535_v48, %v6518_v50  ;;  %v2572_v32 = vrot.slane %v2571_v45, 2 }
 0xcb7   : > { %v2542_v27 = vmul.f32 %v5124_v51, %v6539_v57 }
 0xcb8   : > { %v2555_v47 = vsel %vm1134_vm11, %v2541_v38, 0.0  ;;  %2753 = vrot.lane.b32.xlu0 %v2745_v63, %s5628_s24 }
 0xcb9   : > { %v2556_v33 = vrot.slane %v2555_v47, 4  ;;  %v2562_v46 = vsel %vm1134_vm11, %v2542_v27, 0.0 }
 0xcba   : > { %v2563_v23 = vrot.slane %v2562_v46, 4 }
 0xcbb   : > { %v2557_v12 = vadd.f32 %v2556_v33, %v2555_v47  ;;  %v2460_v39 = vpop.permute.xlu0 %2459  ;;  %v2239_v47 = vperm.slane %v2231_v15, 0  ;;  %v2553_v33 = vrot.slane %v2552_v17, 1  ;;  %v4885_v15 = vld [vmem:[%s5816_s17 + $0x10] sm:$0xf] }
 0xcbc   : > { %v2458_v34 = vpop.permute.xlu1 %2457  ;;  %v6564_v44 = vadd.f32 %v2460_v39, %v2254_v37  ;;  %v2564_v19 = vadd.f32 %v2563_v23, %v2562_v46  ;;  %v6607_v59 = vunpack.c.l.bf16 %v4885_v15 }
 0xcbd   : > { %v6567_v31 = vadd.f32 %v2458_v34, %v2253_v60  ;;  %v2558_v29 = vrot.slane %v2557_v12, 2  ;;  %v2573_v60 = vadd.f32 %v2572_v32, %v2571_v45  ;;  %v2255_v41 = vmul.f32 %v5114_v40, %v2239_v47 }
 0xcbe   : > { %v2545_v7 = vmul.f32 %v5130_v35, %v6564_v44  ;;  %v2565_v62 = vrot.slane %v2564_v19, 2  ;;  %v2554_v18 = vadd.f32 %v2553_v33, %v2552_v17 }
 0xcbf   : > { %v2544_v58 = vmul.f32 %v5129_v3, %v6567_v31  ;;  %v2747_v13 = vpack.c.bf16 %v6564_v44, %v6567_v31  ;;  %v2559_v9 = vadd.f32 %v2558_v29, %v2557_v12 }
 0xcc0   : > { %v2583_v4 = vsel %vm1134_vm11, %v2545_v7, 0.0  ;;  %v2566_v49 = vadd.f32 %v2565_v62, %v2564_v19 }
 0xcc1   : > { %v2576_v1 = vsel %vm1134_vm11, %v2544_v58, 0.0  ;;  %v2584_v25 = vrot.slane %v2583_v4, 4  ;;  %2757 = vrot.lane.b32.xlu0 %v2747_v13, %s5628_s24  ;;  %v2560_v20 = vrot.slane %v2559_v9, 1  ;;  %v2574_v13 = vrot.slane %v2573_v60, 1 }
 0xcc2   : > { %v2577_v54 = vrot.slane %v2576_v1, 4  ;;  %v2567_v37 = vrot.slane %v2566_v49, 1 }
 0xcc3   : > { %v2585_v63 = vadd.f32 %v2584_v25, %v2583_v4  ;;  %v2464_v23 = vpop.permute.xlu0 %2463  ;;  %v2561_v39 = vadd.f32 %v2560_v20, %v2559_v9  ;;  %v2604_v4 = vpack.c.bf16 %v2554_v18, %v2554_v18  ;;  %v2575_v17 = vadd.f32 %v2574_v13, %v2573_v60 }
 0xcc4   : > { %v2578_v55 = vadd.f32 %v2577_v54, %v2576_v1  ;;  %v2462_v38 = vpop.permute.xlu1 %2461  ;;  %v6588_v34 = vadd.f32 %v2464_v23, %v2256_v26  ;;  %v2568_v58 = vadd.f32 %v2567_v37, %v2566_v49  ;;  %v2949_v60 = vperm.slane %v6607_v59, 0 }
 0xcc5   : > { %v2586_v46 = vrot.slane %v2585_v63, 2  ;;  %v6592_v36 = vadd.f32 %v2462_v38, %v2255_v41  ;;  %v2605_v24 = vpack.c.bf16 %v2561_v39, %v2561_v39  ;;  %v2620_v49 = vunpack.c.l.b16 %v2604_v4 }
 0xcc6   : > { %v2579_v27 = vrot.slane %v2578_v55, 2  ;;  %v2606_v54 = vpack.c.bf16 %v2568_v58, %v2568_v58  ;;  %v2956_v39 = vperm.slane %v6607_v59, 1 }
 0xcc7   : > { %v2587_v7 = vadd.f32 %v2586_v46, %v2585_v63  ;;  %v2607_v46 = vpack.c.bf16 %v2575_v17, %v2575_v17 }
 0xcc8   : > { %v2580_v12 = vadd.f32 %v2579_v27, %v2578_v55  ;;  %v2621_v55 = vunpack.c.l.b16 %v2605_v24  ;;  %v2622_v32 = vunpack.c.l.b16 %v2606_v54 }
 0xcc9   : > { %2874 = vrot.lane.b32.xlu0 %v6518_v50, %s5628_s24  ;;  %v2588_v1 = vrot.slane %v2587_v7, 1 }
 0xcca   : > { %v2581_v10 = vrot.slane %v2580_v12, 1  ;;  %v2628_v23 = vsel %vm1215_vm12, %v2621_v55, %v2620_v49  ;;  %v2746_v55 = vpack.c.bf16 %v6533_v6, %v6539_v57 }
 0xccb   : > { %v2589_v27 = vadd.f32 %v2588_v1, %v2587_v7  ;;  %v2629_v58 = vsel %vm1217_vm13, %v2622_v32, %v2628_v23 }
 0xccc   : > { %v6590_v19 = vpop.permute.xlu1 %5132  ;;  %v2582_v8 = vadd.f32 %v2581_v10, %v2580_v12  ;;  %v2623_v10 = vunpack.c.l.b16 %v2607_v46 }
 0xccd   : > { %v5135_v50 = vunpack.i.h.bf16 %v6590_v19  ;;  %v5134_v29 = vunpack.i.l.bf16 %v6590_v19  ;;  %v2609_v26 = vpack.c.bf16 %v2589_v27, %v2589_v27  ;;  %v4878_v27 = vld [vmem:[%s5821_s28 + $0x10] sm:$0xf] }
 0xcce   : > { %v2608_v20 = vpack.c.bf16 %v2582_v8, %v2582_v8  ;;  %v2630_v4 = vsel %vm1219_vm14, %v2623_v10, %v2629_v58  ;;  %v2676_v32 = vunpack.c.l.bf16 %v4878_v27 }
 0xccf   : > { %v2546_v61 = vmul.f32 %v5134_v29, %v6592_v36  ;;  %v2547_v40 = vmul.f32 %v5135_v50, %v6588_v34 }
 0xcd0   : > { %v2624_v41 = vunpack.c.l.b16 %v2608_v20 }
 0xcd1   : > { %v2590_v25 = vsel %vm1134_vm11, %v2546_v61, 0.0  ;;  %v2597_v62 = vsel %vm1134_vm11, %v2547_v40, 0.0  ;;  %2880 = vrot.lane.b32.xlu0 %v6533_v6, %s5628_s24  ;;  %v2625_v61 = vunpack.c.l.b16 %v2609_v26  ;;  %v5136_v40 = vpack.i.bf16 %v2956_v39, %v2949_v60 }
 0xcd2   : > { %v2591_v45 = vrot.slane %v2590_v25, 4  ;;  %v2598_v9 = vrot.slane %v2597_v62, 4 }
 0xcd4   : > { %v2592_v38 = vadd.f32 %v2591_v45, %v2590_v25  ;;  %v2599_v63 = vadd.f32 %v2598_v9, %v2597_v62  ;;  %v2631_v62 = vsel %vm1221_vm15, %v2624_v41, %v2630_v4 }
 0xcd5   : > { %v2632_v45 = vsel %vm1223_vm0, %v2625_v61, %v2631_v62 }
 0xcd6   : > { %v2593_v47 = vrot.slane %v2592_v38, 2  ;;  %v2600_v33 = vrot.slane %v2599_v63, 2 }
 0xcd8   : > { %v2594_v37 = vadd.f32 %v2593_v47, %v2592_v38  ;;  %v2601_v12 = vadd.f32 %v2600_v33, %v2599_v63 }
 0xcd9   : > { %2886 = vrot.lane.b32.xlu0 %v6592_v36, %s5628_s24 }
 0xcda   : > { %v2595_v18 = vrot.slane %v2594_v37, 1  ;;  %v2602_v7 = vrot.slane %v2601_v12, 1 }
 0xcdc   : > { %v2596_v13 = vadd.f32 %v2595_v18, %v2594_v37  ;;  %v2603_v24 = vadd.f32 %v2602_v7, %v2601_v12 }
 0xcde   : > { %v2610_v1 = vpack.c.bf16 %v2596_v13, %v2596_v13  ;;  %v2611_v25 = vpack.c.bf16 %v2603_v24, %v2603_v24 }
 0xce0   : > { %v2626_v54 = vunpack.c.l.b16 %v2610_v1  ;;  %v2627_v8 = vunpack.c.l.b16 %v2611_v25 }
 0xce1   : > { %5137 = vperm.xlu0 %5055, %v5136_v40  }
 0xce2   : > { %v2633_v9 = vsel %vm1225_vm1, %v2626_v54, %v2632_v45 }
 0xce3   : > { %v2634_v15 = vsel %vm1227_vm2, %v2627_v8, %v2633_v9 }
 0xce4   : > { %v2635_v17 = vpack.c.b16 %v2634_v15, %v2634_v15 }
 0xce6   : > { %2636 = vrot.lane.b32.xlu2 %v2635_v17, %s5628_s24 }
 0xcee   : > { %2755 = vrot.lane.b32.xlu2 %v2746_v55, %s5628_s24 }
 0xd2a   : > { %v2754_v63 = vpop.permute.xlu0 %2753 }
 0xd33   : > { %v2758_v6 = vpop.permute.xlu0 %2757 }
 0xd40   : > { %v2637_v38 = vpop.permute.xlu2 %2636 }
 0xd41   : > { %4876 = vmatmul.msk.bf16.vlgmr.msrb.gmra.mxu3 %vm882_vm10, %v2637_v38 }
 0xd42   : > { %4133 = vmatpush.bf16.msrb.mxu3 %v5912_v53 }
 0xd46   : > { %4134 = vmatpush.bf16.msrb.mxu3 %v5931_v11 }
 0xd48   : > { %v2756_v49 = vpop.permute.xlu2 %2755 }
 0xd51   : > { %4881 = vmatmul.msk.bf16.vlgmr.msra.gmra.mxu3 %vm882_vm10, %v2754_v63 }
 0xd52   : > { %4507 = vmatpush.bf16.msra.mxu3 %v6114_v42  ;;  %v2748_v42 = vpack.c.bf16 %v6588_v34, %v6592_v36 }
 0xd56   : > { %4508 = vmatpush.bf16.msra.mxu3 %v6119_v5 }
 0xd61   : > { %4882 = vmatmul.msk.bf16.gmra.mxu3 %vm882_vm10, %v2756_v49 }
 0xd71   : > { %4883 = vmatmul.msk.bf16.gmra.mxu3 %vm882_vm10, %v2758_v6 }
 0xdc4   : > { %v6633_v20 = vpop.f32.mrf.mxu3 }
 0xdc5   : > { %v2677_v53 = vadd.f32 %v2676_v32, %v6633_v20 }
 0xdc7   : > { %5316 = vtanh.f32 %v2677_v53  ;;  %v2679_v5 = vmul.f32 0.5, %v2677_v53 }
 0xdc9   : > { %5318 = vtanh.f32 %v2679_v5 }
 0xdcc   : > { %v2652_v11 = vpop.f32.mrf.mxu3 }
 0xdcd   : > { %v5317_v47 = vpop.eup %5316 }
 0xdce   : > { %v2683_v33 = vadd.f32 1.0, %v5317_v47 }
 0xdcf   : > { %v5319_v46 = vpop.eup %5318 }
 0xdd0   : > { %2685 = vrot.lane.b32.xlu1 %v2683_v33, %s5627_s12  ;;  %v2681_v23 = vmul.f32 0.5, %v5319_v46 }
 0xdd2   : > { %v2682_v37 = vadd.f32 0.5, %v2681_v23 }
 0xdd4   : > { %v2782_v18 = vpop.f32.mrf.mxu3 }
 0xdd8   : > { %2759 = vrot.lane.b32.xlu1 %v2748_v42, %s5628_s24 }
 0xddc   : > { %v2784_v7 = vpop.f32.mrf.mxu3 }
 0xde0   : > { %2876 = vrot.lane.b32.xlu1 %v6535_v48, %s5628_s24 }
 0xde8   : > { %2882 = vrot.lane.b32.xlu1 %v6567_v31, %s5628_s24  ;;  %v2963_v31 = vperm.slane %v6607_v59, 2 }
 0xdf0   : > { %2888 = vrot.lane.b32.xlu1 %v6588_v34, %s5628_s24  ;;  %v2970_v34 = vperm.slane %v6607_v59, 3 }
 0xdf2   : > { %v5141_v39 = vpack.i.bf16 %v2970_v34, %v2963_v31 }
 0xe42   : > { %v2686_v12 = vpop.permute.xlu1 %2685 }
 0xe43   : > { %v2688_v26 = vmul.f32 %v2686_v12, %v2682_v37 }
 0xe45   : > { %v6646_v60 = vmul.f32 0.5, %v2688_v26 }
 0xe47   : > { %v2722_v36 = vpack.c.bf16 %v6646_v60, %v6646_v60 }
 0xe49   : > { %2727 = vrot.lane.b32.xlu2 %v2722_v36, %s5628_s24 }
 0xe4a   : > { %v2760_v48 = vpop.permute.xlu1 %2759 }
 0xe4b   : > { %4884 = vmatmul.msk.bf16.gmra.mxu3 %vm882_vm10, %v2760_v48 }
 0xe51   : > { %2878 = vrot.lane.b32.xlu2 %v6539_v57, %s5628_s24  ;;  %v2787_v57 = vpop.f32.mrf.mxu3 }
 0xe59   : > { %2884 = vrot.lane.b32.xlu2 %v6564_v44, %s5628_s24  ;;  %v2789_v58 = vpop.f32.mrf.mxu3  ;;  %v4879_v44 = vld [vmem:[%s5796_s15 + $0x10] sm:$0xf] }
 0xe5a   : > { %v2725_v24 = vunpack.c.l.bf16 %v4879_v44 }
 0xe61   : > { %5142 = vperm.xlu2 %5054, %v5141_v39   ;;  %v2792_v10 = vpop.f32.mrf.mxu3 }
 0xe69   : > { %v2794_v13 = vpop.f32.mrf.mxu3 }
 0xea3   : > { %v2728_v41 = vpop.permute.xlu2 %2727 }
 0xea4   : > { %4880 = vmatmul.msk.bf16.vlgmr.msra.gmra.mxu0 %vm882_vm10, %v2728_v41 }
 0xea5   : > { %3244 = vmatpush.bf16.msra.mxu0 %v5908_v52 }
 0xea9   : > { %3245 = vmatpush.bf16.msra.mxu0 %v5920_v56 }
 0xece   : > { %v2797_v4 = vpop.f32.mrf.mxu3 }
 0xed6   : > { %v2799_v48 = vpop.f32.mrf.mxu3 }
 0xf21   : > { %v2741_v61 = vpop.f32.mrf.mxu0 }
 0xf22   : > { %v2742_v40 = vadd.f32 %v2741_v61, %v2725_v24 }
 0xf24   : > { %v2810_v1 = vperm.slane %v2742_v40, 0  ;;  %v2803_v25 = vrot.slane %v2742_v40, 1  ;;  %v2804_v62 = vrot.slane %v2742_v40, 2  ;;  %v2805_v54 = vrot.slane %v2742_v40, 3 }
 0xf25   : > { %v2806_v8 = vrot.slane %v2742_v40, 4  ;;  %v2807_v45 = vrot.slane %v2742_v40, 5  ;;  %v2808_v49 = vrot.slane %v2742_v40, 6  ;;  %v2809_v6 = vrot.slane %v2742_v40, 7  ;;  %v2879_v40 = vpop.permute.xlu2 %2878 }
 0xf26   : > { %v2826_v9 = vadd.f32 %v2810_v1, %v2782_v18  ;;  %v2811_v15 = vperm.slane %v2803_v25, 0  ;;  %v2812_v17 = vperm.slane %v2804_v62, 0  ;;  %v2813_v55 = vperm.slane %v2805_v54, 0 }
 0xf27   : > { %v2814_v38 = vperm.slane %v2806_v8, 0  ;;  %v2815_v63 = vperm.slane %v2807_v45, 0  ;;  %v2817_v5 = vperm.slane %v2809_v6, 0  ;;  %v2816_v26 = vperm.slane %v2808_v49, 0 }
 0xf28   : > { %v2834_v27 = vmul.f32 0.5, %v2826_v9  ;;  %v2827_v32 = vadd.f32 %v2811_v15, %v2784_v7  ;;  %v2828_v53 = vadd.f32 %v2812_v17, %v2787_v57  ;;  %v2829_v11 = vadd.f32 %v2813_v55, %v2789_v58  ;;  %v2875_v7 = vpop.permute.xlu0 %2874  ;;  %v2877_v57 = vpop.permute.xlu1 %2876 }
 0xf29   : > { %v2743_v47 = vpop.f32.mrf.mxu0  ;;  %v2830_v33 = vadd.f32 %v2814_v38, %v2792_v10  ;;  %v2831_v42 = vadd.f32 %v2815_v63, %v2794_v13  ;;  %v2833_v31 = vadd.f32 %v2817_v5, %v2799_v48  ;;  %v2832_v34 = vadd.f32 %v2816_v26, %v2797_v4 }
 0xf2a   : > { %5320 = vtanh.f32 %v2834_v27  ;;  %v2835_v46 = vmul.f32 0.5, %v2827_v32  ;;  %v2836_v23 = vmul.f32 0.5, %v2828_v53  ;;  %v2837_v37 = vmul.f32 0.5, %v2829_v11 }
 0xf2b   : > { %v2838_v12 = vmul.f32 0.5, %v2830_v33  ;;  %v2839_v36 = vmul.f32 0.5, %v2831_v42  ;;  %v2841_v58 = vmul.f32 0.5, %v2833_v31  ;;  %v2840_v24 = vmul.f32 0.5, %v2832_v34 }
 0xf2c   : > { %5322 = vtanh.f32 %v2835_v46  ;;  %v2977_v42 = vperm.slane %v6607_v59, 4  ;;  %v2984_v5 = vperm.slane %v6607_v59, 5 }
 0xf2d   : > { %5324 = vtanh.f32 %v2836_v23  ;;  %v2885_v47 = vpop.permute.xlu2 %2884 }
 0xf2e   : > { %5326 = vtanh.f32 %v2837_v37 }
 0xf2f   : > { %5328 = vtanh.f32 %v2838_v12  ;;  %v5146_v12 = vpack.i.bf16 %v2984_v5, %v2977_v42 }
 0xf30   : > { %v5321_v39 = vpop.eup %5320  ;;  %5330 = vtanh.f32 %v2839_v36  ;;  %v2881_v6 = vpop.permute.xlu0 %2880 }
 0xf31   : > { %v2850_v41 = vmul.f32 0.5, %v5321_v39  ;;  %5332 = vtanh.f32 %v2841_v58  ;;  %v2883_v27 = vpop.permute.xlu1 %2882 }
 0xf32   : > { %v5323_v18 = vpop.eup %5322  ;;  %5334 = vtanh.f32 %v2840_v24 }
 0xf33   : > { %v5325_v10 = vpop.eup %5324  ;;  %v2858_v13 = vadd.f32 0.5, %v2850_v41  ;;  %v2851_v44 = vmul.f32 0.5, %v5323_v18  ;;  %v2991_v41 = vperm.slane %v6607_v59, 6  ;;  %v2998_v18 = vperm.slane %v6607_v59, 7 }
 0xf34   : > { %v5327_v61 = vpop.eup %5326  ;;  %v2852_v1 = vmul.f32 0.5, %v5325_v10  ;;  %v2698_v10 = vperm.slane %v6646_v60, 0 }
 0xf35   : > { %v5329_v25 = vpop.eup %5328  ;;  %v2898_v62 = vmul.f32 %v2875_v7, %v2858_v13  ;;  %v2859_v54 = vadd.f32 0.5, %v2851_v44  ;;  %v2853_v8 = vmul.f32 0.5, %v5327_v61  ;;  %v5151_v7 = vpack.i.bf16 %v2998_v18, %v2991_v41 }
 0xf36   : > { %v5331_v45 = vpop.eup %5330  ;;  %v2860_v4 = vadd.f32 0.5, %v2852_v1  ;;  %v2854_v55 = vmul.f32 0.5, %v5329_v25  ;;  %v2693_v13 = vrot.slane %v6646_v60, 3  ;;  %v2691_v44 = vrot.slane %v6646_v60, 1 }
 0xf37   : > { %2914 = vrot.lane.b32.xlu2 %v2898_v62, %s5627_s12  ;;  %v2899_v9 = vmul.f32 %v2877_v57, %v2859_v54  ;;  %v2855_v15 = vmul.f32 0.5, %v5331_v45  ;;  %v2861_v38 = vadd.f32 0.5, %v2853_v8  ;;  %v5333_v49 = vpop.eup %5332  ;;  %v6674_v57 = vpop.permute.xlu2 %5142  ;;  %v2714_v61 = vmul.f32 %v5119_v2, %v2698_v10 }
 0xf38   : > { %v2900_v17 = vmul.f32 %v2879_v40, %v2860_v4  ;;  %v2862_v32 = vadd.f32 0.5, %v2854_v55  ;;  %v5335_v53 = vpop.eup %5334  ;;  %v2857_v46 = vmul.f32 0.5, %v5333_v49  ;;  %v2887_v31 = vpop.permute.xlu0 %2886  ;;  %v2692_v40 = vrot.slane %v6646_v60, 2 }
 0xf39   : > { %2916 = vrot.lane.b32.xlu0 %v2899_v9, %s5627_s12  ;;  %v2863_v63 = vadd.f32 0.5, %v2855_v15  ;;  %v2901_v11 = vmul.f32 %v2881_v6, %v2861_v38  ;;  %v2856_v37 = vmul.f32 0.5, %v5335_v53  ;;  %v2889_v48 = vpop.permute.xlu1 %2888  ;;  %v2701_v59 = vperm.slane %v2693_v13, 0 }
 0xf3a   : > { %2918 = vrot.lane.b32.xlu1 %v2900_v17, %s5627_s12  ;;  %v2902_v23 = vmul.f32 %v2883_v27, %v2862_v32  ;;  %v2865_v26 = vadd.f32 0.5, %v2857_v46  ;;  %v2699_v25 = vperm.slane %v2691_v44, 0  ;;  %v2700_v8 = vperm.slane %v2692_v40, 0 }
 0xf3b   : > { %v2903_v33 = vmul.f32 %v2885_v47, %v2863_v63  ;;  %v2864_v36 = vadd.f32 0.5, %v2856_v37  ;;  %v2717_v4 = vmul.f32 %v5125_v28, %v2701_v59  ;;  %v2695_v9 = vrot.slane %v6646_v60, 5 }
 0xf3c   : > { %v2905_v34 = vmul.f32 %v2889_v48, %v2865_v26  ;;  %v2715_v2 = vmul.f32 %v5120_v22, %v2699_v25  ;;  %v2716_v17 = vmul.f32 %v5124_v51, %v2700_v8  ;;  %v2694_v55 = vrot.slane %v6646_v60, 4 }
 0xf3d   : > { %v2904_v39 = vmul.f32 %v2887_v31, %v2864_v36  ;;  %v5144_v28 = vunpack.i.l.bf16 %v6674_v57  ;;  %v5145_v27 = vunpack.i.h.bf16 %v6674_v57  ;;  %v2703_v32 = vperm.slane %v2695_v9, 0 }
 0xf3e   : > { %v2697_v8 = vrot.slane %v6646_v60, 7 }
 0xf3f   : > { %2920 = vrot.lane.b32.xlu2 %v2901_v11, %s5627_s12  ;;  %v2702_v11 = vperm.slane %v2694_v55, 0 }
 0xf40   : > { %v6679_v24 = vpop.permute.xlu0 %5137 }
 0xf41   : > { %2924 = vrot.lane.b32.xlu0 %v2903_v33, %s5627_s12  ;;  %v5139_v62 = vunpack.i.l.bf16 %v6679_v24  ;;  %v5140_v38 = vunpack.i.h.bf16 %v6679_v24  ;;  %v2718_v36 = vmul.f32 %v5129_v3, %v2702_v11 }
 0xf42   : > { %2922 = vrot.lane.b32.xlu1 %v2902_v23, %s5627_s12 }
 0xf47   : > { %5147 = vperm.xlu2 %5054, %v5146_v12   ;;  %v2719_v12 = vmul.f32 %v5130_v35, %v2703_v32 }
 0xf49   : > { %2928 = vrot.lane.b32.xlu0 %v2905_v34, %s5627_s12 }
 0xf4a   : > { %2926 = vrot.lane.b32.xlu1 %v2904_v39, %s5627_s12 }
 0xf52   : > { %5152 = vperm.xlu1 %5053, %v5151_v7  }
 0xf91   : > { %v2915_v58 = vpop.permute.xlu2 %2914 }
 0xf92   : > { %v6684_v1 = vadd.f32 %v2915_v58, %v2714_v61 }
 0xf94   : > { %v3005_v45 = vmul.f32 %v5139_v62, %v6684_v1 }
 0xf96   : > { %v3013_v0 = vsel %vm1134_vm11, %v3005_v45, 0.0 }
 0xf97   : > { %v3014_v47 = vrot.slane %v3013_v0, 4 }
 0xf99   : > { %v2921_v54 = vpop.permute.xlu2 %2920  ;;  %v3015_v31 = vadd.f32 %v3014_v47, %v3013_v0 }
 0xf9a   : > { %v6699_v63 = vadd.f32 %v2921_v54, %v2717_v4 }
 0xf9b   : > { %v3016_v44 = vrot.slane %v3015_v31, 2 }
 0xf9c   : > { %v3008_v33 = vmul.f32 %v5145_v27, %v6699_v63 }
 0xf9d   : > { %v3017_v9 = vadd.f32 %v3016_v44, %v3015_v31 }
 0xf9e   : > { %v3034_v34 = vsel %vm1134_vm11, %v3008_v33, 0.0 }
 0xf9f   : > { %v3035_v30 = vrot.slane %v3034_v34, 4  ;;  %v3018_v11 = vrot.slane %v3017_v9, 1 }
 0xfa1   : > { %v6721_v5 = vpop.permute.xlu2 %5147  ;;  %v3036_v45 = vadd.f32 %v3035_v30, %v3034_v34 }
 0xfa2   : > { %v5150_v39 = vunpack.i.h.bf16 %v6721_v5  ;;  %v5149_v7 = vunpack.i.l.bf16 %v6721_v5 }
 0xfab   : > { %v2917_v15 = vpop.permute.xlu0 %2916 }
 0xfac   : > { %v6701_v49 = vadd.f32 %v2917_v15, %v2715_v2  ;;  %v2919_v6 = vpop.permute.xlu1 %2918  ;;  %v2696_v2 = vrot.slane %v6646_v60, 6 }
 0xfad   : > { %v6705_v22 = vadd.f32 %v2919_v6, %v2716_v17 }
 0xfae   : > { %v3006_v14 = vmul.f32 %v5140_v38, %v6701_v49  ;;  %v3210_v51 = vpack.c.bf16 %v6701_v49, %v6684_v1 }
 0xfaf   : > { %v3007_v53 = vmul.f32 %v5144_v28, %v6705_v22 }
 0xfb0   : > { %v3020_v42 = vsel %vm1134_vm11, %v3006_v14, 0.0  ;;  %3218 = vrot.lane.b32.xlu1 %v3210_v51, %s5628_s24  ;;  %v2705_v14 = vperm.slane %v2697_v8, 0  ;;  %v3037_v51 = vrot.slane %v3036_v45, 2 }
 0xfb1   : > { %v3021_v46 = vrot.slane %v3020_v42, 4  ;;  %v3027_v23 = vsel %vm1134_vm11, %v3007_v53, 0.0  ;;  %v2704_v53 = vperm.slane %v2696_v2, 0 }
 0xfb2   : > { %v3028_v37 = vrot.slane %v3027_v23, 4 }
 0xfb3   : > { %v3022_v26 = vadd.f32 %v3021_v46, %v3020_v42  ;;  %v2925_v48 = vpop.permute.xlu0 %2924 }
 0xfb4   : > { %v2923_v41 = vpop.permute.xlu1 %2922  ;;  %v6730_v18 = vadd.f32 %v2925_v48, %v2719_v12  ;;  %v3029_v10 = vadd.f32 %v3028_v37, %v3027_v23  ;;  %v2721_v23 = vmul.f32 %v5135_v50, %v2705_v14  ;;  %v3038_v37 = vadd.f32 %v3037_v51, %v3036_v45 }
 0xfb5   : > { %v6733_v58 = vadd.f32 %v2923_v41, %v2718_v36  ;;  %v3023_v3 = vrot.slane %v3022_v26, 2  ;;  %v2720_v12 = vmul.f32 %v5134_v29, %v2704_v53 }
 0xfb6   : > { %v3010_v35 = vmul.f32 %v5150_v39, %v6730_v18  ;;  %v3030_v25 = vrot.slane %v3029_v10, 2  ;;  %v3039_v50 = vrot.slane %v3038_v37, 1 }
 0xfb7   : > { %v3009_v13 = vmul.f32 %v5149_v7, %v6733_v58  ;;  %v3024_v4 = vadd.f32 %v3023_v3, %v3022_v26  ;;  %v3019_v26 = vadd.f32 %v3018_v11, %v3017_v9 }
 0xfb8   : > { %v3048_v61 = vsel %vm1134_vm11, %v3010_v35, 0.0  ;;  %v3031_v6 = vadd.f32 %v3030_v25, %v3029_v10  ;;  %v3040_v45 = vadd.f32 %v3039_v50, %v3038_v37 }
 0xfb9   : > { %v3041_v40 = vsel %vm1134_vm11, %v3009_v13, 0.0  ;;  %v3049_v59 = vrot.slane %v3048_v61, 4  ;;  %v3025_v32 = vrot.slane %v3024_v4, 1  ;;  %v3069_v13 = vpack.c.bf16 %v3019_v26, %v3019_v26 }
 0xfba   : > { %v3042_v54 = vrot.slane %v3041_v40, 4  ;;  %v3032_v42 = vrot.slane %v3031_v6, 1  ;;  %v3072_v51 = vpack.c.bf16 %v3040_v45, %v3040_v45 }
 0xfbb   : > { %v3050_v55 = vadd.f32 %v3049_v59, %v3048_v61  ;;  %v2929_v33 = vpop.permute.xlu0 %2928  ;;  %v3026_v60 = vadd.f32 %v3025_v32, %v3024_v4 }
 0xfbc   : > { %v3043_v15 = vadd.f32 %v3042_v54, %v3041_v40  ;;  %v2927_v17 = vpop.permute.xlu1 %2926  ;;  %v6749_v36 = vadd.f32 %v2929_v33, %v2721_v23  ;;  %v3033_v35 = vadd.f32 %v3032_v42, %v3031_v6  ;;  %v3088_v37 = vunpack.c.l.b16 %v3072_v51 }
 0xfbd   : > { %v3051_v47 = vrot.slane %v3050_v55, 2  ;;  %v6753_v34 = vadd.f32 %v2927_v17, %v2720_v12  ;;  %v3070_v3 = vpack.c.bf16 %v3026_v60, %v3026_v60 }
 0xfbe   : > { %v3044_v0 = vrot.slane %v3043_v15, 2  ;;  %v3071_v59 = vpack.c.bf16 %v3033_v35, %v3033_v35 }
 0xfbf   : > { %v3052_v31 = vadd.f32 %v3051_v47, %v3050_v55  ;;  %v3086_v4 = vunpack.c.l.b16 %v3070_v3 }
 0xfc0   : > { %v3045_v46 = vadd.f32 %v3044_v0, %v3043_v15  ;;  %v3085_v15 = vunpack.c.l.b16 %v3069_v13  ;;  %v3087_v55 = vunpack.c.l.b16 %v3071_v59  ;;  %v3213_v59 = vpack.c.bf16 %v6749_v36, %v6753_v34 }
 0xfc1   : > { %v3053_v44 = vrot.slane %v3052_v31, 1 }
 0xfc2   : > { %v3046_v30 = vrot.slane %v3045_v46, 1  ;;  %v3093_v32 = vsel %vm1215_vm12, %v3086_v4, %v3085_v15 }
 0xfc3   : > { %v3054_v17 = vadd.f32 %v3053_v44, %v3052_v31  ;;  %v3094_v23 = vsel %vm1217_vm13, %v3087_v55, %v3093_v32  ;;  %v3212_v32 = vpack.c.bf16 %v6730_v18, %v6733_v58 }
 0xfc4   : > { %v6751_v48 = vpop.permute.xlu1 %5152  ;;  %v3047_v25 = vadd.f32 %v3046_v30, %v3045_v46  ;;  %v3095_v31 = vsel %vm1219_vm14, %v3088_v37, %v3094_v23 }
 0xfc5   : > { %v5155_v41 = vunpack.i.h.bf16 %v6751_v48  ;;  %v5154_v10 = vunpack.i.l.bf16 %v6751_v48  ;;  %v3074_v47 = vpack.c.bf16 %v3054_v17, %v3054_v17 }
 0xfc6   : > { %v3073_v6 = vpack.c.bf16 %v3047_v25, %v3047_v25  ;;  %v4895_v25 = vld [vmem:[%s5816_s17 + $0x14] sm:$0xf] }
 0xfc7   : > { %v3011_v19 = vmul.f32 %v5154_v10, %v6753_v34  ;;  %v3012_v29 = vmul.f32 %v5155_v41, %v6749_v36  ;;  %v3090_v26 = vunpack.c.l.b16 %v3074_v47 }
 0xfc8   : > { %v3089_v33 = vunpack.c.l.b16 %v3073_v6 }
 0xfc9   : > { %v3055_v61 = vsel %vm1134_vm11, %v3011_v19, 0.0  ;;  %v3062_v40 = vsel %vm1134_vm11, %v3012_v29, 0.0 }
 0xfca   : > { %v3056_v54 = vrot.slane %v3055_v61, 4  ;;  %v3063_v8 = vrot.slane %v3062_v40, 4  ;;  %v3096_v50 = vsel %vm1221_vm15, %v3089_v33, %v3095_v31 }
 0xfcb   : > { %v3097_v29 = vsel %vm1223_vm0, %v3090_v26, %v3096_v50 }
 0xfcc   : > { %v3057_v2 = vadd.f32 %v3056_v54, %v3055_v61  ;;  %v3064_v9 = vadd.f32 %v3063_v8, %v3062_v40  ;;  %v3211_v40 = vpack.c.bf16 %v6699_v63, %v6705_v22  ;;  %v6782_v54 = vunpack.c.l.bf16 %v4895_v25 }
 0xfce   : > { %v3058_v0 = vrot.slane %v3057_v2, 2  ;;  %v3065_v14 = vrot.slane %v3064_v9, 2  ;;  %v3428_v8 = vperm.slane %v6782_v54, 2  ;;  %v3435_v45 = vperm.slane %v6782_v54, 3 }
 0xfd0   : > { %v3059_v53 = vadd.f32 %v3058_v0, %v3057_v2  ;;  %v3066_v11 = vadd.f32 %v3065_v14, %v3064_v9  ;;  %v5161_v4 = vpack.i.bf16 %v3435_v45, %v3428_v8 }
 0xfd2   : > { %v3060_v42 = vrot.slane %v3059_v53, 1  ;;  %v3067_v46 = vrot.slane %v3066_v11, 1 }
 0xfd4   : > { %v3061_v60 = vadd.f32 %v3060_v42, %v3059_v53  ;;  %v3068_v12 = vadd.f32 %v3067_v46, %v3066_v11  ;;  %v3414_v53 = vperm.slane %v6782_v54, 0  ;;  %v3421_v11 = vperm.slane %v6782_v54, 1 }
 0xfd6   : > { %v3075_v35 = vpack.c.bf16 %v3061_v60, %v3061_v60  ;;  %v3076_v30 = vpack.c.bf16 %v3068_v12, %v3068_v12  ;;  %v5156_v47 = vpack.i.bf16 %v3421_v11, %v3414_v53 }
 0xfd8   : > { %v3091_v3 = vunpack.c.l.b16 %v3075_v35  ;;  %v3092_v19 = vunpack.c.l.b16 %v3076_v30 }
 0xfda   : > { %v3098_v13 = vsel %vm1225_vm1, %v3091_v3, %v3097_v29 }
 0xfdb   : > { %v3099_v44 = vsel %vm1227_vm2, %v3092_v19, %v3098_v13 }
 0xfdc   : > { %v3100_v61 = vpack.c.b16 %v3099_v44, %v3099_v44 }
 0xfde   : > { %3101 = vrot.lane.b32.xlu2 %v3100_v61, %s5628_s24 }
 0xfe6   : > { %3220 = vrot.lane.b32.xlu2 %v3211_v40, %s5628_s24 }
 0xfee   : > { %3224 = vrot.lane.b32.xlu2 %v3213_v59, %s5628_s24 }
 0xff6   : > { %3343 = vrot.lane.b32.xlu2 %v6705_v22, %s5628_s24  ;;  %v4888_v22 = vld [vmem:[%s5821_s28 + $0x14] sm:$0xf] }
 0xff7   : > { %v3141_v17 = vunpack.c.l.bf16 %v4888_v22 }
 0xffe   : > { %3349 = vrot.lane.b32.xlu2 %v6730_v18, %s5628_s24 }
0x1006   : > { %5162 = vperm.xlu2 %5054, %v5161_v4  }
0x1022   : > { %v3219_v9 = vpop.permute.xlu1 %3218 }
0x1038   : > { %v3102_v2 = vpop.permute.xlu2 %3101 }
0x1039   : > { %4886 = vmatmul.msk.bf16.vlgmr.msrb.gmra.mxu0 %vm882_vm10, %v3102_v2 }
0x1040   : > { %v3221_v15 = vpop.permute.xlu2 %3220 }
0x1048   : > { %v3225_v60 = vpop.permute.xlu2 %3224 }
0x1049   : > { %4891 = vmatmul.msk.bf16.vlgmr.msra.gmra.mxu0 %vm882_vm10, %v3219_v9 }
0x1059   : > { %4892 = vmatmul.msk.bf16.gmra.mxu0 %vm882_vm10, %v3221_v15 }
0x10b6   : > { %v6792_v55 = vpop.f32.mrf.mxu0 }
0x10b7   : > { %v3142_v6 = vadd.f32 %v3141_v17, %v6792_v55 }
0x10b9   : > { %5336 = vtanh.f32 %v3142_v6  ;;  %v3144_v33 = vmul.f32 0.5, %v3142_v6 }
0x10bb   : > { %5338 = vtanh.f32 %v3144_v33 }
0x10be   : > { %v3117_v0 = vpop.f32.mrf.mxu0 }
0x10bf   : > { %v5337_v14 = vpop.eup %5336 }
0x10c0   : > { %v3148_v51 = vadd.f32 1.0, %v5337_v14 }
0x10c1   : > { %v5339_v18 = vpop.eup %5338 }
0x10c2   : > { %3150 = vrot.lane.b32.xlu0 %v3148_v51, %s5627_s12  ;;  %v3146_v42 = vmul.f32 0.5, %v5339_v18 }
0x10c4   : > { %v3147_v46 = vadd.f32 0.5, %v3146_v42 }
0x10c6   : > { %v3247_v26 = vpop.f32.mrf.mxu0 }
0x10ca   : > { %3222 = vrot.lane.b32.xlu0 %v3212_v32, %s5628_s24 }
0x10ce   : > { %v3249_v31 = vpop.f32.mrf.mxu0 }
0x10d2   : > { %3339 = vrot.lane.b32.xlu0 %v6684_v1, %s5628_s24 }
0x10d6   : > { %v3252_v35 = vpop.f32.mrf.mxu0 }
0x10da   : > { %3345 = vrot.lane.b32.xlu0 %v6699_v63, %s5628_s24 }
0x10e2   : > { %3351 = vrot.lane.b32.xlu0 %v6753_v34, %s5628_s24 }
0x10ea   : > { %5157 = vperm.xlu0 %5055, %v5156_v47  }
0x1134   : > { %v3151_v23 = vpop.permute.xlu0 %3150 }
0x1135   : > { %v3153_v37 = vmul.f32 %v3151_v23, %v3147_v46 }
0x1137   : > { %v6807_v1 = vmul.f32 0.5, %v3153_v37 }
0x1139   : > { %v3187_v63 = vpack.c.bf16 %v6807_v1, %v6807_v1 }
0x113b   : > { %3192 = vrot.lane.b32.xlu1 %v3187_v63, %s5628_s24 }
0x113c   : > { %v3223_v34 = vpop.permute.xlu0 %3222 }
0x113d   : > { %4893 = vmatmul.msk.bf16.gmra.mxu0 %vm882_vm10, %v3223_v34 }
0x1143   : > { %3341 = vrot.lane.b32.xlu1 %v6701_v49, %s5628_s24  ;;  %v3254_v49 = vpop.f32.mrf.mxu0 }
0x114b   : > { %3347 = vrot.lane.b32.xlu1 %v6733_v58, %s5628_s24  ;;  %v4889_v58 = vld [vmem:[%s5796_s15 + $0x14] sm:$0xf] }
0x114c   : > { %v3190_v3 = vunpack.c.l.bf16 %v4889_v58 }
0x114d   : > { %4894 = vmatmul.msk.bf16.gmra.mxu0 %vm882_vm10, %v3225_v60 }
0x1153   : > { %3353 = vrot.lane.b32.xlu1 %v6749_v36, %s5628_s24 }
0x11ad   : > { %v3193_v12 = vpop.permute.xlu1 %3192 }
0x11ae   : > { %4890 = vmatmul.msk.bf16.vlgmr.msrb.gmra.mxu2 %vm882_vm10, %v3193_v12 }
0x11af   : > { %3709 = vmatpush.bf16.msrb.mxu2 %v5908_v52 }
0x11b3   : > { %3710 = vmatpush.bf16.msrb.mxu2 %v5920_v56 }
0x11ba   : > { %v3257_v30 = vpop.f32.mrf.mxu0 }
0x11c2   : > { %v3259_v50 = vpop.f32.mrf.mxu0 }
0x11ca   : > { %v3262_v13 = vpop.f32.mrf.mxu0 }
0x11d2   : > { %v3264_v63 = vpop.f32.mrf.mxu0 }
0x1231   : > { %v3206_v19 = vpop.f32.mrf.mxu2 }
0x1232   : > { %v3207_v29 = vadd.f32 %v3206_v19, %v3190_v3 }
0x1234   : > { %v3275_v44 = vperm.slane %v3207_v29, 0  ;;  %v3268_v36 = vrot.slane %v3207_v29, 1  ;;  %v3269_v61 = vrot.slane %v3207_v29, 2  ;;  %v3270_v40 = vrot.slane %v3207_v29, 3 }
0x1235   : > { %v3271_v59 = vrot.slane %v3207_v29, 4  ;;  %v3272_v25 = vrot.slane %v3207_v29, 5  ;;  %v3273_v22 = vrot.slane %v3207_v29, 6  ;;  %v3274_v17 = vrot.slane %v3207_v29, 7 }
0x1236   : > { %v3291_v8 = vadd.f32 %v3275_v44, %v3247_v26  ;;  %v3276_v45 = vperm.slane %v3268_v36, 0  ;;  %v3277_v4 = vperm.slane %v3269_v61, 0  ;;  %v3278_v2 = vperm.slane %v3270_v40, 0  ;;  %v3344_v44 = vpop.permute.xlu2 %3343 }
0x1237   : > { %v3279_v9 = vperm.slane %v3271_v59, 0  ;;  %v3280_v15 = vperm.slane %v3272_v25, 0  ;;  %v3282_v47 = vperm.slane %v3274_v17, 0  ;;  %v3281_v23 = vperm.slane %v3273_v22, 0 }
0x1238   : > { %v3299_v6 = vmul.f32 0.5, %v3291_v8  ;;  %v3292_v0 = vadd.f32 %v3276_v45, %v3249_v31  ;;  %v3293_v14 = vadd.f32 %v3277_v4, %v3252_v35  ;;  %v3294_v51 = vadd.f32 %v3278_v2, %v3254_v49  ;;  %v3340_v35 = vpop.permute.xlu0 %3339  ;;  %v3342_v49 = vpop.permute.xlu1 %3341 }
0x1239   : > { %v3208_v32 = vpop.f32.mrf.mxu2  ;;  %v3295_v53 = vadd.f32 %v3279_v9, %v3257_v30  ;;  %v3296_v11 = vadd.f32 %v3280_v15, %v3259_v50  ;;  %v3298_v34 = vadd.f32 %v3282_v47, %v3264_v63  ;;  %v3297_v60 = vadd.f32 %v3281_v23, %v3262_v13 }
0x123a   : > { %5340 = vtanh.f32 %v3299_v6  ;;  %v3300_v33 = vmul.f32 0.5, %v3292_v0  ;;  %v3301_v18 = vmul.f32 0.5, %v3293_v14  ;;  %v3302_v42 = vmul.f32 0.5, %v3294_v51 }
0x123b   : > { %v3303_v46 = vmul.f32 0.5, %v3295_v53  ;;  %v3304_v37 = vmul.f32 0.5, %v3296_v11  ;;  %v3306_v30 = vmul.f32 0.5, %v3298_v34  ;;  %v3305_v19 = vmul.f32 0.5, %v3297_v60 }
0x123c   : > { %5342 = vtanh.f32 %v3300_v33  ;;  %v3442_v47 = vperm.slane %v6782_v54, 4  ;;  %v3449_v33 = vperm.slane %v6782_v54, 5 }
0x123d   : > { %5344 = vtanh.f32 %v3301_v18 }
0x123e   : > { %5346 = vtanh.f32 %v3302_v42  ;;  %v3350_v53 = vpop.permute.xlu2 %3349  ;;  %v5166_v23 = vpack.i.bf16 %v3449_v33, %v3442_v47 }
0x123f   : > { %5348 = vtanh.f32 %v3303_v46 }
0x1240   : > { %v5341_v12 = vpop.eup %5340  ;;  %5350 = vtanh.f32 %v3304_v37  ;;  %v3346_v6 = vpop.permute.xlu0 %3345 }
0x1241   : > { %v3315_v26 = vmul.f32 0.5, %v5341_v12  ;;  %5352 = vtanh.f32 %v3306_v30  ;;  %v3348_v0 = vpop.permute.xlu1 %3347 }
0x1242   : > { %v5343_v31 = vpop.eup %5342  ;;  %5354 = vtanh.f32 %v3305_v19  ;;  %v3156_v19 = vrot.slane %v6807_v1, 1 }
0x1243   : > { %v5345_v50 = vpop.eup %5344  ;;  %v3323_v58 = vadd.f32 0.5, %v3315_v26  ;;  %v3316_v3 = vmul.f32 0.5, %v5343_v31  ;;  %v3456_v31 = vperm.slane %v6782_v54, 6 }
0x1244   : > { %v5347_v29 = vpop.eup %5346  ;;  %v3317_v36 = vmul.f32 0.5, %v5345_v50 }
0x1245   : > { %v5349_v61 = vpop.eup %5348  ;;  %v3363_v40 = vmul.f32 %v3340_v35, %v3323_v58  ;;  %v3324_v59 = vadd.f32 0.5, %v3316_v3  ;;  %v3318_v25 = vmul.f32 0.5, %v5347_v29  ;;  %v3463_v35 = vperm.slane %v6782_v54, 7 }
0x1246   : > { %v5351_v8 = vpop.eup %5350  ;;  %v3325_v13 = vadd.f32 0.5, %v3317_v36  ;;  %v3319_v9 = vmul.f32 0.5, %v5349_v61  ;;  %v6836_v30 = vpop.permute.xlu2 %5162  ;;  %v3163_v58 = vperm.slane %v6807_v1, 0  ;;  %v3158_v3 = vrot.slane %v6807_v1, 3 }
0x1247   : > { %3379 = vrot.lane.b32.xlu2 %v3363_v40, %s5627_s12  ;;  %v3364_v45 = vmul.f32 %v3342_v49, %v3324_v59  ;;  %v3320_v4 = vmul.f32 0.5, %v5351_v8  ;;  %v3326_v15 = vadd.f32 0.5, %v3318_v25  ;;  %v5353_v17 = vpop.eup %5352  ;;  %v5171_v49 = vpack.i.bf16 %v3463_v35, %v3456_v31 }
0x1248   : > { %v3365_v2 = vmul.f32 %v3344_v44, %v3325_v13  ;;  %v3327_v14 = vadd.f32 0.5, %v3319_v9  ;;  %v5355_v51 = vpop.eup %5354  ;;  %v3322_v18 = vmul.f32 0.5, %v5353_v17  ;;  %v3352_v60 = vpop.permute.xlu0 %3351  ;;  %v3179_v44 = vmul.f32 %v5139_v62, %v3163_v58 }
0x1249   : > { %3381 = vrot.lane.b32.xlu0 %v3364_v45, %s5627_s12  ;;  %v3328_v22 = vadd.f32 0.5, %v3320_v4  ;;  %v3366_v32 = vmul.f32 %v3346_v6, %v3326_v15  ;;  %v3321_v46 = vmul.f32 0.5, %v5355_v51  ;;  %v3354_v34 = vpop.permute.xlu1 %3353  ;;  %v3157_v36 = vrot.slane %v6807_v1, 2 }
0x124a   : > { %3383 = vrot.lane.b32.xlu1 %v3365_v2, %s5627_s12  ;;  %v3367_v42 = vmul.f32 %v3348_v0, %v3327_v14  ;;  %v3330_v37 = vadd.f32 0.5, %v3322_v18  ;;  %v3166_v54 = vperm.slane %v3158_v3, 0  ;;  %v3164_v40 = vperm.slane %v3156_v19, 0 }
0x124b   : > { %v3368_v11 = vmul.f32 %v3350_v53, %v3328_v22  ;;  %v3329_v63 = vadd.f32 0.5, %v3321_v46  ;;  %v3165_v8 = vperm.slane %v3157_v36, 0  ;;  %v3160_v4 = vrot.slane %v6807_v1, 5 }
0x124c   : > { %v3370_v12 = vmul.f32 %v3354_v34, %v3330_v37  ;;  %v3182_v45 = vmul.f32 %v5145_v27, %v3166_v54  ;;  %v3180_v62 = vmul.f32 %v5140_v38, %v3164_v40  ;;  %v3159_v15 = vrot.slane %v6807_v1, 4 }
0x124d   : > { %v3369_v26 = vmul.f32 %v3352_v60, %v3329_v63  ;;  %v3181_v9 = vmul.f32 %v5144_v28, %v3165_v8  ;;  %v5164_v27 = vunpack.i.l.bf16 %v6836_v30  ;;  %v5165_v14 = vunpack.i.h.bf16 %v6836_v30 }
0x124e   : > { %v3168_v51 = vperm.slane %v3160_v4, 0  ;;  %v3167_v53 = vperm.slane %v3159_v15, 0 }
0x124f   : > { %3385 = vrot.lane.b32.xlu2 %v3366_v32, %s5627_s12 }
0x1250   : > { %v6841_v29 = vpop.permute.xlu0 %5157  ;;  %v3184_v37 = vmul.f32 %v5150_v39, %v3168_v51  ;;  %v3183_v34 = vmul.f32 %v5149_v7, %v3167_v53 }
0x1251   : > { %3389 = vrot.lane.b32.xlu0 %v3368_v11, %s5627_s12  ;;  %v5159_v59 = vunpack.i.l.bf16 %v6841_v29  ;;  %v5160_v22 = vunpack.i.h.bf16 %v6841_v29 }
0x1252   : > { %3387 = vrot.lane.b32.xlu1 %v3367_v42, %s5627_s12 }
0x1257   : > { %5167 = vperm.xlu2 %5054, %v5166_v23  }
0x1259   : > { %3393 = vrot.lane.b32.xlu0 %v3370_v12, %s5627_s12 }
0x125a   : > { %3391 = vrot.lane.b32.xlu1 %v3369_v26, %s5627_s12 }
0x1262   : > { %5172 = vperm.xlu1 %5053, %v5171_v49  }
0x12a1   : > { %v3380_v50 = vpop.permute.xlu2 %3379 }
0x12a2   : > { %v6846_v61 = vadd.f32 %v3380_v50, %v3179_v44 }
0x12a4   : > { %v3470_v13 = vmul.f32 %v5159_v59, %v6846_v61 }
0x12a6   : > { %v3478_v24 = vsel %vm1134_vm11, %v3470_v13, 0.0 }
0x12a7   : > { %v3479_v11 = vrot.slane %v3478_v24, 4 }
0x12a9   : > { %v3386_v25 = vpop.permute.xlu2 %3385  ;;  %v3480_v12 = vadd.f32 %v3479_v11, %v3478_v24 }
0x12aa   : > { %v6861_v17 = vadd.f32 %v3386_v25, %v3182_v45  ;;  %v3162_v45 = vrot.slane %v6807_v1, 7 }
0x12ab   : > { %v3481_v36 = vrot.slane %v3480_v12, 2 }
0x12ac   : > { %v3473_v47 = vmul.f32 %v5165_v14, %v6861_v17  ;;  %v3170_v51 = vperm.slane %v3162_v45, 0 }
0x12ae   : > { %v3499_v26 = vsel %vm1134_vm11, %v3473_v47, 0.0 }
0x12af   : > { %v3500_v5 = vrot.slane %v3499_v26, 4 }
0x12b1   : > { %v6883_v18 = vpop.permute.xlu2 %5167 }
0x12b2   : > { %v5170_v31 = vunpack.i.h.bf16 %v6883_v18  ;;  %v5169_v50 = vunpack.i.l.bf16 %v6883_v18 }
0x12bb   : > { %v3382_v2 = vpop.permute.xlu0 %3381 }
0x12bc   : > { %v6863_v6 = vadd.f32 %v3382_v2, %v3180_v62  ;;  %v3384_v0 = vpop.permute.xlu1 %3383  ;;  %v3501_v62 = vadd.f32 %v3500_v5, %v3499_v26  ;;  %v3161_v2 = vrot.slane %v6807_v1, 6  ;;  %v3186_v1 = vmul.f32 %v5155_v41, %v3170_v51 }
0x12bd   : > { %v6867_v38 = vadd.f32 %v3384_v0, %v3181_v9  ;;  %v3482_v9 = vadd.f32 %v3481_v36, %v3480_v12 }
0x12be   : > { %v3471_v57 = vmul.f32 %v5160_v22, %v6863_v6  ;;  %v3675_v28 = vpack.c.bf16 %v6863_v6, %v6846_v61  ;;  %v3169_v11 = vperm.slane %v3161_v2, 0 }
0x12bf   : > { %v3472_v32 = vmul.f32 %v5164_v27, %v6867_v38  ;;  %v3483_v47 = vrot.slane %v3482_v9, 1 }
0x12c0   : > { %v3485_v33 = vsel %vm1134_vm11, %v3471_v57, 0.0  ;;  %3683 = vrot.lane.b32.xlu0 %v3675_v28, %s5628_s24 }
0x12c1   : > { %v3486_v42 = vrot.slane %v3485_v33, 4  ;;  %v3492_v46 = vsel %vm1134_vm11, %v3472_v32, 0.0  ;;  %v3502_v32 = vrot.slane %v3501_v62, 2 }
0x12c2   : > { %v3493_v23 = vrot.slane %v3492_v46, 4 }
0x12c3   : > { %v3487_v63 = vadd.f32 %v3486_v42, %v3485_v33  ;;  %v3390_v60 = vpop.permute.xlu0 %3389 }
0x12c4   : > { %v3388_v35 = vpop.permute.xlu1 %3387  ;;  %v6892_v49 = vadd.f32 %v3390_v60, %v3184_v37  ;;  %v3494_v3 = vadd.f32 %v3493_v23, %v3492_v46  ;;  %v3503_v37 = vadd.f32 %v3502_v32, %v3501_v62  ;;  %v3484_v60 = vadd.f32 %v3483_v47, %v3482_v9  ;;  %v4905_v62 = vld [vmem:[%s5816_s17 + $0x18] sm:$0xf] }
0x12c5   : > { %v6895_v58 = vadd.f32 %v3388_v35, %v3183_v34  ;;  %v3488_v7 = vrot.slane %v3487_v63, 2  ;;  %v3185_v34 = vmul.f32 %v5154_v10, %v3169_v11 }
0x12c6   : > { %v3475_v39 = vmul.f32 %v5170_v31, %v6892_v49  ;;  %v3495_v8 = vrot.slane %v3494_v3, 2 }
0x12c7   : > { %v3474_v19 = vmul.f32 %v5169_v50, %v6895_v58  ;;  %v3677_v44 = vpack.c.bf16 %v6892_v49, %v6895_v58  ;;  %v3489_v4 = vadd.f32 %v3488_v7, %v3487_v63  ;;  %v3504_v7 = vrot.slane %v3503_v37, 1 }
0x12c8   : > { %v3513_v54 = vsel %vm1134_vm11, %v3475_v39, 0.0  ;;  %v3496_v57 = vadd.f32 %v3495_v8, %v3494_v3 }
0x12c9   : > { %v3506_v40 = vsel %vm1134_vm11, %v3474_v19, 0.0  ;;  %v3514_v25 = vrot.slane %v3513_v54, 4  ;;  %3687 = vrot.lane.b32.xlu0 %v3677_v44, %s5628_s24  ;;  %v3490_v53 = vrot.slane %v3489_v4, 1  ;;  %v3534_v44 = vpack.c.bf16 %v3484_v60, %v3484_v60 }
0x12ca   : > { %v3507_v13 = vrot.slane %v3506_v40, 4  ;;  %v3497_v46 = vrot.slane %v3496_v57, 1 }
0x12cb   : > { %v3515_v24 = vadd.f32 %v3514_v25, %v3513_v54  ;;  %v3394_v42 = vpop.permute.xlu0 %3393  ;;  %v3491_v63 = vadd.f32 %v3490_v53, %v3489_v4  ;;  %v3505_v4 = vadd.f32 %v3504_v7, %v3503_v37 }
0x12cc   : > { %v3508_v15 = vadd.f32 %v3507_v13, %v3506_v40  ;;  %v3392_v0 = vpop.permute.xlu1 %3391  ;;  %v6916_v12 = vadd.f32 %v3394_v42, %v3186_v1  ;;  %v3498_v5 = vadd.f32 %v3497_v46, %v3496_v57  ;;  %v6935_v57 = vunpack.c.l.bf16 %v4905_v62 }
0x12cd   : > { %v3516_v33 = vrot.slane %v3515_v24, 2  ;;  %v6920_v3 = vadd.f32 %v3392_v0, %v3185_v34  ;;  %v3535_v19 = vpack.c.bf16 %v3491_v63, %v3491_v63  ;;  %v3550_v0 = vunpack.c.l.b16 %v3534_v44 }
0x12ce   : > { %v3509_v28 = vrot.slane %v3508_v15, 2  ;;  %v3536_v25 = vpack.c.bf16 %v3498_v5, %v3498_v5  ;;  %v3537_v11 = vpack.c.bf16 %v3505_v4, %v3505_v4  ;;  %v3886_v1 = vperm.slane %v6935_v57, 1 }
0x12cf   : > { %v3517_v35 = vadd.f32 %v3516_v33, %v3515_v24  ;;  %v3551_v2 = vunpack.c.l.b16 %v3535_v19  ;;  %v3676_v62 = vpack.c.bf16 %v6861_v17, %v6867_v38 }
0x12d0   : > { %v3510_v23 = vadd.f32 %v3509_v28, %v3508_v15  ;;  %v3552_v28 = vunpack.c.l.b16 %v3536_v25 }
0x12d1   : > { %3804 = vrot.lane.b32.xlu0 %v6846_v61, %s5628_s24  ;;  %v3518_v36 = vrot.slane %v3517_v35, 1  ;;  %v3558_v47 = vsel %vm1215_vm12, %v3551_v2, %v3550_v0  ;;  %v4898_v0 = vld [vmem:[%s5821_s28 + $0x18] sm:$0xf] }
0x12d2   : > { %v3511_v41 = vrot.slane %v3510_v23, 1  ;;  %v3559_v37 = vsel %vm1217_vm13, %v3552_v28, %v3558_v47 }
0x12d3   : > { %v3519_v24 = vadd.f32 %v3518_v36, %v3517_v35  ;;  %v3553_v35 = vunpack.c.l.b16 %v3537_v11  ;;  %v3678_v11 = vpack.c.bf16 %v6916_v12, %v6920_v3 }
0x12d4   : > { %v6918_v26 = vpop.permute.xlu1 %5172  ;;  %v3512_v8 = vadd.f32 %v3511_v41, %v3510_v23  ;;  %v3879_v23 = vperm.slane %v6935_v57, 0 }
0x12d5   : > { %v5175_v61 = vunpack.i.h.bf16 %v6918_v26  ;;  %v5174_v39 = vunpack.i.l.bf16 %v6918_v26  ;;  %v3539_v46 = vpack.c.bf16 %v3519_v24, %v3519_v24  ;;  %v3606_v24 = vunpack.c.l.bf16 %v4898_v0 }
0x12d6   : > { %v3538_v51 = vpack.c.bf16 %v3512_v8, %v3512_v8  ;;  %v5176_v19 = vpack.i.bf16 %v3886_v1, %v3879_v23 }
0x12d7   : > { %v3476_v48 = vmul.f32 %v5174_v39, %v6920_v3  ;;  %v3477_v10 = vmul.f32 %v5175_v61, %v6916_v12  ;;  %v3555_v7 = vunpack.c.l.b16 %v3539_v46 }
0x12d8   : > { %v3554_v63 = vunpack.c.l.b16 %v3538_v51 }
0x12d9   : > { %v3520_v54 = vsel %vm1134_vm11, %v3476_v48, 0.0  ;;  %v3527_v40 = vsel %vm1134_vm11, %v3477_v10, 0.0  ;;  %3810 = vrot.lane.b32.xlu0 %v6861_v17, %s5628_s24  ;;  %v3560_v48 = vsel %vm1219_vm14, %v3553_v35, %v3559_v37 }
0x12da   : > { %v3521_v13 = vrot.slane %v3520_v54, 4  ;;  %v3528_v45 = vrot.slane %v3527_v40, 4  ;;  %v3561_v36 = vsel %vm1221_vm15, %v3554_v63, %v3560_v48 }
0x12db   : > { %v3562_v25 = vsel %vm1223_vm0, %v3555_v7, %v3561_v36 }
0x12dc   : > { %v3522_v9 = vadd.f32 %v3521_v13, %v3520_v54  ;;  %v3529_v15 = vadd.f32 %v3528_v45, %v3527_v40 }
0x12de   : > { %v3523_v32 = vrot.slane %v3522_v9, 2  ;;  %v3530_v53 = vrot.slane %v3529_v15, 2 }
0x12e0   : > { %v3524_v33 = vadd.f32 %v3523_v32, %v3522_v9  ;;  %v3531_v42 = vadd.f32 %v3530_v53, %v3529_v15 }
0x12e1   : > { %3816 = vrot.lane.b32.xlu0 %v6920_v3, %s5628_s24 }
0x12e2   : > { %v3525_v34 = vrot.slane %v3524_v33, 1  ;;  %v3532_v60 = vrot.slane %v3531_v42, 1 }
0x12e4   : > { %v3526_v5 = vadd.f32 %v3525_v34, %v3524_v33  ;;  %v3533_v41 = vadd.f32 %v3532_v60, %v3531_v42 }
0x12e6   : > { %v3540_v10 = vpack.c.bf16 %v3526_v5, %v3526_v5  ;;  %v3541_v44 = vpack.c.bf16 %v3533_v41, %v3533_v41 }
0x12e8   : > { %v3556_v54 = vunpack.c.l.b16 %v3540_v10  ;;  %v3557_v40 = vunpack.c.l.b16 %v3541_v44 }
0x12e9   : > { %5177 = vperm.xlu0 %5055, %v5176_v19  }
0x12ea   : > { %v3563_v8 = vsel %vm1225_vm1, %v3556_v54, %v3562_v25 }
0x12eb   : > { %v3564_v13 = vsel %vm1227_vm2, %v3557_v40, %v3563_v8 }
0x12ec   : > { %v3565_v45 = vpack.c.b16 %v3564_v13, %v3564_v13 }
0x12ee   : > { %3566 = vrot.lane.b32.xlu2 %v3565_v45, %s5628_s24 }
0x12f6   : > { %3685 = vrot.lane.b32.xlu2 %v3676_v62, %s5628_s24 }
0x1332   : > { %v3684_v2 = vpop.permute.xlu0 %3683 }
0x133b   : > { %v3688_v15 = vpop.permute.xlu0 %3687 }
0x1348   : > { %v3567_v4 = vpop.permute.xlu2 %3566 }
0x1349   : > { %4896 = vmatmul.msk.bf16.vlgmr.msra.gmra.mxu2 %vm882_vm10, %v3567_v4 }
0x1350   : > { %v3686_v9 = vpop.permute.xlu2 %3685 }
0x1359   : > { %4901 = vmatmul.msk.bf16.vlgmr.msrb.gmra.mxu2 %vm882_vm10, %v3684_v2 }
0x1369   : > { %4902 = vmatmul.msk.bf16.gmra.mxu2 %vm882_vm10, %v3686_v9 }
0x1379   : > { %4903 = vmatmul.msk.bf16.gmra.mxu2 %vm882_vm10, %v3688_v15 }
0x13cc   : > { %v6957_v28 = vpop.f32.mrf.mxu2 }
0x13cd   : > { %v3607_v17 = vadd.f32 %v3606_v24, %v6957_v28 }
0x13cf   : > { %5356 = vtanh.f32 %v3607_v17  ;;  %v3609_v47 = vmul.f32 0.5, %v3607_v17 }
0x13d1   : > { %5358 = vtanh.f32 %v3609_v47 }
0x13d4   : > { %v3582_v51 = vpop.f32.mrf.mxu2 }
0x13d5   : > { %v5357_v32 = vpop.eup %5356 }
0x13d6   : > { %v3613_v53 = vadd.f32 1.0, %v5357_v32 }
0x13d7   : > { %v5359_v33 = vpop.eup %5358 }
0x13d8   : > { %3615 = vrot.lane.b32.xlu1 %v3613_v53, %s5627_s12  ;;  %v3611_v42 = vmul.f32 0.5, %v5359_v33 }
0x13da   : > { %v3612_v46 = vadd.f32 0.5, %v3611_v42 }
0x13dc   : > { %v3712_v60 = vpop.f32.mrf.mxu2 }
0x13e0   : > { %3689 = vrot.lane.b32.xlu1 %v3678_v11, %s5628_s24 }
0x13e4   : > { %v3714_v35 = vpop.f32.mrf.mxu2 }
0x13e8   : > { %3806 = vrot.lane.b32.xlu1 %v6863_v6, %s5628_s24 }
0x13f0   : > { %3812 = vrot.lane.b32.xlu1 %v6895_v58, %s5628_s24  ;;  %v3893_v58 = vperm.slane %v6935_v57, 2 }
0x13f8   : > { %3818 = vrot.lane.b32.xlu1 %v6916_v12, %s5628_s24  ;;  %v3900_v12 = vperm.slane %v6935_v57, 3 }
0x13fa   : > { %v5181_v63 = vpack.i.bf16 %v3900_v12, %v3893_v58 }
0x144a   : > { %v3616_v23 = vpop.permute.xlu1 %3615 }
0x144b   : > { %v3618_v1 = vmul.f32 %v3616_v23, %v3612_v46 }
0x144d   : > { %v6970_v37 = vmul.f32 0.5, %v3618_v1 }
0x144f   : > { %v3652_v3 = vpack.c.bf16 %v6970_v37, %v6970_v37 }
0x1451   : > { %3657 = vrot.lane.b32.xlu2 %v3652_v3, %s5628_s24 }
0x1452   : > { %v3690_v6 = vpop.permute.xlu1 %3689 }
0x1453   : > { %4904 = vmatmul.msk.bf16.gmra.mxu2 %vm882_vm10, %v3690_v6 }
0x1459   : > { %3808 = vrot.lane.b32.xlu2 %v6867_v38, %s5628_s24  ;;  %v3717_v38 = vpop.f32.mrf.mxu2 }
0x1461   : > { %3814 = vrot.lane.b32.xlu2 %v6892_v49, %s5628_s24  ;;  %v3719_v5 = vpop.f32.mrf.mxu2  ;;  %v4899_v49 = vld [vmem:[%s5796_s15 + $0x18] sm:$0xf] }
0x1462   : > { %v3655_v19 = vunpack.c.l.bf16 %v4899_v49 }
0x1469   : > { %5182 = vperm.xlu2 %5054, %v5181_v63   ;;  %v3722_v41 = vpop.f32.mrf.mxu2 }
0x1471   : > { %v3724_v7 = vpop.f32.mrf.mxu2 }
0x14ab   : > { %v3658_v34 = vpop.permute.xlu2 %3657 }
0x14ac   : > { %4900 = vmatmul.msk.bf16.vlgmr.msra.gmra.mxu1 %vm882_vm10, %v3658_v34 }
0x14ad   : > { %4174 = vmatpush.bf16.msra.mxu1 %v5908_v52 }
0x14b1   : > { %4175 = vmatpush.bf16.msra.mxu1 %v5920_v56 }
0x14d6   : > { %v3727_v44 = vpop.f32.mrf.mxu2 }
0x14de   : > { %v3729_v6 = vpop.f32.mrf.mxu2 }
0x1529   : > { %v3671_v48 = vpop.f32.mrf.mxu1 }
0x152a   : > { %v3672_v10 = vadd.f32 %v3671_v48, %v3655_v19 }
0x152c   : > { %v3740_v36 = vperm.slane %v3672_v10, 0  ;;  %v3733_v54 = vrot.slane %v3672_v10, 1  ;;  %v3734_v40 = vrot.slane %v3672_v10, 2  ;;  %v3735_v25 = vrot.slane %v3672_v10, 3 }
0x152d   : > { %v3736_v8 = vrot.slane %v3672_v10, 4  ;;  %v3737_v13 = vrot.slane %v3672_v10, 5  ;;  %v3738_v9 = vrot.slane %v3672_v10, 6  ;;  %v3739_v15 = vrot.slane %v3672_v10, 7  ;;  %v3809_v10 = vpop.permute.xlu2 %3808 }
0x152e   : > { %v3756_v52 = vadd.f32 %v3740_v36, %v3712_v60  ;;  %v3741_v45 = vperm.slane %v3733_v54, 0  ;;  %v3742_v56 = vperm.slane %v3734_v40, 0  ;;  %v3743_v62 = vperm.slane %v3735_v25, 0 }
0x152f   : > { %v3744_v4 = vperm.slane %v3736_v8, 0  ;;  %v3745_v2 = vperm.slane %v3737_v13, 0  ;;  %v3747_v47 = vperm.slane %v3739_v15, 0  ;;  %v3746_v1 = vperm.slane %v3738_v9, 0 }
0x1530   : > { %v3764_v0 = vmul.f32 0.5, %v3756_v52  ;;  %v3757_v24 = vadd.f32 %v3741_v45, %v3714_v35  ;;  %v3758_v17 = vadd.f32 %v3742_v56, %v3717_v38  ;;  %v3759_v51 = vadd.f32 %v3743_v62, %v3719_v5  ;;  %v3805_v35 = vpop.permute.xlu0 %3804  ;;  %v3807_v38 = vpop.permute.xlu1 %3806 }
0x1531   : > { %v3673_v32 = vpop.f32.mrf.mxu1  ;;  %v3760_v53 = vadd.f32 %v3744_v4, %v3722_v41  ;;  %v3761_v11 = vadd.f32 %v3745_v2, %v3724_v7  ;;  %v3763_v58 = vadd.f32 %v3747_v47, %v3729_v6  ;;  %v3762_v12 = vadd.f32 %v3746_v1, %v3727_v44 }
0x1532   : > { %5360 = vtanh.f32 %v3764_v0  ;;  %v3765_v33 = vmul.f32 0.5, %v3757_v24  ;;  %v3766_v42 = vmul.f32 0.5, %v3758_v17  ;;  %v3767_v46 = vmul.f32 0.5, %v3759_v51 }
0x1533   : > { %v3768_v23 = vmul.f32 0.5, %v3760_v53  ;;  %v3769_v3 = vmul.f32 0.5, %v3761_v11  ;;  %v3771_v5 = vmul.f32 0.5, %v3763_v58  ;;  %v3770_v19 = vmul.f32 0.5, %v3762_v12 }
0x1534   : > { %5362 = vtanh.f32 %v3765_v33  ;;  %v3907_v11 = vperm.slane %v6935_v57, 4  ;;  %v3914_v47 = vperm.slane %v6935_v57, 5 }
0x1535   : > { %5364 = vtanh.f32 %v3766_v42  ;;  %v3815_v32 = vpop.permute.xlu2 %3814 }
0x1536   : > { %5366 = vtanh.f32 %v3767_v46 }
0x1537   : > { %5368 = vtanh.f32 %v3768_v23  ;;  %v5186_v23 = vpack.i.bf16 %v3914_v47, %v3907_v11 }
0x1538   : > { %v5361_v63 = vpop.eup %5360  ;;  %5370 = vtanh.f32 %v3769_v3  ;;  %v3811_v15 = vpop.permute.xlu0 %3810 }
0x1539   : > { %v3780_v34 = vmul.f32 0.5, %v5361_v63  ;;  %5372 = vtanh.f32 %v3771_v5  ;;  %v3813_v0 = vpop.permute.xlu1 %3812 }
0x153a   : > { %v5363_v60 = vpop.eup %5362  ;;  %5374 = vtanh.f32 %v3770_v19 }
0x153b   : > { %v5365_v41 = vpop.eup %5364  ;;  %v3788_v7 = vadd.f32 0.5, %v3780_v34  ;;  %v3781_v49 = vmul.f32 0.5, %v5363_v60  ;;  %v3921_v34 = vperm.slane %v6935_v57, 6  ;;  %v3928_v60 = vperm.slane %v6935_v57, 7 }
0x153c   : > { %v5367_v48 = vpop.eup %5366  ;;  %v3782_v36 = vmul.f32 0.5, %v5365_v41  ;;  %v3628_v41 = vperm.slane %v6970_v37, 0 }
0x153d   : > { %v5369_v54 = vpop.eup %5368  ;;  %v3828_v40 = vmul.f32 %v3805_v35, %v3788_v7  ;;  %v3789_v25 = vadd.f32 0.5, %v3781_v49  ;;  %v3783_v8 = vmul.f32 0.5, %v5367_v48  ;;  %v5191_v35 = vpack.i.bf16 %v3928_v60, %v3921_v34 }
0x153e   : > { %v5371_v13 = vpop.eup %5370  ;;  %v3790_v44 = vadd.f32 0.5, %v3782_v36  ;;  %v3784_v62 = vmul.f32 0.5, %v5369_v54  ;;  %v3623_v7 = vrot.slane %v6970_v37, 3  ;;  %v3621_v49 = vrot.slane %v6970_v37, 1 }
0x153f   : > { %3844 = vrot.lane.b32.xlu2 %v3828_v40, %s5627_s12  ;;  %v3829_v52 = vmul.f32 %v3807_v38, %v3789_v25  ;;  %v3785_v45 = vmul.f32 0.5, %v5371_v13  ;;  %v3791_v4 = vadd.f32 0.5, %v3783_v8  ;;  %v5373_v9 = vpop.eup %5372  ;;  %v6998_v38 = vpop.permute.xlu2 %5182  ;;  %v3644_v48 = vmul.f32 %v5159_v59, %v3628_v41 }
0x1540   : > { %v3830_v56 = vmul.f32 %v3809_v10, %v3790_v44  ;;  %v3792_v24 = vadd.f32 0.5, %v3784_v62  ;;  %v5375_v17 = vpop.eup %5374  ;;  %v3787_v33 = vmul.f32 0.5, %v5373_v9  ;;  %v3817_v58 = vpop.permute.xlu0 %3816  ;;  %v3622_v10 = vrot.slane %v6970_v37, 2 }
0x1541   : > { %3846 = vrot.lane.b32.xlu0 %v3829_v52, %s5627_s12  ;;  %v3793_v2 = vadd.f32 0.5, %v3785_v45  ;;  %v3831_v51 = vmul.f32 %v3811_v15, %v3791_v4  ;;  %v3786_v46 = vmul.f32 0.5, %v5375_v17  ;;  %v3819_v6 = vpop.permute.xlu1 %3818  ;;  %v3631_v57 = vperm.slane %v3623_v7, 0 }
0x1542   : > { %3848 = vrot.lane.b32.xlu1 %v3830_v56, %s5627_s12  ;;  %v3832_v42 = vmul.f32 %v3813_v0, %v3792_v24  ;;  %v3795_v1 = vadd.f32 0.5, %v3787_v33  ;;  %v3629_v54 = vperm.slane %v3621_v49, 0  ;;  %v3630_v8 = vperm.slane %v3622_v10, 0 }
0x1543   : > { %v3833_v53 = vmul.f32 %v3815_v32, %v3793_v2  ;;  %v3794_v3 = vadd.f32 0.5, %v3786_v46  ;;  %v3647_v44 = vmul.f32 %v5165_v14, %v3631_v57  ;;  %v3625_v52 = vrot.slane %v6970_v37, 5 }
0x1544   : > { %v3835_v12 = vmul.f32 %v3819_v6, %v3795_v1  ;;  %v3645_v59 = vmul.f32 %v5160_v22, %v3629_v54  ;;  %v3646_v56 = vmul.f32 %v5164_v27, %v3630_v8  ;;  %v3624_v62 = vrot.slane %v6970_v37, 4 }
0x1545   : > { %v3834_v63 = vmul.f32 %v3817_v58, %v3794_v3  ;;  %v5184_v14 = vunpack.i.l.bf16 %v6998_v38  ;;  %v5185_v0 = vunpack.i.h.bf16 %v6998_v38  ;;  %v3633_v24 = vperm.slane %v3625_v52, 0 }
0x1546   : > { %v3627_v8 = vrot.slane %v6970_v37, 7 }
0x1547   : > { %3850 = vrot.lane.b32.xlu2 %v3831_v51, %s5627_s12  ;;  %v3632_v51 = vperm.slane %v3624_v62, 0 }
0x1548   : > { %v7003_v19 = vpop.permute.xlu0 %5177 }
0x1549   : > { %3854 = vrot.lane.b32.xlu0 %v3833_v53, %s5627_s12  ;;  %v5179_v40 = vunpack.i.l.bf16 %v7003_v19  ;;  %v5180_v4 = vunpack.i.h.bf16 %v7003_v19  ;;  %v3648_v3 = vmul.f32 %v5169_v50, %v3632_v51 }
0x154a   : > { %3852 = vrot.lane.b32.xlu1 %v3832_v42, %s5627_s12 }
0x154f   : > { %5187 = vperm.xlu2 %5054, %v5186_v23   ;;  %v3649_v23 = vmul.f32 %v5170_v31, %v3633_v24 }
0x1551   : > { %3858 = vrot.lane.b32.xlu0 %v3835_v12, %s5627_s12 }
0x1552   : > { %3856 = vrot.lane.b32.xlu1 %v3834_v63, %s5627_s12 }
0x155a   : > { %5192 = vperm.xlu1 %5053, %v5191_v35  }
0x1599   : > { %v3845_v5 = vpop.permute.xlu2 %3844 }
0x159a   : > { %v7008_v36 = vadd.f32 %v3845_v5, %v3644_v48 }
0x159c   : > { %v3935_v13 = vmul.f32 %v5179_v40, %v7008_v36 }
0x159e   : > { %v3943_v29 = vsel %vm1134_vm11, %v3935_v13, 0.0 }
0x159f   : > { %v3944_v32 = vrot.slane %v3943_v29, 4 }
0x15a1   : > { %v3851_v25 = vpop.permute.xlu2 %3850  ;;  %v3945_v58 = vadd.f32 %v3944_v32, %v3943_v29 }
0x15a2   : > { %v7023_v2 = vadd.f32 %v3851_v25, %v3647_v44 }
0x15a3   : > { %v3946_v49 = vrot.slane %v3945_v58, 2 }
0x15a4   : > { %v3938_v53 = vmul.f32 %v5185_v0, %v7023_v2 }
0x15a5   : > { %v3947_v52 = vadd.f32 %v3946_v49, %v3945_v58 }
0x15a6   : > { %v3964_v12 = vsel %vm1134_vm11, %v3938_v53, 0.0 }
0x15a7   : > { %v3965_v18 = vrot.slane %v3964_v12, 4  ;;  %v3948_v51 = vrot.slane %v3947_v52, 1 }
0x15a9   : > { %v7045_v47 = vpop.permute.xlu2 %5187  ;;  %v3966_v13 = vadd.f32 %v3965_v18, %v3964_v12 }
0x15aa   : > { %v5190_v63 = vunpack.i.h.bf16 %v7045_v47  ;;  %v5189_v35 = vunpack.i.l.bf16 %v7045_v47 }
0x15b3   : > { %v3847_v45 = vpop.permute.xlu0 %3846 }
0x15b4   : > { %v7025_v9 = vadd.f32 %v3847_v45, %v3645_v59  ;;  %v3849_v15 = vpop.permute.xlu1 %3848  ;;  %v3626_v59 = vrot.slane %v6970_v37, 6 }
0x15b5   : > { %v7029_v22 = vadd.f32 %v3849_v15, %v3646_v56 }
0x15b6   : > { %v3936_v30 = vmul.f32 %v5180_v4, %v7025_v9  ;;  %v4140_v27 = vpack.c.bf16 %v7025_v9, %v7008_v36 }
0x15b7   : > { %v3937_v17 = vmul.f32 %v5184_v14, %v7029_v22 }
0x15b8   : > { %v3950_v11 = vsel %vm1134_vm11, %v3936_v30, 0.0  ;;  %4148 = vrot.lane.b32.xlu1 %v4140_v27, %s5628_s24  ;;  %v3635_v30 = vperm.slane %v3627_v8, 0  ;;  %v3967_v27 = vrot.slane %v3966_v13, 2 }
0x15b9   : > { %v3951_v33 = vrot.slane %v3950_v11, 4  ;;  %v3957_v42 = vsel %vm1134_vm11, %v3937_v17, 0.0  ;;  %v3634_v17 = vperm.slane %v3626_v59, 0 }
0x15ba   : > { %v3958_v46 = vrot.slane %v3957_v42, 4 }
0x15bb   : > { %v3952_v1 = vadd.f32 %v3951_v33, %v3950_v11  ;;  %v3855_v6 = vpop.permute.xlu0 %3854 }
0x15bc   : > { %v3853_v34 = vpop.permute.xlu1 %3852  ;;  %v7054_v60 = vadd.f32 %v3855_v6, %v3649_v23  ;;  %v3959_v41 = vadd.f32 %v3958_v46, %v3957_v42  ;;  %v3651_v42 = vmul.f32 %v5175_v61, %v3635_v30  ;;  %v3968_v46 = vadd.f32 %v3967_v27, %v3966_v13 }
0x15bd   : > { %v7057_v5 = vadd.f32 %v3853_v34, %v3648_v3  ;;  %v3953_v50 = vrot.slane %v3952_v1, 2  ;;  %v3650_v23 = vmul.f32 %v5174_v39, %v3634_v17 }
0x15be   : > { %v3940_v31 = vmul.f32 %v5190_v63, %v7054_v60  ;;  %v3960_v54 = vrot.slane %v3959_v41, 2  ;;  %v3969_v61 = vrot.slane %v3968_v46, 1 }
0x15bf   : > { %v3939_v7 = vmul.f32 %v5189_v35, %v7057_v5  ;;  %v3954_v44 = vadd.f32 %v3953_v50, %v3952_v1  ;;  %v3949_v1 = vadd.f32 %v3948_v51, %v3947_v52 }
0x15c0   : > { %v3978_v48 = vsel %vm1134_vm11, %v3940_v31, 0.0  ;;  %v3961_v15 = vadd.f32 %v3960_v54, %v3959_v41  ;;  %v3970_v13 = vadd.f32 %v3969_v61, %v3968_v46 }
0x15c1   : > { %v3971_v10 = vsel %vm1134_vm11, %v3939_v7, 0.0  ;;  %v3979_v57 = vrot.slane %v3978_v48, 4  ;;  %v3955_v24 = vrot.slane %v3954_v44, 1  ;;  %v3999_v7 = vpack.c.bf16 %v3949_v1, %v3949_v1 }
0x15c2   : > { %v3972_v25 = vrot.slane %v3971_v10, 4  ;;  %v3962_v11 = vrot.slane %v3961_v15, 1  ;;  %v4002_v27 = vpack.c.bf16 %v3970_v13, %v3970_v13 }
0x15c3   : > { %v3980_v62 = vadd.f32 %v3979_v57, %v3978_v48  ;;  %v3859_v53 = vpop.permute.xlu0 %3858  ;;  %v3956_v37 = vadd.f32 %v3955_v24, %v3954_v44 }
0x15c4   : > { %v3973_v45 = vadd.f32 %v3972_v25, %v3971_v10  ;;  %v3857_v56 = vpop.permute.xlu1 %3856  ;;  %v7073_v3 = vadd.f32 %v3859_v53, %v3651_v42  ;;  %v3963_v31 = vadd.f32 %v3962_v11, %v3961_v15  ;;  %v4018_v46 = vunpack.c.l.b16 %v4002_v27 }
0x15c5   : > { %v3981_v32 = vrot.slane %v3980_v62, 2  ;;  %v7077_v12 = vadd.f32 %v3857_v56, %v3650_v23  ;;  %v4000_v50 = vpack.c.bf16 %v3956_v37, %v3956_v37 }
0x15c6   : > { %v3974_v29 = vrot.slane %v3973_v45, 2  ;;  %v4001_v57 = vpack.c.bf16 %v3963_v31, %v3963_v31 }
0x15c7   : > { %v3982_v58 = vadd.f32 %v3981_v32, %v3980_v62  ;;  %v4016_v44 = vunpack.c.l.b16 %v4000_v50 }
0x15c8   : > { %v3975_v33 = vadd.f32 %v3974_v29, %v3973_v45  ;;  %v4015_v45 = vunpack.c.l.b16 %v3999_v7  ;;  %v4017_v62 = vunpack.c.l.b16 %v4001_v57  ;;  %v4143_v57 = vpack.c.bf16 %v7073_v3, %v7077_v12 }
0x15c9   : > { %v3983_v49 = vrot.slane %v3982_v58, 1 }
0x15ca   : > { %v3976_v18 = vrot.slane %v3975_v33, 1  ;;  %v4023_v24 = vsel %vm1215_vm12, %v4016_v44, %v4015_v45 }
0x15cb   : > { %v3984_v56 = vadd.f32 %v3983_v49, %v3982_v58  ;;  %v4024_v53 = vsel %vm1217_vm13, %v4017_v62, %v4023_v24  ;;  %v4142_v24 = vpack.c.bf16 %v7054_v60, %v7057_v5 }
0x15cc   : > { %v7075_v6 = vpop.permute.xlu1 %5192  ;;  %v3977_v54 = vadd.f32 %v3976_v18, %v3975_v33  ;;  %v4025_v58 = vsel %vm1219_vm14, %v4018_v46, %v4024_v53 }
0x15cd   : > { %v5195_v34 = vunpack.i.h.bf16 %v7075_v6  ;;  %v5194_v41 = vunpack.i.l.bf16 %v7075_v6  ;;  %v4004_v32 = vpack.c.bf16 %v3984_v56, %v3984_v56 }
0x15ce   : > { %v4003_v15 = vpack.c.bf16 %v3977_v54, %v3977_v54  ;;  %v4915_v54 = vld [vmem:[%s5816_s17 + $0x1c] sm:$0xf] }
0x15cf   : > { %v3941_v26 = vmul.f32 %v5194_v41, %v7077_v12  ;;  %v3942_v39 = vmul.f32 %v5195_v34, %v7073_v3  ;;  %v4020_v1 = vunpack.c.l.b16 %v4004_v32 }
0x15d0   : > { %v4019_v11 = vunpack.c.l.b16 %v4003_v15 }
0x15d1   : > { %v3985_v48 = vsel %vm1134_vm11, %v3941_v26, 0.0  ;;  %v3992_v10 = vsel %vm1134_vm11, %v3942_v39, 0.0 }
0x15d2   : > { %v3986_v25 = vrot.slane %v3985_v48, 4  ;;  %v3993_v8 = vrot.slane %v3992_v10, 4  ;;  %v4026_v61 = vsel %vm1221_vm15, %v4019_v11, %v4025_v58 }
0x15d3   : > { %v4027_v39 = vsel %vm1223_vm0, %v4020_v1, %v4026_v61 }
0x15d4   : > { %v3987_v59 = vadd.f32 %v3986_v25, %v3985_v48  ;;  %v3994_v52 = vadd.f32 %v3993_v8, %v3992_v10  ;;  %v4141_v10 = vpack.c.bf16 %v7023_v2, %v7029_v22  ;;  %v7106_v25 = vunpack.c.l.bf16 %v4915_v54 }
0x15d6   : > { %v3988_v29 = vrot.slane %v3987_v59, 2  ;;  %v3995_v30 = vrot.slane %v3994_v52, 2  ;;  %v4358_v8 = vperm.slane %v7106_v25, 2  ;;  %v4365_v13 = vperm.slane %v7106_v25, 3 }
0x15d8   : > { %v3989_v17 = vadd.f32 %v3988_v29, %v3987_v59  ;;  %v3996_v51 = vadd.f32 %v3995_v30, %v3994_v52  ;;  %v5201_v44 = vpack.i.bf16 %v4365_v13, %v4358_v8 }
0x15da   : > { %v3990_v33 = vrot.slane %v3989_v17, 1  ;;  %v3997_v42 = vrot.slane %v3996_v51, 1 }
0x15dc   : > { %v3991_v37 = vadd.f32 %v3990_v33, %v3989_v17  ;;  %v3998_v23 = vadd.f32 %v3997_v42, %v3996_v51  ;;  %v4344_v17 = vperm.slane %v7106_v25, 0  ;;  %v4351_v51 = vperm.slane %v7106_v25, 1 }
0x15de   : > { %v4005_v31 = vpack.c.bf16 %v3991_v37, %v3991_v37  ;;  %v4006_v18 = vpack.c.bf16 %v3998_v23, %v3998_v23  ;;  %v5196_v32 = vpack.i.bf16 %v4351_v51, %v4344_v17 }
0x15e0   : > { %v4021_v50 = vunpack.c.l.b16 %v4005_v31  ;;  %v4022_v26 = vunpack.c.l.b16 %v4006_v18 }
0x15e2   : > { %v4028_v7 = vsel %vm1225_vm1, %v4021_v50, %v4027_v39 }
0x15e3   : > { %v4029_v49 = vsel %vm1227_vm2, %v4022_v26, %v4028_v7  ;;  %v4909_v26 = vld [vmem:[%s5796_s15 + $0x1c] sm:$0xf]  ;;  %s5629_s15 = smov 64  }
0x15e4   : > { %v4030_v48 = vpack.c.b16 %v4029_v49, %v4029_v49 }
0x15e6   : > { %4031 = vrot.lane.b32.xlu2 %v4030_v48, %s5628_s24 }
0x15ee   : > { %4150 = vrot.lane.b32.xlu2 %v4141_v10, %s5628_s24 }
0x15f6   : > { %4154 = vrot.lane.b32.xlu2 %v4143_v57, %s5628_s24 }
0x15fe   : > { %4273 = vrot.lane.b32.xlu2 %v7029_v22, %s5628_s24  ;;  %v4908_v22 = vld [vmem:[%s5821_s28 + $0x1c] sm:$0xf]  ;;  %s7337_s28 = sld [smem:[#allocation23_spill]] }
0x15ff   : > { %v4071_v56 = vunpack.c.l.bf16 %v4908_v22 }
0x1604   : > { %s4625_s25 = scalar_lea.vmem %s7337_s28, %s5809_s21 }
0x1606   : > { %4279 = vrot.lane.b32.xlu2 %v7054_v60, %s5628_s24 }
0x160e   : > { %5202 = vperm.xlu2 %5054, %v5201_v44  }
0x162a   : > { %v4149_v52 = vpop.permute.xlu1 %4148 }
0x1640   : > { %v4032_v59 = vpop.permute.xlu2 %4031 }
0x1641   : > { %4906 = vmatmul.msk.bf16.vlgmr.msrb.gmra.mxu1 %vm882_vm10, %v4032_v59 }
0x1648   : > { %v4151_v45 = vpop.permute.xlu2 %4150 }
0x1650   : > { %v4155_v37 = vpop.permute.xlu2 %4154 }
0x1651   : > { %4911 = vmatmul.msk.bf16.vlgmr.msra.gmra.mxu1 %vm882_vm10, %v4149_v52 }
0x1661   : > { %4912 = vmatmul.msk.bf16.gmra.mxu1 %vm882_vm10, %v4151_v45 }
0x16be   : > { %v7116_v62 = vpop.f32.mrf.mxu1 }
0x16bf   : > { %v4072_v15 = vadd.f32 %v4071_v56, %v7116_v62 }
0x16c1   : > { %5376 = vtanh.f32 %v4072_v15  ;;  %v4074_v53 = vmul.f32 0.5, %v4072_v15 }
0x16c3   : > { %5378 = vtanh.f32 %v4074_v53 }
0x16c6   : > { %v4047_v29 = vpop.f32.mrf.mxu1 }
0x16c7   : > { %v5377_v30 = vpop.eup %5376 }
0x16c8   : > { %v4078_v27 = vadd.f32 1.0, %v5377_v30 }
0x16c9   : > { %v5379_v60 = vpop.eup %5378 }
0x16ca   : > { %4080 = vrot.lane.b32.xlu0 %v4078_v27, %s5627_s12  ;;  %v4076_v11 = vmul.f32 0.5, %v5379_v60 }
0x16cc   : > { %v4077_v33 = vadd.f32 0.5, %v4076_v11 }
0x16ce   : > { %v4177_v1 = vpop.f32.mrf.mxu1 }
0x16d2   : > { %4152 = vrot.lane.b32.xlu0 %v4142_v24, %s5628_s24 }
0x16d6   : > { %v4179_v58 = vpop.f32.mrf.mxu1 }
0x16da   : > { %4269 = vrot.lane.b32.xlu0 %v7008_v36, %s5628_s24 }
0x16de   : > { %v4182_v31 = vpop.f32.mrf.mxu1 }
0x16e2   : > { %4275 = vrot.lane.b32.xlu0 %v7023_v2, %s5628_s24 }
0x16e6   : > { %v4184_v18 = vpop.f32.mrf.mxu1 }
0x16ea   : > { %4281 = vrot.lane.b32.xlu0 %v7077_v12, %s5628_s24 }
0x16f2   : > { %5197 = vperm.xlu0 %5055, %v5196_v32  }
0x173c   : > { %v4081_v42 = vpop.permute.xlu0 %4080 }
0x173d   : > { %v4083_v46 = vmul.f32 %v4081_v42, %v4077_v33 }
0x173f   : > { %v7131_v36 = vmul.f32 0.5, %v4083_v46 }
0x1741   : > { %v4117_v2 = vpack.c.bf16 %v7131_v36, %v7131_v36 }
0x1743   : > { %4122 = vrot.lane.b32.xlu1 %v4117_v2, %s5628_s24 }
0x1744   : > { %v4153_v12 = vpop.permute.xlu0 %4152 }
0x1745   : > { %4913 = vmatmul.msk.bf16.gmra.mxu1 %vm882_vm10, %v4153_v12 }
0x174b   : > { %4271 = vrot.lane.b32.xlu1 %v7025_v9, %s5628_s24  ;;  %v4120_v9 = vunpack.c.l.bf16 %v4909_v26 }
0x1753   : > { %4277 = vrot.lane.b32.xlu1 %v7057_v5, %s5628_s24 }
0x1755   : > { %4914 = vmatmul.msk.bf16.gmra.mxu1 %vm882_vm10, %v4155_v37 }
0x175b   : > { %4283 = vrot.lane.b32.xlu1 %v7073_v3, %s5628_s24 }
0x17b5   : > { %v4123_v23 = vpop.permute.xlu1 %4122 }
0x17b6   : > { %4910 = vmatmul.msk.bf16.vlgmr.msrb.gmra.mxu3 %vm882_vm10, %v4123_v23 }
0x17c2   : > { %v4187_v61 = vpop.f32.mrf.mxu1 }
0x17ca   : > { %v4189_v50 = vpop.f32.mrf.mxu1 }
0x17d2   : > { %v4192_v5 = vpop.f32.mrf.mxu1 }
0x17da   : > { %v4194_v2 = vpop.f32.mrf.mxu1 }
0x1839   : > { %v4136_v39 = vpop.f32.mrf.mxu3 }
0x183a   : > { %v4137_v7 = vadd.f32 %v4136_v39, %v4120_v9 }
0x183c   : > { %v4205_v49 = vperm.slane %v4137_v7, 0  ;;  %v4198_v48 = vrot.slane %v4137_v7, 1  ;;  %v4199_v10 = vrot.slane %v4137_v7, 2  ;;  %v4200_v57 = vrot.slane %v4137_v7, 3 }
0x183d   : > { %v4201_v54 = vrot.slane %v4137_v7, 4  ;;  %v4202_v3 = vrot.slane %v4137_v7, 5  ;;  %v4203_v22 = vrot.slane %v4137_v7, 6  ;;  %v4204_v56 = vrot.slane %v4137_v7, 7 }
0x183e   : > { %v4221_v8 = vadd.f32 %v4205_v49, %v4177_v1  ;;  %v4206_v13 = vperm.slane %v4198_v48, 0  ;;  %v4207_v44 = vperm.slane %v4199_v10, 0  ;;  %v4208_v59 = vperm.slane %v4200_v57, 0  ;;  %v4274_v49 = vpop.permute.xlu2 %4273 }
0x183f   : > { %v4209_v52 = vperm.slane %v4201_v54, 0  ;;  %v4210_v45 = vperm.slane %v4202_v3, 0  ;;  %v4212_v32 = vperm.slane %v4204_v56, 0  ;;  %v4211_v42 = vperm.slane %v4203_v22, 0 }
0x1840   : > { %v4229_v15 = vmul.f32 0.5, %v4221_v8  ;;  %v4222_v29 = vadd.f32 %v4206_v13, %v4179_v58  ;;  %v4223_v30 = vadd.f32 %v4207_v44, %v4182_v31  ;;  %v4224_v27 = vadd.f32 %v4208_v59, %v4184_v18  ;;  %v4270_v31 = vpop.permute.xlu0 %4269  ;;  %v4272_v18 = vpop.permute.xlu1 %4271 }
0x1841   : > { %v4138_v24 = vpop.f32.mrf.mxu3  ;;  %v4225_v17 = vadd.f32 %v4209_v52, %v4187_v61  ;;  %v4226_v51 = vadd.f32 %v4210_v45, %v4189_v50  ;;  %v4228_v12 = vadd.f32 %v4212_v32, %v4194_v2  ;;  %v4227_v37 = vadd.f32 %v4211_v42, %v4192_v5 }
0x1842   : > { %5380 = vtanh.f32 %v4229_v15  ;;  %v4230_v53 = vmul.f32 0.5, %v4222_v29  ;;  %v4231_v60 = vmul.f32 0.5, %v4223_v30  ;;  %v4232_v11 = vmul.f32 0.5, %v4224_v27 }
0x1843   : > { %v4233_v33 = vmul.f32 0.5, %v4225_v17  ;;  %v4234_v46 = vmul.f32 0.5, %v4226_v51  ;;  %v4236_v61 = vmul.f32 0.5, %v4228_v12  ;;  %v4235_v39 = vmul.f32 0.5, %v4227_v37  ;;  %v1260_v37 = vld [vmem:[%s5802_s13] sm:$0xff]  }
0x1844   : > { %5382 = vtanh.f32 %v4230_v53  ;;  %v4372_v32 = vperm.slane %v7106_v25, 4  ;;  %v4379_v53 = vperm.slane %v7106_v25, 5 }
0x1845   : > { %5384 = vtanh.f32 %v4231_v60 }
0x1846   : > { %5386 = vtanh.f32 %v4232_v11  ;;  %v4280_v17 = vpop.permute.xlu2 %4279  ;;  %v5206_v42 = vpack.i.bf16 %v4379_v53, %v4372_v32 }
0x1847   : > { %5388 = vtanh.f32 %v4233_v33 }
0x1848   : > { %v5381_v23 = vpop.eup %5380  ;;  %5390 = vtanh.f32 %v4234_v46  ;;  %v4276_v15 = vpop.permute.xlu0 %4275 }
0x1849   : > { %v4245_v1 = vmul.f32 0.5, %v5381_v23  ;;  %5392 = vtanh.f32 %v4236_v61  ;;  %v4278_v29 = vpop.permute.xlu1 %4277  ;;  %v4386_v61 = vperm.slane %v7106_v25, 6 }
0x184a   : > { %v5383_v58 = vpop.eup %5382  ;;  %5394 = vtanh.f32 %v4235_v39 }
0x184b   : > { %v5385_v50 = vpop.eup %5384  ;;  %v4253_v26 = vadd.f32 0.5, %v4245_v1  ;;  %v4246_v9 = vmul.f32 0.5, %v5383_v58 }
0x184c   : > { %v5387_v7 = vpop.eup %5386  ;;  %v4247_v48 = vmul.f32 0.5, %v5385_v50  ;;  %v4393_v50 = vperm.slane %v7106_v25, 7 }
0x184d   : > { %v5389_v10 = vpop.eup %5388  ;;  %v4293_v57 = vmul.f32 %v4270_v31, %v4253_v26  ;;  %v4254_v54 = vadd.f32 0.5, %v4246_v9  ;;  %v4248_v3 = vmul.f32 0.5, %v5387_v7  ;;  %v1261_v31 = vunpack.c.l.bf16 %v1260_v37 }
0x184e   : > { %v5391_v8 = vpop.eup %5390  ;;  %v4255_v5 = vadd.f32 0.5, %v4247_v48  ;;  %v4249_v52 = vmul.f32 0.5, %v5389_v10  ;;  %v5211_v9 = vpack.i.bf16 %v4393_v50, %v4386_v61  ;;  %v5203_v39 = vpop.permute.xlu2 %5202  ;;  %v4088_v10 = vrot.slane %v7131_v36, 3 }
0x184f   : > { %4309 = vrot.lane.b32.xlu2 %v4293_v57, %s5627_s12  ;;  %v4294_v13 = vmul.f32 %v4272_v18, %v4254_v54  ;;  %v4250_v44 = vmul.f32 0.5, %v5391_v8  ;;  %v4256_v45 = vadd.f32 0.5, %v4248_v3  ;;  %v5393_v56 = vpop.eup %5392  ;;  %v1726_v18 = vunpack.c.h.bf16 %v1260_v37 }
0x1850   : > { %v4295_v59 = vmul.f32 %v4274_v49, %v4255_v5  ;;  %v4257_v30 = vadd.f32 0.5, %v4249_v52  ;;  %v5395_v27 = vpop.eup %5394  ;;  %v4252_v60 = vmul.f32 0.5, %v5393_v56  ;;  %v4282_v23 = vpop.permute.xlu0 %4281  ;;  %v4093_v49 = vperm.slane %v7131_v36, 0 }
0x1851   : > { %4311 = vrot.lane.b32.xlu0 %v4294_v13, %s5627_s12  ;;  %v4258_v22 = vadd.f32 0.5, %v4250_v44  ;;  %v4296_v24 = vmul.f32 %v4276_v15, %v4256_v45  ;;  %v4251_v33 = vmul.f32 0.5, %v5395_v27  ;;  %v4284_v12 = vpop.permute.xlu1 %4283  ;;  %v5216_v26 = vpack.i.bf16 %v1726_v18, %v1261_v31 }
0x1852   : > { %4313 = vrot.lane.b32.xlu1 %v4295_v59, %s5627_s12  ;;  %v4297_v11 = vmul.f32 %v4278_v29, %v4257_v30  ;;  %v4260_v46 = vadd.f32 0.5, %v4252_v60  ;;  %v4109_v48 = vmul.f32 %v5179_v40, %v4093_v49  ;;  %v4086_v57 = vrot.slane %v7131_v36, 1 }
0x1853   : > { %v4298_v51 = vmul.f32 %v4280_v17, %v4258_v22  ;;  %v4259_v2 = vadd.f32 0.5, %v4251_v33  ;;  %v4087_v3 = vrot.slane %v7131_v36, 2  ;;  %v4096_v13 = vperm.slane %v4088_v10, 0 }
0x1854   : > { %v4300_v1 = vmul.f32 %v4284_v12, %v4260_v46  ;;  %v4094_v44 = vperm.slane %v4086_v57, 0  ;;  %v4090_v56 = vrot.slane %v7131_v36, 5  ;;  %v4089_v30 = vrot.slane %v7131_v36, 4 }
0x1855   : > { %v4299_v58 = vmul.f32 %v4282_v23, %v4259_v2  ;;  %v4095_v52 = vperm.slane %v4087_v3, 0  ;;  %v4112_v22 = vmul.f32 %v5185_v0, %v4096_v13  ;;  %v5204_v0 = vunpack.i.l.bf16 %v5203_v39 }
0x1856   : > { %v4110_v40 = vmul.f32 %v5180_v4, %v4094_v44  ;;  %v5205_v19 = vunpack.i.h.bf16 %v5203_v39  ;;  %v4098_v60 = vperm.slane %v4090_v56, 0 }
0x1857   : > { %4315 = vrot.lane.b32.xlu2 %v4296_v24, %s5627_s12  ;;  %v4111_v29 = vmul.f32 %v5184_v14, %v4095_v52  ;;  %v4097_v14 = vperm.slane %v4089_v30, 0 }
0x1858   : > { %v5198_v54 = vpop.permute.xlu0 %5197  ;;  %v4114_v23 = vmul.f32 %v5190_v63, %v4098_v60 }
0x1859   : > { %4319 = vrot.lane.b32.xlu0 %v4298_v51, %s5627_s12  ;;  %v5199_v5 = vunpack.i.l.bf16 %v5198_v54  ;;  %v5200_v27 = vunpack.i.h.bf16 %v5198_v54  ;;  %v4113_v31 = vmul.f32 %v5189_v35, %v4097_v14 }
0x185a   : > { %4317 = vrot.lane.b32.xlu1 %v4297_v11, %s5627_s12 }
0x185f   : > { %5207 = vperm.xlu2 %5054, %v5206_v42  }
0x1861   : > { %4323 = vrot.lane.b32.xlu0 %v4300_v1, %s5627_s12 }
0x1862   : > { %4321 = vrot.lane.b32.xlu1 %v4299_v58, %s5627_s12 }
0x1869   : > { %5217 = vrot.lane.b32.xlu0 %v5216_v26, %s5629_s15 }
0x186a   : > { %5212 = vperm.xlu1 %5053, %v5211_v9  }
0x18a9   : > { %v4310_v7 = vpop.permute.xlu2 %4309 }
0x18aa   : > { %v7166_v8 = vadd.f32 %v4310_v7, %v4109_v48 }
0x18ac   : > { %v4400_v45 = vmul.f32 %v5199_v5, %v7166_v8 }
0x18ae   : > { %v4408_v24 = vsel %vm1134_vm11, %v4400_v45, 0.0 }
0x18af   : > { %v4409_v11 = vrot.slane %v4408_v24, 4 }
0x18b1   : > { %v4316_v59 = vpop.permute.xlu2 %4315  ;;  %v4410_v1 = vadd.f32 %v4409_v11, %v4408_v24 }
0x18b2   : > { %v7178_v17 = vadd.f32 %v4316_v59, %v4112_v22  ;;  %v4092_v59 = vrot.slane %v7131_v36, 7 }
0x18b3   : > { %v4411_v63 = vrot.slane %v4410_v1, 2 }
0x18b4   : > { %v4403_v33 = vmul.f32 %v5205_v19, %v7178_v17 }
0x18b5   : > { %v4412_v52 = vadd.f32 %v4411_v63, %v4410_v1 }
0x18b6   : > { %v4429_v61 = vsel %vm1134_vm11, %v4403_v33, 0.0 }
0x18b7   : > { %v4430_v57 = vrot.slane %v4429_v61, 4 }
0x18b9   : > { %v5208_v46 = vpop.permute.xlu2 %5207  ;;  %v4431_v45 = vadd.f32 %v4430_v57, %v4429_v61 }
0x18ba   : > { %v5210_v50 = vunpack.i.h.bf16 %v5208_v46  ;;  %v5209_v7 = vunpack.i.l.bf16 %v5208_v46 }
0x18bb   : > { %v4432_v19 = vrot.slane %v4431_v45, 2 }
0x18bd   : > { %v4433_v46 = vadd.f32 %v4432_v19, %v4431_v45 }
0x18c3   : > { %v4312_v15 = vpop.permute.xlu0 %4311 }
0x18c4   : > { %v7180_v51 = vadd.f32 %v4312_v15, %v4110_v40  ;;  %v4314_v32 = vpop.permute.xlu1 %4313  ;;  %v4091_v40 = vrot.slane %v7131_v36, 6 }
0x18c5   : > { %v7182_v53 = vadd.f32 %v4314_v32, %v4111_v29  ;;  %v4100_v32 = vperm.slane %v4092_v59, 0 }
0x18c6   : > { %v4401_v4 = vmul.f32 %v5200_v27, %v7180_v51  ;;  %v4099_v60 = vperm.slane %v4091_v40, 0 }
0x18c7   : > { %v4402_v38 = vmul.f32 %v5204_v0, %v7182_v53  ;;  %v4413_v0 = vrot.slane %v4412_v52, 1  ;;  %v4116_v33 = vmul.f32 %v5195_v34, %v4100_v32 }
0x18c8   : > { %v4415_v42 = vsel %vm1134_vm11, %v4401_v4, 0.0 }
0x18c9   : > { %v4416_v2 = vrot.slane %v4415_v42, 4  ;;  %v4422_v12 = vsel %vm1134_vm11, %v4402_v38, 0.0 }
0x18ca   : > { %v4423_v37 = vrot.slane %v4422_v12, 4 }
0x18cb   : > { %v4417_v58 = vadd.f32 %v4416_v2, %v4415_v42  ;;  %v4320_v18 = vpop.permute.xlu0 %4319  ;;  %v4414_v42 = vadd.f32 %v4413_v0, %v4412_v52  ;;  %v4115_v2 = vmul.f32 %v5194_v41, %v4099_v60 }
0x18cc   : > { %v4424_v26 = vadd.f32 %v4423_v37, %v4422_v12  ;;  %v4318_v9 = vpop.permute.xlu1 %4317  ;;  %v7194_v39 = vadd.f32 %v4320_v18, %v4114_v23 }
0x18cd   : > { %v4418_v49 = vrot.slane %v4417_v58, 2  ;;  %v7196_v48 = vadd.f32 %v4318_v9, %v4113_v31 }
0x18ce   : > { %v4405_v10 = vmul.f32 %v5210_v50, %v7194_v39  ;;  %v4425_v54 = vrot.slane %v4424_v26, 2 }
0x18cf   : > { %v4404_v47 = vmul.f32 %v5209_v7, %v7196_v48  ;;  %v4419_v35 = vadd.f32 %v4418_v49, %v4417_v58  ;;  %v4434_v49 = vrot.slane %v4433_v46, 1 }
0x18d0   : > { %v4443_v3 = vsel %vm1134_vm11, %v4405_v10, 0.0  ;;  %v4426_v22 = vadd.f32 %v4425_v54, %v4424_v26  ;;  %v4464_v10 = vpack.c.bf16 %v4414_v42, %v4414_v42 }
0x18d1   : > { %v4436_v5 = vsel %vm1134_vm11, %v4404_v47, 0.0  ;;  %v4444_v13 = vrot.slane %v4443_v3, 4  ;;  %v4420_v15 = vrot.slane %v4419_v35, 1 }
0x18d2   : > { %v4437_v44 = vrot.slane %v4436_v5, 4  ;;  %v4427_v4 = vrot.slane %v4426_v22, 1  ;;  %v4480_v59 = vunpack.c.l.b16 %v4464_v10 }
0x18d3   : > { %v4324_v56 = vpop.permute.xlu0 %4323  ;;  %v4445_v27 = vadd.f32 %v4444_v13, %v4443_v3  ;;  %v4421_v11 = vadd.f32 %v4420_v15, %v4419_v35 }
0x18d4   : > { %v4438_v29 = vadd.f32 %v4437_v44, %v4436_v5  ;;  %v4322_v30 = vpop.permute.xlu1 %4321  ;;  %v4428_v36 = vadd.f32 %v4427_v4, %v4426_v22  ;;  %v7208_v23 = vadd.f32 %v4324_v56, %v4116_v33 }
0x18d5   : > { %v4446_v38 = vrot.slane %v4445_v27, 2  ;;  %v4465_v37 = vpack.c.bf16 %v4421_v11, %v4421_v11  ;;  %v7210_v61 = vadd.f32 %v4322_v30, %v4115_v2 }
0x18d6   : > { %v4439_v24 = vrot.slane %v4438_v29, 2  ;;  %v4466_v63 = vpack.c.bf16 %v4428_v36, %v4428_v36 }
0x18d7   : > { %v4447_v18 = vadd.f32 %v4446_v38, %v4445_v27  ;;  %v4481_v47 = vunpack.c.l.b16 %v4465_v37 }
0x18d8   : > { %v4440_v14 = vadd.f32 %v4439_v24, %v4438_v29  ;;  %v4482_v22 = vunpack.c.l.b16 %v4466_v63 }
0x18d9   : > { %v4448_v35 = vrot.slane %v4447_v18, 1  ;;  %v4488_v56 = vsel %vm1215_vm12, %v4481_v47, %v4480_v59  ;;  %vm4576_vm12 = vcmask 64512  }
0x18da   : > { %v4441_v9 = vrot.slane %v4440_v14, 1  ;;  %v4489_v4 = vsel %vm1217_vm13, %v4482_v22, %v4488_v56  ;;  %v4887_v22 = vld [vmem:[%s5802_s13 + $0x10] sm:$0xff]   ;;  %4577 = vst.msk [vmem:[#allocation4] sm:$0xff] %vm4576_vm12, %v7106_v25 }
0x18db   : > { %v5218_v12 = vpop.permute.xlu0 %5217  ;;  %v4449_v40 = vadd.f32 %v4448_v35, %v4447_v18  ;;  %v3121_v56 = vunpack.c.l.bf16 %v4887_v22 }
0x18dc   : > { %v5213_v1 = vpop.permute.xlu1 %5212  ;;  %v5220_v58 = vunpack.i.h.bf16 %v5218_v12  ;;  %v5219_v31 = vunpack.i.l.bf16 %v5218_v12  ;;  %v4442_v13 = vadd.f32 %v4441_v9, %v4440_v14 }
0x18dd   : > { %v5215_v50 = vunpack.i.h.bf16 %v5213_v1  ;;  %v5214_v26 = vunpack.i.l.bf16 %v5213_v1  ;;  %v4469_v60 = vpack.c.bf16 %v4449_v40, %v4449_v40  ;;  %v4907_v40 = vld [vmem:[%s5802_s13 + $0x18] sm:$0xff]  }
0x18de   : > { %v1731_v34 = vadd.f32 %v5220_v58, %v6298_v21  ;;  %v1266_v7 = vadd.f32 %v5219_v31, %v6132_v43  ;;  %v4435_v43 = vadd.f32 %v4434_v49, %v4433_v46  ;;  %v4468_v15 = vpack.c.bf16 %v4442_v13, %v4442_v13  ;;  %v4867_v46 = vld [vmem:[%s5802_s13 + $0x8] sm:$0xff]  }
0x18df   : > { %v4406_v6 = vmul.f32 %v5214_v26, %v7210_v61  ;;  %v4407_v41 = vmul.f32 %v5215_v50, %v7208_v23  ;;  %v4485_v58 = vunpack.c.l.b16 %v4469_v60  ;;  %v2191_v31 = vunpack.c.l.bf16 %v4867_v46 }
0x18e0   : > { %v1732_v57 = vmul.f32 0.5, %v1731_v34  ;;  %v1267_v54 = vmul.f32 0.5, %v1266_v7  ;;  %v4467_v27 = vpack.c.bf16 %v4435_v43, %v4435_v43  ;;  %v4484_v38 = vunpack.c.l.b16 %v4468_v15 }
0x18e1   : > { %v4450_v3 = vsel %vm1134_vm11, %v4406_v6, 0.0  ;;  %v4457_v5 = vsel %vm1134_vm11, %v4407_v41, 0.0  ;;  %v2656_v18 = vunpack.c.h.bf16 %v4867_v46  ;;  %v3586_v15 = vunpack.c.h.bf16 %v4887_v22 }
0x18e2   : > { %v4451_v44 = vrot.slane %v4450_v3, 4  ;;  %v4458_v21 = vrot.slane %v4457_v5, 4  ;;  %5396 = vtanh.f32 %v1732_v57  ;;  %v4483_v36 = vunpack.c.l.b16 %v4467_v27 }
0x18e3   : > { %5398 = vtanh.f32 %v1267_v54  ;;  %v5221_v6 = vpack.i.bf16 %v2656_v18, %v2191_v31  ;;  %vm4590_vm11 = vcmask 56320  }
0x18e4   : > { %v4452_v52 = vadd.f32 %v4451_v44, %v4450_v3  ;;  %v4459_v45 = vadd.f32 %v4458_v21, %v4457_v5  ;;  %v4490_v50 = vsel %vm1219_vm14, %v4483_v36, %v4489_v4 }
0x18e5   : > { %v4491_v34 = vsel %vm1221_vm15, %v4484_v38, %v4490_v50 }
0x18e6   : > { %v4453_v29 = vrot.slane %v4452_v52, 2  ;;  %v4460_v30 = vrot.slane %v4459_v45, 2  ;;  %v4492_v41 = vsel %vm1223_vm0, %v4485_v58, %v4491_v34 }
0x18e8   : > { %v5397_v24 = vpop.eup %5396  ;;  %v4454_v32 = vadd.f32 %v4453_v29, %v4452_v52  ;;  %v4461_v0 = vadd.f32 %v4460_v30, %v4459_v45  ;;  %v4051_v29 = vunpack.c.l.bf16 %v4907_v40  ;;  %v4516_v30 = vunpack.c.h.bf16 %v4907_v40 }
0x18e9   : > { %v5399_v19 = vpop.eup %5398  ;;  %v1734_v11 = vmul.f32 0.5, %v5397_v24 }
0x18ea   : > { %v4455_v14 = vrot.slane %v4454_v32, 1  ;;  %v4462_v33 = vrot.slane %v4461_v0, 1  ;;  %v1269_v42 = vmul.f32 0.5, %v5399_v19 }
0x18eb   : > { %v1735_v2 = vadd.f32 0.5, %v1734_v11 }
0x18ec   : > { %v4456_v12 = vadd.f32 %v4455_v14, %v4454_v32  ;;  %v4463_v37 = vadd.f32 %v4462_v33, %v4461_v0  ;;  %v1270_v1 = vadd.f32 0.5, %v1269_v42  ;;  %v5226_v32 = vpack.i.bf16 %v3586_v15, %v3121_v56 }
0x18ed   : > { %1737 = vrot.lane.b32.xlu0 %v1735_v2, %s5629_s15  ;;  %v5231_v0 = vpack.i.bf16 %v4516_v30, %v4051_v29 }
0x18ee   : > { %v4470_v26 = vpack.c.bf16 %v4456_v12, %v4456_v12  ;;  %v4471_v9 = vpack.c.bf16 %v4463_v37, %v4463_v37  ;;  %1272 = vrot.lane.b32.xlu1 %v1270_v1, %s5629_s15 }
0x18f0   : > { %v4486_v7 = vunpack.c.l.b16 %v4470_v26  ;;  %v4487_v49 = vunpack.c.l.b16 %v4471_v9 }
0x18f2   : > { %v4493_v10 = vsel %vm1225_vm1, %v4486_v7, %v4492_v41 }
0x18f3   : > { %v4494_v63 = vsel %vm1227_vm2, %v4487_v49, %v4493_v10 }
0x18f4   : > { %v4495_v57 = vpack.c.b16 %v4494_v63, %v4494_v63 }
0x18f5   : > { %5222 = vrot.lane.b32.xlu0 %v5221_v6, %s5629_s15 }
0x18f6   : > { %4496 = vrot.lane.b32.xlu2 %v4495_v57, %s5628_s24 }
0x1950   : > { %v4497_v54 = vpop.permute.xlu2 %4496 }
0x1951   : > { %4916 = vmatmul.msk.bf16.vlgmr.msra.gmra.mxu3 %vm882_vm10, %v4497_v54 }
0x195f   : > { %v1738_v47 = vpop.permute.xlu0 %1737 }
0x1960   : > { %v1740_v35 = vsel %vm882_vm10, %v1738_v47, 0.0  ;;  %v1273_v3 = vpop.permute.xlu1 %1272 }
0x1961   : > { %v1275_v5 = vsel %vm882_vm10, %v1273_v3, 0.0  ;;  %1741 = vadd.xlane.f32.xlu1 %v1740_v35 }
0x1962   : > { %1276 = vadd.xlane.f32.xlu2 %v1275_v5 }
0x1967   : > { %v5223_v13 = vpop.permute.xlu0 %5222 }
0x1968   : > { %v5225_v44 = vunpack.i.h.bf16 %v5223_v13  ;;  %v5224_v21 = vunpack.i.l.bf16 %v5223_v13 }
0x196a   : > { %v2196_v43 = vadd.f32 %v5224_v21, %v6464_v16  ;;  %v2661_v59 = vadd.f32 %v5225_v44, %v6633_v20 }
0x196c   : > { %v2197_v52 = vmul.f32 0.5, %v2196_v43  ;;  %v2662_v45 = vmul.f32 0.5, %v2661_v59 }
0x196e   : > { %5400 = vtanh.f32 %v2197_v52 }
0x196f   : > { %5402 = vtanh.f32 %v2662_v45 }
0x1974   : > { %v5401_v27 = vpop.eup %5400 }
0x1975   : > { %v2199_v24 = vmul.f32 0.5, %v5401_v27  ;;  %v5403_v4 = vpop.eup %5402 }
0x1976   : > { %v2664_v16 = vmul.f32 0.5, %v5403_v4 }
0x1977   : > { %v2200_v19 = vadd.f32 0.5, %v2199_v24 }
0x1978   : > { %v2665_v20 = vadd.f32 0.5, %v2664_v16 }
0x1979   : > { %2202 = vrot.lane.b32.xlu0 %v2200_v19, %s5629_s15 }
0x197a   : > { %5227 = vrot.lane.b32.xlu2 %v5226_v32, %s5629_s15  ;;  %5232 = vrot.lane.b32.xlu1 %v5231_v0, %s5629_s15 }
0x1982   : > { %2667 = vrot.lane.b32.xlu2 %v2665_v20, %s5629_s15 }
0x19d4   : > { %v4510_v60 = vpop.f32.mrf.mxu3  ;;  %v1742_v11 = vpop.xlane.xlu1 %1741 }
0x19d5   : > { %4575 = vst.msk [vmem:[#allocation3] sm:$0xff] %vm4574_vm3, %v4510_v60  ;;  %v1743_v38 = vmul.f32 0.03125, %v1742_v11  ;;  %v1277_v14 = vpop.xlane.xlu2 %1276 }
0x19d6   : > { %v1278_v33 = vmul.f32 0.03125, %v1277_v14 }
0x19d8   : > { %v4579_v42 = vsel %vm4578_vm4, %v1278_v33, %v1743_v38 }
0x19dc   : > { %v4512_v46 = vpop.f32.mrf.mxu3 }
0x19dd   : > { %v5228_v36 = vpop.permute.xlu2 %5227 }
0x19de   : > { %v5229_v37 = vunpack.i.l.bf16 %v5228_v36  ;;  %v5230_v18 = vunpack.i.h.bf16 %v5228_v36 }
0x19e0   : > { %v3126_v1 = vadd.f32 %v5229_v37, %v6792_v55  ;;  %v3591_v26 = vadd.f32 %v5230_v18, %v6957_v28 }
0x19e2   : > { %v3127_v50 = vmul.f32 0.5, %v3126_v1  ;;  %v3592_v34 = vmul.f32 0.5, %v3591_v26 }
0x19e4   : > { %5404 = vtanh.f32 %v3127_v50 }
0x19e5   : > { %v2668_v2 = vpop.permute.xlu2 %2667  ;;  %5406 = vtanh.f32 %v3592_v34 }
0x19e6   : > { %v2670_v12 = vsel %vm882_vm10, %v2668_v2, 0.0 }
0x19e7   : > { %2671 = vadd.xlane.f32.xlu2 %v2670_v12 }
0x19ea   : > { %v5405_v49 = vpop.eup %5404 }
0x19eb   : > { %v2203_v58 = vpop.permute.xlu0 %2202  ;;  %v3129_v41 = vmul.f32 0.5, %v5405_v49  ;;  %v5407_v57 = vpop.eup %5406 }
0x19ec   : > { %v2205_v31 = vsel %vm882_vm10, %v2203_v58, 0.0  ;;  %v5233_v9 = vpop.permute.xlu1 %5232  ;;  %v3594_v47 = vmul.f32 0.5, %v5407_v57 }
0x19ed   : > { %2206 = vadd.xlane.f32.xlu0 %v2205_v31  ;;  %v5234_v7 = vunpack.i.l.bf16 %v5233_v9  ;;  %v5235_v10 = vunpack.i.h.bf16 %v5233_v9  ;;  %v3130_v55 = vadd.f32 0.5, %v3129_v41 }
0x19ee   : > { %v3595_v28 = vadd.f32 0.5, %v3594_v47 }
0x19ef   : > { %v4056_v6 = vadd.f32 %v5234_v7, %v7116_v62  ;;  %v4521_v54 = vadd.f32 %v5235_v10, %v4510_v60 }
0x19f1   : > { %v4057_v63 = vmul.f32 0.5, %v4056_v6  ;;  %v4522_v35 = vmul.f32 0.5, %v4521_v54 }
0x19f3   : > { %5408 = vtanh.f32 %v4057_v63 }
0x19f4   : > { %5410 = vtanh.f32 %v4522_v35 }
0x19f9   : > { %v5409_v3 = vpop.eup %5408 }
0x19fa   : > { %v4059_v5 = vmul.f32 0.5, %v5409_v3  ;;  %v5411_v44 = vpop.eup %5410 }
0x19fb   : > { %v4524_v62 = vmul.f32 0.5, %v5411_v44 }
0x19fc   : > { %v4060_v13 = vadd.f32 0.5, %v4059_v5 }
0x19fd   : > { %v4525_v21 = vadd.f32 0.5, %v4524_v62 }
0x1a01   : > { %3132 = vrot.lane.b32.xlu0 %v3130_v55, %s5629_s15 }
0x1a09   : > { %3597 = vrot.lane.b32.xlu0 %v3595_v28, %s5629_s15 }
0x1a11   : > { %4062 = vrot.lane.b32.xlu0 %v4060_v13, %s5629_s15 }
0x1a19   : > { %4527 = vrot.lane.b32.xlu0 %v4525_v21, %s5629_s15 }
0x1a60   : > { %v2207_v43 = vpop.xlane.xlu0 %2206 }
0x1a61   : > { %v2208_v59 = vmul.f32 0.03125, %v2207_v43 }
0x1a63   : > { %v4581_v52 = vsel %vm4580_vm5, %v4579_v42, %v2208_v59 }
0x1a73   : > { %v3133_v45 = vpop.permute.xlu0 %3132 }
0x1a74   : > { %v3135_v22 = vsel %vm882_vm10, %v3133_v45, 0.0 }
0x1a75   : > { %3136 = vadd.xlane.f32.xlu1 %v3135_v22 }
0x1a7b   : > { %v3598_v40 = vpop.permute.xlu0 %3597 }
0x1a7c   : > { %v3600_v56 = vsel %vm882_vm10, %v3598_v40, 0.0 }
0x1a7d   : > { %3601 = vadd.xlane.f32.xlu2 %v3600_v56 }
0x1a83   : > { %v4063_v15 = vpop.permute.xlu0 %4062 }
0x1a84   : > { %v4065_v29 = vsel %vm882_vm10, %v4063_v15, 0.0 }
0x1a85   : > { %4066 = vadd.xlane.f32.xlu1 %v4065_v29 }
0x1a8b   : > { %v4528_v30 = vpop.permute.xlu0 %4527 }
0x1a8c   : > { %v4530_v27 = vsel %vm882_vm10, %v4528_v30, 0.0 }
0x1a8d   : > { %4531 = vadd.xlane.f32.xlu0 %v4530_v27 }
0x1a95   : > { %4542 = vrot.lane.b32.xlu2 %v7166_v8, %s5628_s24  ;;  %v2672_v8 = vpop.xlane.xlu2 %2671 }
0x1a96   : > { %v2673_v0 = vmul.f32 0.03125, %v2672_v8 }
0x1a98   : > { %v4583_v19 = vsel %vm4582_vm6, %v4581_v52, %v2673_v0 }
0x1a9d   : > { %4546 = vrot.lane.b32.xlu2 %v7182_v53, %s5628_s24 }
0x1a9e   : > { %4544 = vrot.lane.b32.xlu1 %v7180_v51, %s5628_s24 }
0x1aa1   : > { %4554 = vrot.lane.b32.xlu0 %v7210_v61, %s5628_s24 }
0x1aa5   : > { %4550 = vrot.lane.b32.xlu2 %v7196_v48, %s5628_s24 }
0x1aa6   : > { %4548 = vrot.lane.b32.xlu1 %v7178_v17, %s5628_s24 }
0x1aad   : > { %4556 = vrot.lane.b32.xlu2 %v7208_v23, %s5628_s24 }
0x1aae   : > { %4552 = vrot.lane.b32.xlu1 %v7194_v39, %s5628_s24 }
0x1ae8   : > { %v3137_v24 = vpop.xlane.xlu1 %3136 }
0x1ae9   : > { %v3138_v61 = vmul.f32 0.03125, %v3137_v24 }
0x1aeb   : > { %v4585_v23 = vsel %vm4584_vm7, %v4583_v19, %v3138_v61 }
0x1af0   : > { %v3602_v53 = vpop.xlane.xlu2 %3601 }
0x1af1   : > { %v3603_v48 = vmul.f32 0.03125, %v3602_v53 }
0x1af3   : > { %v4587_v39 = vsel %vm4586_vm8, %v4585_v23, %v3603_v48 }
0x1af8   : > { %v4543_v32 = vpop.permute.xlu2 %4542  ;;  %v4067_v51 = vpop.xlane.xlu1 %4066 }
0x1af9   : > { %4566 = vst.msk [vmem:[#allocation2] sm:$0xff] %vm882_vm10, %v4543_v32  ;;  %v4068_v17 = vmul.f32 0.03125, %v4067_v51 }
0x1afb   : > { %v4589_v60 = vsel %vm4588_vm9, %v4587_v39, %v4068_v17 }
0x1b00   : > { %v4547_v4 = vpop.permute.xlu2 %4546  ;;  %v4532_v16 = vpop.xlane.xlu0 %4531 }
0x1b01   : > { %4568 = vst.msk [vmem:[#allocation2 + $0x10] sm:$0xff] %vm882_vm10, %v4547_v4  ;;  %v4533_v20 = vmul.f32 0.03125, %v4532_v16 }
0x1b03   : > { %v4591_v11 = vsel %vm4590_vm11, %v4589_v60, %v4533_v20 }
0x1b04   : > { %4592 = vxpose.xlu1.b32.start.end [1/1] (short) (narrow) %v4591_v11, 8 }
0x1b08   : > { %v4551_v38 = vpop.permute.xlu2 %4550 }
0x1b09   : > { %4570 = vst.msk [vmem:[#allocation2 + $0x20] sm:$0xff] %vm882_vm10, %v4551_v38 }
0x1b10   : > { %v4557_v14 = vpop.permute.xlu2 %4556  ;;  %v4545_v33 = vpop.permute.xlu1 %4544 }
0x1b11   : > { %4573 = vst.msk [vmem:[#allocation2 + $0x38] sm:$0xff] %vm882_vm10, %v4557_v14 }
0x1b12   : > { %4567 = vst.msk [vmem:[#allocation2 + $0x8] sm:$0xff] %vm882_vm10, %v4545_v33 }
0x1b13   : > { %v4555_v42 = vpop.permute.xlu0 %4554 }
0x1b14   : > { %4572 = vst.msk [vmem:[#allocation2 + $0x30] sm:$0xff] %vm882_vm10, %v4555_v42 }
0x1b18   : > { %v4549_v46 = vpop.permute.xlu1 %4548 }
0x1b19   : > { %4569 = vst.msk [vmem:[#allocation2 + $0x18] sm:$0xff] %vm882_vm10, %v4549_v46 }
0x1b20   : > { %v4553_v36 = vpop.permute.xlu1 %4552 }
0x1b21   : > { %4571 = vst.msk [vmem:[#allocation2 + $0x28] sm:$0xff] %vm882_vm10, %v4553_v36 }
0x1ba8   : > { %v4608_v25 = vpop.trf.xlu1 }
0x1ba9   : > { %4626 = vst.msk [vmem:[%s4625_s25] sm:$0xff] %vm4576_vm12, %v4608_v25 }
0x1baa PF: > { %s24_s14 = sadd.s32 1, %s5620_s14   ;;  %s7338_s22 = sld [smem:[#allocation18_spill]] }
0x1bab   : > { %p21_p3 = scmp.ge.s32.totalorder %s24_s14, 4   ;;  %s7339_s12 = sld [smem:[#allocation16_spill]] }
0x1bac   : > { %s7340_s13 = sld [smem:[#allocation17_spill]]  ;;  %s7341_s30 = smov %s5604_s10 }
0x1bad   : > { %s7342_s10 = smov %s5608_s11  ;;  %23 = sbr.rel (!%p21_p3) target bundleno = 12 (0xc), region = 160 }
0x1bb0   : > { %s7343_s11 = smov %s7338_s22 }
0x1bb2   :  { %4646 = vsyncpa [#allocation6], 1 }
0x1bb3   :  { %4648 = vsyncpa [#allocation6 + $0x1], 1 }
0x1bb4   :  { %4649 = vsyncpa [#allocation8], 1 }
0x1bb5   :  { %4651 = vsyncpa [#allocation8 + $0x1], 1 }
0x1bb6   :  { %4652 = vsyncpa [#allocation11], 1 }

</bundles_post_ra>
